<compile_context>
chip_gen: v5e
topology: v5e:2x2
jax: 0.10.0
libtpu: 0.0.40
codegen_flags: <defaults>
</compile_context>

<pallas_src>
import functools

import jax
import jax.numpy as jnp
import numpy as np
from jax import lax
from jax.experimental import pallas as pl
from jax.experimental.pallas import tpu as pltpu


# ---------------------------------------------------------------------------
# Kernel 1: hoisted, tiled input projection -> gate-major GI for both directions
# ---------------------------------------------------------------------------
def _make_input_proj_kernel(Tt, B_pad, D, H):
    def kernel(x_ref, wf_ref, wb_ref, bf_ref, bb_ref, gif_ref, gib_ref):
        # x_ref: (Tt, B_pad, D); w*_ref: (D, 3H); b*_ref: (1, 3H)
        # gi*_ref: (Tt, 3, B_pad, H)  gate-major output.
        x2 = x_ref[...].reshape(Tt * B_pad, D)
        yf = (jnp.dot(x2, wf_ref[...], preferred_element_type=jnp.float32)
              + bf_ref[...]).reshape(Tt, B_pad, 3 * H)
        yb = (jnp.dot(x2, wb_ref[...], preferred_element_type=jnp.float32)
              + bb_ref[...]).reshape(Tt, B_pad, 3 * H)
        for g in range(3):                      # static gate slabs -> gate-major store
            gif_ref[:, g] = yf[:, :, g * H:(g + 1) * H]
            gib_ref[:, g] = yb[:, :, g * H:(g + 1) * H]

    return kernel


# ---------------------------------------------------------------------------
# Kernel 2: bidirectional GRU recurrence over blocks of Tt timesteps (+ fused FC)
# ---------------------------------------------------------------------------
def _make_recurrent_kernel(T, T_pad, Tt, B_pad, H):
    need_mask = (T_pad != T)

    def kernel(gif_ref, gib_ref, whf_ref, whb_ref,
               bhnf_ref, bhnb_ref, wfcf_ref, wfcb_ref, bfc_ref,
               out_ref, hf_ref, hb_ref):
        tb = pl.program_id(0)
        nb = pl.num_programs(0)

        @pl.when(tb == 0)
        def _():
            hf_ref[...] = jnp.zeros_like(hf_ref)
            hb_ref[...] = jnp.zeros_like(hb_ref)

        # Hoist time-invariant loads / broadcasts out of the unrolled loop.
        whf = whf_ref[...]                                         # (3, H, H)
        whb = whb_ref[...]                                         # (3, H, H)
        bhn_f = jnp.broadcast_to(bhnf_ref[...], (B_pad, H))        # (B_pad, H)
        bhn_b = jnp.broadcast_to(bhnb_ref[...], (B_pad, H))        # (B_pad, H)

        base = tb * Tt

        def cell(gi, h, wh, bhn):
            # PyTorch GRU cell, gate order (r, z, n); b_ih (+ b_hr/b_hz) already in gi.
            r = jax.nn.sigmoid(
                gi[0] + jnp.dot(h, wh[0], preferred_element_type=jnp.float32))
            z = jax.nn.sigmoid(
                gi[1] + jnp.dot(h, wh[1], preferred_element_type=jnp.float32))
            n = jnp.tanh(
                gi[2] + r * (jnp.dot(h, wh[2],
                                     preferred_element_type=jnp.float32) + bhn))
            return (1.0 - z) * n + z * h

        def step(i, carry):
            hf, hb = carry
            s = base + i                       # global step index 0..T_pad-1
            hf_new = cell(gif_ref[i], hf, whf, bhn_f)             # time = s
            hb_new = cell(gib_ref[Tt - 1 - i], hb, whb, bhn_b)    # time = T_pad-1-s
            if not need_mask:
                return hf_new, hb_new
            hf = jnp.where(s < T, hf_new, hf)                     # skip padded tail
            hb = jnp.where(s >= T_pad - T, hb_new, hb)            # skip padded head
            return hf, hb

        hf, hb = lax.fori_loop(0, Tt, step, (hf_ref[...], hb_ref[...]),
                               unroll=True)
        hf_ref[...] = hf
        hb_ref[...] = hb

        @pl.when(tb == nb - 1)
        def _():
            # out = cat(hf, hb) @ W_fc + b_fc  without the lane-axis concat.
            out_ref[...] = (
                jnp.dot(hf, wfcf_ref[...], preferred_element_type=jnp.float32)
                + jnp.dot(hb, wfcb_ref[...], preferred_element_type=jnp.float32)
                + bfc_ref[...]
            )

    return kernel


# ---------------------------------------------------------------------------
# Wrapper
# ---------------------------------------------------------------------------
@jax.jit
def gru_model_pallas(x, params):
    """x: (B, T, D) batch-first float32.  Returns (B, 1)."""
    B, T, D = x.shape
    H = params["whf"].shape[-1]

    SUB = 8                                    # f32 sublane width
    B_pad = ((B + SUB - 1) // SUB) * SUB
    Tt = min(T, 16)                            # timesteps per grid iteration
    T_pad = ((T + Tt - 1) // Tt) * Tt
    nb = T_pad // Tt

    # time-major, padded input: (T_pad, B_pad, D)  (small one-time copy)
    x_tm = jnp.transpose(x, (1, 0, 2))
    x_tm = jnp.pad(x_tm, ((0, T_pad - T), (0, B_pad - B), (0, 0)))

    # ---- input-projection weights: columns [r, z, n] per direction ----
    w_f = jnp.transpose(params["wif"], (1, 0, 2)).reshape(D, 3 * H)
    w_b = jnp.transpose(params["wib"], (1, 0, 2)).reshape(D, 3 * H)
    b_f = jnp.concatenate([params["bif"][0] + params["bhf"][0],
                           params["bif"][1] + params["bhf"][1],
                           params["bif"][2]]).reshape(1, 3 * H)
    b_b = jnp.concatenate([params["bib"][0] + params["bhb"][0],
                           params["bib"][1] + params["bhb"][1],
                           params["bib"][2]]).reshape(1, 3 * H)

    full2 = lambda shape: pl.BlockSpec(shape, lambda tb: (0, 0))

    # ---- kernel 1: tiled input projection, gate-major GI output ----
    proj_grid = pltpu.PrefetchScalarGridSpec(
        num_scalar_prefetch=0,
        grid=(nb,),
        in_specs=[
            pl.BlockSpec((Tt, B_pad, D), lambda tb: (tb, 0, 0)),   # x time-block
            full2((D, 3 * H)),                                     # W_ih forward
            full2((D, 3 * H)),                                     # W_ih backward
            full2((1, 3 * H)),                                     # bias forward
            full2((1, 3 * H)),                                     # bias backward
        ],
        out_specs=[
            pl.BlockSpec((Tt, 3, B_pad, H), lambda tb: (tb, 0, 0, 0)),
            pl.BlockSpec((Tt, 3, B_pad, H), lambda tb: (tb, 0, 0, 0)),
        ],
    )
    gi_f, gi_b = pl.pallas_call(
        _make_input_proj_kernel(Tt, B_pad, D, H),
        out_shape=(jax.ShapeDtypeStruct((T_pad, 3, B_pad, H), jnp.float32),
                   jax.ShapeDtypeStruct((T_pad, 3, B_pad, H), jnp.float32)),
        grid_spec=proj_grid,
        compiler_params=pltpu.CompilerParams(
            dimension_semantics=("parallel",)),    # time blocks independent
    )(x_tm, w_f, w_b, b_f, b_b)

    # remaining small params
    bhn_f = params["bhf"][2].reshape(1, H)
    bhn_b = params["bhb"][2].reshape(1, H)
    wfc_f = params["wfc"][:H]                  # (H, 1)
    wfc_b = params["wfc"][H:]                  # (H, 1)
    bfc = params["bfc"]                        # (1, 1)

    full3 = lambda shape: pl.BlockSpec(shape, lambda tb: (0, 0, 0))

    # ---- kernel 2: sequential recurrence + fused final FC ----
    rec_grid = pltpu.PrefetchScalarGridSpec(
        num_scalar_prefetch=0,
        grid=(nb,),
        in_specs=[
            # GI forward: time-blocks in forward order
            pl.BlockSpec((Tt, 3, B_pad, H), lambda tb: (tb, 0, 0, 0)),
            # GI backward: same storage order, reversed block index (no copy)
            pl.BlockSpec((Tt, 3, B_pad, H), lambda tb: (nb - 1 - tb, 0, 0, 0)),
            full3((3, H, H)),                  # W_hh forward (gate-major)
            full3((3, H, H)),                  # W_hh backward
            full2((1, H)),                     # b_hn forward
            full2((1, H)),                     # b_hn backward
            full2((H, 1)),                     # fc weight (forward half)
            full2((H, 1)),                     # fc weight (backward half)
            full2((1, 1)),                     # fc bias
        ],
        out_specs=pl.BlockSpec((B_pad, 1), lambda tb: (0, 0)),
        scratch_shapes=[
            pltpu.VMEM((B_pad, H), jnp.float32),   # h_forward carry
            pltpu.VMEM((B_pad, H), jnp.float32),   # h_backward carry
        ],
    )

    out_full = pl.pallas_call(
        _make_recurrent_kernel(T, T_pad, Tt, B_pad, H),
        out_shape=jax.ShapeDtypeStruct((B_pad, 1), jnp.float32),
        grid_spec=rec_grid,
        compiler_params=pltpu.CompilerParams(
            dimension_semantics=("arbitrary",)),   # recurrence -> sequential
    )(gi_f, gi_b,
      params["whf"], params["whb"], bhn_f, bhn_b, wfc_f, wfc_b, bfc)

    return out_full[:B]


# ---------------------------------------------------------------------------
# Pure-JAX reference mirroring torch semantics (correctness check)
# ---------------------------------------------------------------------------
def gru_model_ref(x, params):
    B, T, D = x.shape
    H = params["whf"].shape[-1]

    def cell(h, xt, wi, wh, bi, bh):
        r = jax.nn.sigmoid(xt @ wi[0] + bi[0] + h @ wh[0] + bh[0])
        z = jax.nn.sigmoid(xt @ wi[1] + bi[1] + h @ wh[1] + bh[1])
        n = jnp.tanh(xt @ wi[2] + bi[2] + r * (h @ wh[2] + bh[2]))
        return (1.0 - z) * n + z * h

    hf = jnp.zeros((B, H), jnp.float32)
    hb = jnp.zeros((B, H), jnp.float32)
    for t in range(T):
        hf = cell(hf, x[:, t], params["wif"], params["whf"],
                  params["bif"], params["bhf"])
    for t in range(T - 1, -1, -1):
        hb = cell(hb, x[:, t], params["wib"], params["whb"],
                  params["bib"], params["bhb"])
    h_cat = jnp.concatenate([hf, hb], axis=1)
    return h_cat @ params["wfc"] + params["bfc"]


def init_params(key, input_dim, hidden_dim):
    """Deterministic synthetic init, gate-major layout, same math as
    nn.GRU(bidirectional=True) + Linear(2H, 1)."""
    D, H = input_dim, hidden_dim
    scale = 1.0 / np.sqrt(H)
    ks = jax.random.split(key, 12)
    u = lambda k, shape: jax.random.uniform(k, shape, jnp.float32, -scale, scale)
    return {
        # forward direction, gate order (r, z, n) on the leading axis
        "wif": u(ks[0], (3, D, H)), "whf": u(ks[1], (3, H, H)),
        "bif": u(ks[2], (3, H)), "bhf": u(ks[3], (3, H)),
        # backward direction
        "wib": u(ks[4], (3, D, H)), "whb": u(ks[5], (3, H, H)),
        "bib": u(ks[6], (3, H)), "bhb": u(ks[7], (3, H)),
        # fc: Linear(2H, 1)
        "wfc": u(ks[8], (2 * H, 1)), "bfc": u(ks[9], (1, 1)),
    }


if __name__ == "__main__":
    B, T, D, H = 2, 8, 8, 32

    key = jax.random.PRNGKey(0)
    kx, kp = jax.random.split(key)
    x = jax.random.normal(kx, (B, T, D), jnp.float32)
    params = init_params(kp, D, H)

    out = gru_model_pallas(x, params)
    out = jax.block_until_ready(out)

    ref = gru_model_ref(x, params)
    assert out.shape == (B, 1), out.shape
    np.testing.assert_allclose(np.asarray(out), np.asarray(ref),
                               rtol=1e-5, atol=1e-5)
    print("KERNEL_OK")
</pallas_src>

<mosaic_0001>
module attributes {stable_mosaic.version = 11 : i64} {
  func.func @kernel(%arg0: i32, %arg1: memref<8x8x8xf32, #tpu.memory_space<vmem>>, %arg2: memref<8x96xf32, #tpu.memory_space<vmem>>, %arg3: memref<8x96xf32, #tpu.memory_space<vmem>>, %arg4: memref<1x96xf32, #tpu.memory_space<vmem>>, %arg5: memref<1x96xf32, #tpu.memory_space<vmem>>, %arg6: memref<8x3x8x32xf32, #tpu.memory_space<vmem>>, %arg7: memref<8x3x8x32xf32, #tpu.memory_space<vmem>>) attributes {dimension_semantics = [#tpu.dimension_semantics<parallel>], iteration_bounds = array<i64: 1>, scalar_prefetch = 0 : i64, scratch_operands = 0 : i64, tpu.core_type = #tpu.core_type<tc>, window_params = [{transform_indices = @transform_0, window_bounds = array<i64: 8, 8, 8>}, {pipeline_mode = #tpu.pipeline_mode<synchronous>, transform_indices = @transform_1, window_bounds = array<i64: 8, 96>}, {pipeline_mode = #tpu.pipeline_mode<synchronous>, transform_indices = @transform_2, window_bounds = array<i64: 8, 96>}, {pipeline_mode = #tpu.pipeline_mode<synchronous>, transform_indices = @transform_3, window_bounds = array<i64: 1, 96>}, {pipeline_mode = #tpu.pipeline_mode<synchronous>, transform_indices = @transform_4, window_bounds = array<i64: 1, 96>}, {transform_indices = @transform_5, window_bounds = array<i64: 8, 3, 8, 32>}, {transform_indices = @transform_6, window_bounds = array<i64: 8, 3, 8, 32>}]} {
    %c0 = arith.constant 0 : index
    %c0_0 = arith.constant 0 : index
    %c0_1 = arith.constant 0 : index
    %0 = vector.load %arg1[%c0, %c0_0, %c0_1] : memref<8x8x8xf32, #tpu.memory_space<vmem>>, vector<8x8x8xf32>
    %1 = vector.shape_cast %0 : vector<8x8x8xf32> to vector<64x8xf32>
    %c0_2 = arith.constant 0 : index
    %c0_3 = arith.constant 0 : index
    %2 = vector.load %arg2[%c0_2, %c0_3] : memref<8x96xf32, #tpu.memory_space<vmem>>, vector<8x96xf32>
    %cst = arith.constant dense<0.000000e+00> : vector<64x96xf32>
    %3 = tpu.matmul %1, %2, %cst {dimension_numbers = #tpu.dot_dimension_numbers<[1], [0], [0], [1], [0, 0, 1, 1], [], []>} : vector<64x8xf32>, vector<8x96xf32>, vector<64x96xf32> -> vector<64x96xf32>
    %c0_4 = arith.constant 0 : index
    %c0_5 = arith.constant 0 : index
    %4 = vector.load %arg4[%c0_4, %c0_5] : memref<1x96xf32, #tpu.memory_space<vmem>>, vector<1x96xf32>
    %5 = vector.broadcast %4 : vector<1x96xf32> to vector<64x96xf32>
    %6 = arith.addf %3, %5 : vector<64x96xf32>
    %7 = vector.shape_cast %6 : vector<64x96xf32> to vector<8x8x96xf32>
    %c0_6 = arith.constant 0 : index
    %c0_7 = arith.constant 0 : index
    %8 = vector.load %arg3[%c0_6, %c0_7] : memref<8x96xf32, #tpu.memory_space<vmem>>, vector<8x96xf32>
    %cst_8 = arith.constant dense<0.000000e+00> : vector<64x96xf32>
    %9 = tpu.matmul %1, %8, %cst_8 {dimension_numbers = #tpu.dot_dimension_numbers<[1], [0], [0], [1], [0, 0, 1, 1], [], []>} : vector<64x8xf32>, vector<8x96xf32>, vector<64x96xf32> -> vector<64x96xf32>
    %c0_9 = arith.constant 0 : index
    %c0_10 = arith.constant 0 : index
    %10 = vector.load %arg5[%c0_9, %c0_10] : memref<1x96xf32, #tpu.memory_space<vmem>>, vector<1x96xf32>
    %11 = vector.broadcast %10 : vector<1x96xf32> to vector<64x96xf32>
    %12 = arith.addf %9, %11 : vector<64x96xf32>
    %13 = vector.shape_cast %12 : vector<64x96xf32> to vector<8x8x96xf32>
    %14 = vector.extract_strided_slice %7 {offsets = [0, 0, 0], sizes = [8, 8, 32], strides = [1, 1, 1]} : vector<8x8x96xf32> to vector<8x8x32xf32>
    %c0_11 = arith.constant 0 : index
    %c0_12 = arith.constant 0 : index
    %c0_13 = arith.constant 0 : index
    %c0_14 = arith.constant 0 : index
    %15 = vector.load %arg6[%c0_11, %c0_12, %c0_13, %c0_14] : memref<8x3x8x32xf32, #tpu.memory_space<vmem>>, vector<8x1x8x32xf32>
    %16 = vector.shape_cast %15 : vector<8x1x8x32xf32> to vector<8x8x32xf32>
    %17 = vector.shape_cast %14 : vector<8x8x32xf32> to vector<8x1x8x32xf32>
    tpu.vector_store %arg6[%c0_11, %c0_12, %c0_13, %c0_14], %17 {strides = array<i32>} : memref<8x3x8x32xf32, #tpu.memory_space<vmem>>, vector<8x1x8x32xf32>,
    %18 = vector.extract_strided_slice %13 {offsets = [0, 0, 0], sizes = [8, 8, 32], strides = [1, 1, 1]} : vector<8x8x96xf32> to vector<8x8x32xf32>
    %c0_15 = arith.constant 0 : index
    %c0_16 = arith.constant 0 : index
    %c0_17 = arith.constant 0 : index
    %c0_18 = arith.constant 0 : index
    %19 = vector.load %arg7[%c0_15, %c0_16, %c0_17, %c0_18] : memref<8x3x8x32xf32, #tpu.memory_space<vmem>>, vector<8x1x8x32xf32>
    %20 = vector.shape_cast %19 : vector<8x1x8x32xf32> to vector<8x8x32xf32>
    %21 = vector.shape_cast %18 : vector<8x8x32xf32> to vector<8x1x8x32xf32>
    tpu.vector_store %arg7[%c0_15, %c0_16, %c0_17, %c0_18], %21 {strides = array<i32>} : memref<8x3x8x32xf32, #tpu.memory_space<vmem>>, vector<8x1x8x32xf32>,
    %22 = vector.extract_strided_slice %7 {offsets = [0, 0, 32], sizes = [8, 8, 32], strides = [1, 1, 1]} : vector<8x8x96xf32> to vector<8x8x32xf32>
    %c0_19 = arith.constant 0 : index
    %c1 = arith.constant 1 : index
    %c0_20 = arith.constant 0 : index
    %c0_21 = arith.constant 0 : index
    %23 = vector.load %arg6[%c0_19, %c1, %c0_20, %c0_21] : memref<8x3x8x32xf32, #tpu.memory_space<vmem>>, vector<8x1x8x32xf32>
    %24 = vector.shape_cast %23 : vector<8x1x8x32xf32> to vector<8x8x32xf32>
    %25 = vector.shape_cast %22 : vector<8x8x32xf32> to vector<8x1x8x32xf32>
    tpu.vector_store %arg6[%c0_19, %c1, %c0_20, %c0_21], %25 {strides = array<i32>} : memref<8x3x8x32xf32, #tpu.memory_space<vmem>>, vector<8x1x8x32xf32>,
    %26 = vector.extract_strided_slice %13 {offsets = [0, 0, 32], sizes = [8, 8, 32], strides = [1, 1, 1]} : vector<8x8x96xf32> to vector<8x8x32xf32>
    %c0_22 = arith.constant 0 : index
    %c1_23 = arith.constant 1 : index
    %c0_24 = arith.constant 0 : index
    %c0_25 = arith.constant 0 : index
    %27 = vector.load %arg7[%c0_22, %c1_23, %c0_24, %c0_25] : memref<8x3x8x32xf32, #tpu.memory_space<vmem>>, vector<8x1x8x32xf32>
    %28 = vector.shape_cast %27 : vector<8x1x8x32xf32> to vector<8x8x32xf32>
    %29 = vector.shape_cast %26 : vector<8x8x32xf32> to vector<8x1x8x32xf32>
    tpu.vector_store %arg7[%c0_22, %c1_23, %c0_24, %c0_25], %29 {strides = array<i32>} : memref<8x3x8x32xf32, #tpu.memory_space<vmem>>, vector<8x1x8x32xf32>,
    %30 = vector.extract_strided_slice %7 {offsets = [0, 0, 64], sizes = [8, 8, 32], strides = [1, 1, 1]} : vector<8x8x96xf32> to vector<8x8x32xf32>
    %c0_26 = arith.constant 0 : index
    %c2 = arith.constant 2 : index
    %c0_27 = arith.constant 0 : index
    %c0_28 = arith.constant 0 : index
    %31 = vector.load %arg6[%c0_26, %c2, %c0_27, %c0_28] : memref<8x3x8x32xf32, #tpu.memory_space<vmem>>, vector<8x1x8x32xf32>
    %32 = vector.shape_cast %31 : vector<8x1x8x32xf32> to vector<8x8x32xf32>
    %33 = vector.shape_cast %30 : vector<8x8x32xf32> to vector<8x1x8x32xf32>
    tpu.vector_store %arg6[%c0_26, %c2, %c0_27, %c0_28], %33 {strides = array<i32>} : memref<8x3x8x32xf32, #tpu.memory_space<vmem>>, vector<8x1x8x32xf32>,
    %34 = vector.extract_strided_slice %13 {offsets = [0, 0, 64], sizes = [8, 8, 32], strides = [1, 1, 1]} : vector<8x8x96xf32> to vector<8x8x32xf32>
    %c0_29 = arith.constant 0 : index
    %c2_30 = arith.constant 2 : index
    %c0_31 = arith.constant 0 : index
    %c0_32 = arith.constant 0 : index
    %35 = vector.load %arg7[%c0_29, %c2_30, %c0_31, %c0_32] : memref<8x3x8x32xf32, #tpu.memory_space<vmem>>, vector<8x1x8x32xf32>
    %36 = vector.shape_cast %35 : vector<8x1x8x32xf32> to vector<8x8x32xf32>
    %37 = vector.shape_cast %34 : vector<8x8x32xf32> to vector<8x1x8x32xf32>
    tpu.vector_store %arg7[%c0_29, %c2_30, %c0_31, %c0_32], %37 {strides = array<i32>} : memref<8x3x8x32xf32, #tpu.memory_space<vmem>>, vector<8x1x8x32xf32>,
    return
  }
  func.func @transform_0(%arg0: i32) -> (i32, i32, i32) {
    %c0_i32 = arith.constant 0 : i32
    %c0_i32_0 = arith.constant 0 : i32
    %c0_i32_1 = arith.constant 0 : i32
    return %arg0, %c0_i32, %c0_i32_0 : i32, i32, i32
  }
  func.func @transform_1(%arg0: i32) -> (i32, i32) {
    %c0_i32 = arith.constant 0 : i32
    %c0_i32_0 = arith.constant 0 : i32
    %c0_i32_1 = arith.constant 0 : i32
    return %c0_i32, %c0_i32_0 : i32, i32
  }
  func.func @transform_2(%arg0: i32) -> (i32, i32) {
    %c0_i32 = arith.constant 0 : i32
    %c0_i32_0 = arith.constant 0 : i32
    %c0_i32_1 = arith.constant 0 : i32
    return %c0_i32, %c0_i32_0 : i32, i32
  }
  func.func @transform_3(%arg0: i32) -> (i32, i32) {
    %c0_i32 = arith.constant 0 : i32
    %c0_i32_0 = arith.constant 0 : i32
    %c0_i32_1 = arith.constant 0 : i32
    return %c0_i32, %c0_i32_0 : i32, i32
  }
  func.func @transform_4(%arg0: i32) -> (i32, i32) {
    %c0_i32 = arith.constant 0 : i32
    %c0_i32_0 = arith.constant 0 : i32
    %c0_i32_1 = arith.constant 0 : i32
    return %c0_i32, %c0_i32_0 : i32, i32
  }
  func.func @transform_5(%arg0: i32) -> (i32, i32, i32, i32) {
    %c0_i32 = arith.constant 0 : i32
    %c0_i32_0 = arith.constant 0 : i32
    %c0_i32_1 = arith.constant 0 : i32
    %c0_i32_2 = arith.constant 0 : i32
    return %arg0, %c0_i32, %c0_i32_0, %c0_i32_1 : i32, i32, i32, i32
  }
  func.func @transform_6(%arg0: i32) -> (i32, i32, i32, i32) {
    %c0_i32 = arith.constant 0 : i32
    %c0_i32_0 = arith.constant 0 : i32
    %c0_i32_1 = arith.constant 0 : i32
    %c0_i32_2 = arith.constant 0 : i32
    return %arg0, %c0_i32, %c0_i32_0, %c0_i32_1 : i32, i32, i32, i32
  }
}

module attributes {stable_mosaic.version = 11 : i64} {
  func.func @kernel(%arg0: i32, %arg1: memref<8x3x8x32xf32, #tpu.memory_space<vmem>>, %arg2: memref<8x3x8x32xf32, #tpu.memory_space<vmem>>, %arg3: memref<3x32x32xf32, #tpu.memory_space<vmem>>, %arg4: memref<3x32x32xf32, #tpu.memory_space<vmem>>, %arg5: memref<1x32xf32, #tpu.memory_space<vmem>>, %arg6: memref<1x32xf32, #tpu.memory_space<vmem>>, %arg7: memref<32x1xf32, #tpu.memory_space<vmem>>, %arg8: memref<32x1xf32, #tpu.memory_space<vmem>>, %arg9: memref<1x1xf32, #tpu.memory_space<vmem>>, %arg10: memref<8x1xf32, #tpu.memory_space<vmem>>, %arg11: memref<8x32xf32, #tpu.memory_space<vmem>>, %arg12: memref<8x32xf32, #tpu.memory_space<vmem>>) attributes {dimension_semantics = [#tpu.dimension_semantics<arbitrary>], iteration_bounds = array<i64: 1>, scalar_prefetch = 0 : i64, scratch_operands = 2 : i64, tpu.core_type = #tpu.core_type<tc>, window_params = [{transform_indices = @transform_0, window_bounds = array<i64: 8, 3, 8, 32>}, {transform_indices = @transform_1, window_bounds = array<i64: 8, 3, 8, 32>}, {pipeline_mode = #tpu.pipeline_mode<synchronous>, transform_indices = @transform_2, window_bounds = array<i64: 3, 32, 32>}, {pipeline_mode = #tpu.pipeline_mode<synchronous>, transform_indices = @transform_3, window_bounds = array<i64: 3, 32, 32>}, {pipeline_mode = #tpu.pipeline_mode<synchronous>, transform_indices = @transform_4, window_bounds = array<i64: 1, 32>}, {pipeline_mode = #tpu.pipeline_mode<synchronous>, transform_indices = @transform_5, window_bounds = array<i64: 1, 32>}, {pipeline_mode = #tpu.pipeline_mode<synchronous>, transform_indices = @transform_6, window_bounds = array<i64: 32, 1>}, {pipeline_mode = #tpu.pipeline_mode<synchronous>, transform_indices = @transform_7, window_bounds = array<i64: 32, 1>}, {pipeline_mode = #tpu.pipeline_mode<synchronous>, transform_indices = @transform_8, window_bounds = array<i64: 1, 1>}, {pipeline_mode = #tpu.pipeline_mode<synchronous>, transform_indices = @transform_9, window_bounds = array<i64: 8, 1>}]} {
    %c0_i32 = arith.constant 0 : i32
    %0 = arith.cmpi eq, %arg0, %c0_i32 : i32
    %1 = arith.extui %0 : i1 to i32
    %c0_i32_0 = arith.constant 0 : i32
    %2 = arith.cmpi ne, %1, %c0_i32_0 : i32
    scf.if %2 {
      %cst_172 = arith.constant 0.000000e+00 : f32
      %650 = vector.broadcast %cst_172 : f32 to vector<8x32xf32>
      %c0_173 = arith.constant 0 : index
      %c0_174 = arith.constant 0 : index
      %651 = vector.load %arg11[%c0_173, %c0_174] : memref<8x32xf32, #tpu.memory_space<vmem>>, vector<8x32xf32>
      tpu.vector_store %arg11[%c0_173, %c0_174], %650 {strides = array<i32>} : memref<8x32xf32, #tpu.memory_space<vmem>>, vector<8x32xf32>,
      %cst_175 = arith.constant 0.000000e+00 : f32
      %652 = vector.broadcast %cst_175 : f32 to vector<8x32xf32>
      %c0_176 = arith.constant 0 : index
      %c0_177 = arith.constant 0 : index
      %653 = vector.load %arg12[%c0_176, %c0_177] : memref<8x32xf32, #tpu.memory_space<vmem>>, vector<8x32xf32>
      tpu.vector_store %arg12[%c0_176, %c0_177], %652 {strides = array<i32>} : memref<8x32xf32, #tpu.memory_space<vmem>>, vector<8x32xf32>,
    } else {
    }
    %c0 = arith.constant 0 : index
    %c0_1 = arith.constant 0 : index
    %c0_2 = arith.constant 0 : index
    %3 = vector.load %arg3[%c0, %c0_1, %c0_2] : memref<3x32x32xf32, #tpu.memory_space<vmem>>, vector<3x32x32xf32>
    %c0_3 = arith.constant 0 : index
    %c0_4 = arith.constant 0 : index
    %c0_5 = arith.constant 0 : index
    %4 = vector.load %arg4[%c0_3, %c0_4, %c0_5] : memref<3x32x32xf32, #tpu.memory_space<vmem>>, vector<3x32x32xf32>
    %c0_6 = arith.constant 0 : index
    %c0_7 = arith.constant 0 : index
    %5 = vector.load %arg5[%c0_6, %c0_7] : memref<1x32xf32, #tpu.memory_space<vmem>>, vector<1x32xf32>
    %6 = vector.shape_cast %5 : vector<1x32xf32> to vector<1x32xf32>
    %7 = vector.broadcast %6 : vector<1x32xf32> to vector<8x32xf32>
    %c0_8 = arith.constant 0 : index
    %c0_9 = arith.constant 0 : index
    %8 = vector.load %arg6[%c0_8, %c0_9] : memref<1x32xf32, #tpu.memory_space<vmem>>, vector<1x32xf32>
    %9 = vector.shape_cast %8 : vector<1x32xf32> to vector<1x32xf32>
    %10 = vector.broadcast %9 : vector<1x32xf32> to vector<8x32xf32>
    %c0_10 = arith.constant 0 : index
    %c0_11 = arith.constant 0 : index
    %11 = vector.load %arg11[%c0_10, %c0_11] : memref<8x32xf32, #tpu.memory_space<vmem>>, vector<8x32xf32>
    %c0_12 = arith.constant 0 : index
    %c0_13 = arith.constant 0 : index
    %12 = vector.load %arg12[%c0_12, %c0_13] : memref<8x32xf32, #tpu.memory_space<vmem>>, vector<8x32xf32>
    %c0_i32_14 = arith.constant 0 : i32
    %13 = arith.index_cast %c0_i32_14 : i32 to index
    %c0_15 = arith.constant 0 : index
    %c0_16 = arith.constant 0 : index
    %c0_17 = arith.constant 0 : index
    %14 = vector.load %arg1[%13, %c0_15, %c0_16, %c0_17] : memref<8x3x8x32xf32, #tpu.memory_space<vmem>>, vector<1x3x8x32xf32>
    %15 = vector.shape_cast %14 : vector<1x3x8x32xf32> to vector<3x8x32xf32>
    %16 = vector.extract_strided_slice %15 {offsets = [0, 0, 0], sizes = [1, 8, 32], strides = [1, 1, 1]} : vector<3x8x32xf32> to vector<1x8x32xf32>
    %17 = vector.shape_cast %16 : vector<1x8x32xf32> to vector<8x32xf32>
    %18 = vector.extract_strided_slice %3 {offsets = [0, 0, 0], sizes = [1, 32, 32], strides = [1, 1, 1]} : vector<3x32x32xf32> to vector<1x32x32xf32>
    %19 = vector.shape_cast %18 : vector<1x32x32xf32> to vector<32x32xf32>
    %cst = arith.constant dense<0.000000e+00> : vector<8x32xf32>
    %20 = tpu.matmul %11, %19, %cst {dimension_numbers = #tpu.dot_dimension_numbers<[1], [0], [0], [1], [0, 0, 1, 1], [], []>} : vector<8x32xf32>, vector<32x32xf32>, vector<8x32xf32> -> vector<8x32xf32>
    %21 = arith.addf %17, %20 : vector<8x32xf32>
    %22 = arith.negf %21 : vector<8x32xf32>
    %23 = math.exp %22 : vector<8x32xf32>
    %cst_18 = arith.constant 1.000000e+00 : f32
    %24 = vector.broadcast %cst_18 : f32 to vector<8x32xf32>
    %25 = arith.addf %24, %23 : vector<8x32xf32>
    %26 = arith.divf %24, %25 : vector<8x32xf32>
    %27 = vector.extract_strided_slice %15 {offsets = [1, 0, 0], sizes = [1, 8, 32], strides = [1, 1, 1]} : vector<3x8x32xf32> to vector<1x8x32xf32>
    %28 = vector.shape_cast %27 : vector<1x8x32xf32> to vector<8x32xf32>
    %29 = vector.extract_strided_slice %3 {offsets = [1, 0, 0], sizes = [1, 32, 32], strides = [1, 1, 1]} : vector<3x32x32xf32> to vector<1x32x32xf32>
    %30 = vector.shape_cast %29 : vector<1x32x32xf32> to vector<32x32xf32>
    %cst_19 = arith.constant dense<0.000000e+00> : vector<8x32xf32>
    %31 = tpu.matmul %11, %30, %cst_19 {dimension_numbers = #tpu.dot_dimension_numbers<[1], [0], [0], [1], [0, 0, 1, 1], [], []>} : vector<8x32xf32>, vector<32x32xf32>, vector<8x32xf32> -> vector<8x32xf32>
    %32 = arith.addf %28, %31 : vector<8x32xf32>
    %33 = arith.negf %32 : vector<8x32xf32>
    %34 = math.exp %33 : vector<8x32xf32>
    %cst_20 = arith.constant 1.000000e+00 : f32
    %35 = vector.broadcast %cst_20 : f32 to vector<8x32xf32>
    %36 = arith.addf %35, %34 : vector<8x32xf32>
    %37 = arith.divf %35, %36 : vector<8x32xf32>
    %38 = vector.extract_strided_slice %15 {offsets = [2, 0, 0], sizes = [1, 8, 32], strides = [1, 1, 1]} : vector<3x8x32xf32> to vector<1x8x32xf32>
    %39 = vector.shape_cast %38 : vector<1x8x32xf32> to vector<8x32xf32>
    %40 = vector.extract_strided_slice %3 {offsets = [2, 0, 0], sizes = [1, 32, 32], strides = [1, 1, 1]} : vector<3x32x32xf32> to vector<1x32x32xf32>
    %41 = vector.shape_cast %40 : vector<1x32x32xf32> to vector<32x32xf32>
    %cst_21 = arith.constant dense<0.000000e+00> : vector<8x32xf32>
    %42 = tpu.matmul %11, %41, %cst_21 {dimension_numbers = #tpu.dot_dimension_numbers<[1], [0], [0], [1], [0, 0, 1, 1], [], []>} : vector<8x32xf32>, vector<32x32xf32>, vector<8x32xf32> -> vector<8x32xf32>
    %43 = arith.addf %42, %7 : vector<8x32xf32>
    %44 = arith.mulf %26, %43 : vector<8x32xf32>
    %45 = arith.addf %39, %44 : vector<8x32xf32>
    %46 = math.tanh %45 : vector<8x32xf32>
    %cst_22 = arith.constant 1.000000e+00 : f32
    %47 = vector.broadcast %cst_22 : f32 to vector<8x32xf32>
    %48 = arith.subf %47, %37 : vector<8x32xf32>
    %49 = arith.mulf %48, %46 : vector<8x32xf32>
    %50 = arith.mulf %37, %11 : vector<8x32xf32>
    %51 = arith.addf %49, %50 : vector<8x32xf32>
    %c7_i32 = arith.constant 7 : i32
    %52 = arith.subi %c7_i32, %c0_i32_14 : i32
    %53 = arith.index_cast %52 : i32 to index
    %c0_23 = arith.constant 0 : index
    %c0_24 = arith.constant 0 : index
    %c0_25 = arith.constant 0 : index
    %54 = vector.load %arg2[%53, %c0_23, %c0_24, %c0_25] : memref<8x3x8x32xf32, #tpu.memory_space<vmem>>, vector<1x3x8x32xf32>
    %55 = vector.shape_cast %54 : vector<1x3x8x32xf32> to vector<3x8x32xf32>
    %56 = vector.extract_strided_slice %55 {offsets = [0, 0, 0], sizes = [1, 8, 32], strides = [1, 1, 1]} : vector<3x8x32xf32> to vector<1x8x32xf32>
    %57 = vector.shape_cast %56 : vector<1x8x32xf32> to vector<8x32xf32>
    %58 = vector.extract_strided_slice %4 {offsets = [0, 0, 0], sizes = [1, 32, 32], strides = [1, 1, 1]} : vector<3x32x32xf32> to vector<1x32x32xf32>
    %59 = vector.shape_cast %58 : vector<1x32x32xf32> to vector<32x32xf32>
    %cst_26 = arith.constant dense<0.000000e+00> : vector<8x32xf32>
    %60 = tpu.matmul %12, %59, %cst_26 {dimension_numbers = #tpu.dot_dimension_numbers<[1], [0], [0], [1], [0, 0, 1, 1], [], []>} : vector<8x32xf32>, vector<32x32xf32>, vector<8x32xf32> -> vector<8x32xf32>
    %61 = arith.addf %57, %60 : vector<8x32xf32>
    %62 = arith.negf %61 : vector<8x32xf32>
    %63 = math.exp %62 : vector<8x32xf32>
    %cst_27 = arith.constant 1.000000e+00 : f32
    %64 = vector.broadcast %cst_27 : f32 to vector<8x32xf32>
    %65 = arith.addf %64, %63 : vector<8x32xf32>
    %66 = arith.divf %64, %65 : vector<8x32xf32>
    %67 = vector.extract_strided_slice %55 {offsets = [1, 0, 0], sizes = [1, 8, 32], strides = [1, 1, 1]} : vector<3x8x32xf32> to vector<1x8x32xf32>
    %68 = vector.shape_cast %67 : vector<1x8x32xf32> to vector<8x32xf32>
    %69 = vector.extract_strided_slice %4 {offsets = [1, 0, 0], sizes = [1, 32, 32], strides = [1, 1, 1]} : vector<3x32x32xf32> to vector<1x32x32xf32>
    %70 = vector.shape_cast %69 : vector<1x32x32xf32> to vector<32x32xf32>
    %cst_28 = arith.constant dense<0.000000e+00> : vector<8x32xf32>
    %71 = tpu.matmul %12, %70, %cst_28 {dimension_numbers = #tpu.dot_dimension_numbers<[1], [0], [0], [1], [0, 0, 1, 1], [], []>} : vector<8x32xf32>, vector<32x32xf32>, vector<8x32xf32> -> vector<8x32xf32>
    %72 = arith.addf %68, %71 : vector<8x32xf32>
    %73 = arith.negf %72 : vector<8x32xf32>
    %74 = math.exp %73 : vector<8x32xf32>
    %cst_29 = arith.constant 1.000000e+00 : f32
    %75 = vector.broadcast %cst_29 : f32 to vector<8x32xf32>
    %76 = arith.addf %75, %74 : vector<8x32xf32>
    %77 = arith.divf %75, %76 : vector<8x32xf32>
    %78 = vector.extract_strided_slice %55 {offsets = [2, 0, 0], sizes = [1, 8, 32], strides = [1, 1, 1]} : vector<3x8x32xf32> to vector<1x8x32xf32>
    %79 = vector.shape_cast %78 : vector<1x8x32xf32> to vector<8x32xf32>
    %80 = vector.extract_strided_slice %4 {offsets = [2, 0, 0], sizes = [1, 32, 32], strides = [1, 1, 1]} : vector<3x32x32xf32> to vector<1x32x32xf32>
    %81 = vector.shape_cast %80 : vector<1x32x32xf32> to vector<32x32xf32>
    %cst_30 = arith.constant dense<0.000000e+00> : vector<8x32xf32>
    %82 = tpu.matmul %12, %81, %cst_30 {dimension_numbers = #tpu.dot_dimension_numbers<[1], [0], [0], [1], [0, 0, 1, 1], [], []>} : vector<8x32xf32>, vector<32x32xf32>, vector<8x32xf32> -> vector<8x32xf32>
    %83 = arith.addf %82, %10 : vector<8x32xf32>
    %84 = arith.mulf %66, %83 : vector<8x32xf32>
    %85 = arith.addf %79, %84 : vector<8x32xf32>
    %86 = math.tanh %85 : vector<8x32xf32>
    %cst_31 = arith.constant 1.000000e+00 : f32
    %87 = vector.broadcast %cst_31 : f32 to vector<8x32xf32>
    %88 = arith.subf %87, %77 : vector<8x32xf32>
    %89 = arith.mulf %88, %86 : vector<8x32xf32>
    %90 = arith.mulf %77, %12 : vector<8x32xf32>
    %91 = arith.addf %89, %90 : vector<8x32xf32>
    %c1_i32 = arith.constant 1 : i32
    %92 = arith.index_cast %c1_i32 : i32 to index
    %c0_32 = arith.constant 0 : index
    %c0_33 = arith.constant 0 : index
    %c0_34 = arith.constant 0 : index
    %93 = vector.load %arg1[%92, %c0_32, %c0_33, %c0_34] : memref<8x3x8x32xf32, #tpu.memory_space<vmem>>, vector<1x3x8x32xf32>
    %94 = vector.shape_cast %93 : vector<1x3x8x32xf32> to vector<3x8x32xf32>
    %95 = vector.extract_strided_slice %94 {offsets = [0, 0, 0], sizes = [1, 8, 32], strides = [1, 1, 1]} : vector<3x8x32xf32> to vector<1x8x32xf32>
    %96 = vector.shape_cast %95 : vector<1x8x32xf32> to vector<8x32xf32>
    %97 = vector.extract_strided_slice %3 {offsets = [0, 0, 0], sizes = [1, 32, 32], strides = [1, 1, 1]} : vector<3x32x32xf32> to vector<1x32x32xf32>
    %98 = vector.shape_cast %97 : vector<1x32x32xf32> to vector<32x32xf32>
    %cst_35 = arith.constant dense<0.000000e+00> : vector<8x32xf32>
    %99 = tpu.matmul %51, %98, %cst_35 {dimension_numbers = #tpu.dot_dimension_numbers<[1], [0], [0], [1], [0, 0, 1, 1], [], []>} : vector<8x32xf32>, vector<32x32xf32>, vector<8x32xf32> -> vector<8x32xf32>
    %100 = arith.addf %96, %99 : vector<8x32xf32>
    %101 = arith.negf %100 : vector<8x32xf32>
    %102 = math.exp %101 : vector<8x32xf32>
    %cst_36 = arith.constant 1.000000e+00 : f32
    %103 = vector.broadcast %cst_36 : f32 to vector<8x32xf32>
    %104 = arith.addf %103, %102 : vector<8x32xf32>
    %105 = arith.divf %103, %104 : vector<8x32xf32>
    %106 = vector.extract_strided_slice %94 {offsets = [1, 0, 0], sizes = [1, 8, 32], strides = [1, 1, 1]} : vector<3x8x32xf32> to vector<1x8x32xf32>
    %107 = vector.shape_cast %106 : vector<1x8x32xf32> to vector<8x32xf32>
    %108 = vector.extract_strided_slice %3 {offsets = [1, 0, 0], sizes = [1, 32, 32], strides = [1, 1, 1]} : vector<3x32x32xf32> to vector<1x32x32xf32>
    %109 = vector.shape_cast %108 : vector<1x32x32xf32> to vector<32x32xf32>
    %cst_37 = arith.constant dense<0.000000e+00> : vector<8x32xf32>
    %110 = tpu.matmul %51, %109, %cst_37 {dimension_numbers = #tpu.dot_dimension_numbers<[1], [0], [0], [1], [0, 0, 1, 1], [], []>} : vector<8x32xf32>, vector<32x32xf32>, vector<8x32xf32> -> vector<8x32xf32>
    %111 = arith.addf %107, %110 : vector<8x32xf32>
    %112 = arith.negf %111 : vector<8x32xf32>
    %113 = math.exp %112 : vector<8x32xf32>
    %cst_38 = arith.constant 1.000000e+00 : f32
    %114 = vector.broadcast %cst_38 : f32 to vector<8x32xf32>
    %115 = arith.addf %114, %113 : vector<8x32xf32>
    %116 = arith.divf %114, %115 : vector<8x32xf32>
    %117 = vector.extract_strided_slice %94 {offsets = [2, 0, 0], sizes = [1, 8, 32], strides = [1, 1, 1]} : vector<3x8x32xf32> to vector<1x8x32xf32>
    %118 = vector.shape_cast %117 : vector<1x8x32xf32> to vector<8x32xf32>
    %119 = vector.extract_strided_slice %3 {offsets = [2, 0, 0], sizes = [1, 32, 32], strides = [1, 1, 1]} : vector<3x32x32xf32> to vector<1x32x32xf32>
    %120 = vector.shape_cast %119 : vector<1x32x32xf32> to vector<32x32xf32>
    %cst_39 = arith.constant dense<0.000000e+00> : vector<8x32xf32>
    %121 = tpu.matmul %51, %120, %cst_39 {dimension_numbers = #tpu.dot_dimension_numbers<[1], [0], [0], [1], [0, 0, 1, 1], [], []>} : vector<8x32xf32>, vector<32x32xf32>, vector<8x32xf32> -> vector<8x32xf32>
    %122 = arith.addf %121, %7 : vector<8x32xf32>
    %123 = arith.mulf %105, %122 : vector<8x32xf32>
    %124 = arith.addf %118, %123 : vector<8x32xf32>
    %125 = math.tanh %124 : vector<8x32xf32>
    %cst_40 = arith.constant 1.000000e+00 : f32
    %126 = vector.broadcast %cst_40 : f32 to vector<8x32xf32>
    %127 = arith.subf %126, %116 : vector<8x32xf32>
    %128 = arith.mulf %127, %125 : vector<8x32xf32>
    %129 = arith.mulf %116, %51 : vector<8x32xf32>
    %130 = arith.addf %128, %129 : vector<8x32xf32>
    %c7_i32_41 = arith.constant 7 : i32
    %131 = arith.subi %c7_i32_41, %c1_i32 : i32
    %132 = arith.index_cast %131 : i32 to index
    %c0_42 = arith.constant 0 : index
    %c0_43 = arith.constant 0 : index
    %c0_44 = arith.constant 0 : index
    %133 = vector.load %arg2[%132, %c0_42, %c0_43, %c0_44] : memref<8x3x8x32xf32, #tpu.memory_space<vmem>>, vector<1x3x8x32xf32>
    %134 = vector.shape_cast %133 : vector<1x3x8x32xf32> to vector<3x8x32xf32>
    %135 = vector.extract_strided_slice %134 {offsets = [0, 0, 0], sizes = [1, 8, 32], strides = [1, 1, 1]} : vector<3x8x32xf32> to vector<1x8x32xf32>
    %136 = vector.shape_cast %135 : vector<1x8x32xf32> to vector<8x32xf32>
    %137 = vector.extract_strided_slice %4 {offsets = [0, 0, 0], sizes = [1, 32, 32], strides = [1, 1, 1]} : vector<3x32x32xf32> to vector<1x32x32xf32>
    %138 = vector.shape_cast %137 : vector<1x32x32xf32> to vector<32x32xf32>
    %cst_45 = arith.constant dense<0.000000e+00> : vector<8x32xf32>
    %139 = tpu.matmul %91, %138, %cst_45 {dimension_numbers = #tpu.dot_dimension_numbers<[1], [0], [0], [1], [0, 0, 1, 1], [], []>} : vector<8x32xf32>, vector<32x32xf32>, vector<8x32xf32> -> vector<8x32xf32>
    %140 = arith.addf %136, %139 : vector<8x32xf32>
    %141 = arith.negf %140 : vector<8x32xf32>
    %142 = math.exp %141 : vector<8x32xf32>
    %cst_46 = arith.constant 1.000000e+00 : f32
    %143 = vector.broadcast %cst_46 : f32 to vector<8x32xf32>
    %144 = arith.addf %143, %142 : vector<8x32xf32>
    %145 = arith.divf %143, %144 : vector<8x32xf32>
    %146 = vector.extract_strided_slice %134 {offsets = [1, 0, 0], sizes = [1, 8, 32], strides = [1, 1, 1]} : vector<3x8x32xf32> to vector<1x8x32xf32>
    %147 = vector.shape_cast %146 : vector<1x8x32xf32> to vector<8x32xf32>
    %148 = vector.extract_strided_slice %4 {offsets = [1, 0, 0], sizes = [1, 32, 32], strides = [1, 1, 1]} : vector<3x32x32xf32> to vector<1x32x32xf32>
    %149 = vector.shape_cast %148 : vector<1x32x32xf32> to vector<32x32xf32>
    %cst_47 = arith.constant dense<0.000000e+00> : vector<8x32xf32>
    %150 = tpu.matmul %91, %149, %cst_47 {dimension_numbers = #tpu.dot_dimension_numbers<[1], [0], [0], [1], [0, 0, 1, 1], [], []>} : vector<8x32xf32>, vector<32x32xf32>, vector<8x32xf32> -> vector<8x32xf32>
    %151 = arith.addf %147, %150 : vector<8x32xf32>
    %152 = arith.negf %151 : vector<8x32xf32>
    %153 = math.exp %152 : vector<8x32xf32>
    %cst_48 = arith.constant 1.000000e+00 : f32
    %154 = vector.broadcast %cst_48 : f32 to vector<8x32xf32>
    %155 = arith.addf %154, %153 : vector<8x32xf32>
    %156 = arith.divf %154, %155 : vector<8x32xf32>
    %157 = vector.extract_strided_slice %134 {offsets = [2, 0, 0], sizes = [1, 8, 32], strides = [1, 1, 1]} : vector<3x8x32xf32> to vector<1x8x32xf32>
    %158 = vector.shape_cast %157 : vector<1x8x32xf32> to vector<8x32xf32>
    %159 = vector.extract_strided_slice %4 {offsets = [2, 0, 0], sizes = [1, 32, 32], strides = [1, 1, 1]} : vector<3x32x32xf32> to vector<1x32x32xf32>
    %160 = vector.shape_cast %159 : vector<1x32x32xf32> to vector<32x32xf32>
    %cst_49 = arith.constant dense<0.000000e+00> : vector<8x32xf32>
    %161 = tpu.matmul %91, %160, %cst_49 {dimension_numbers = #tpu.dot_dimension_numbers<[1], [0], [0], [1], [0, 0, 1, 1], [], []>} : vector<8x32xf32>, vector<32x32xf32>, vector<8x32xf32> -> vector<8x32xf32>
    %162 = arith.addf %161, %10 : vector<8x32xf32>
    %163 = arith.mulf %145, %162 : vector<8x32xf32>
    %164 = arith.addf %158, %163 : vector<8x32xf32>
    %165 = math.tanh %164 : vector<8x32xf32>
    %cst_50 = arith.constant 1.000000e+00 : f32
    %166 = vector.broadcast %cst_50 : f32 to vector<8x32xf32>
    %167 = arith.subf %166, %156 : vector<8x32xf32>
    %168 = arith.mulf %167, %165 : vector<8x32xf32>
    %169 = arith.mulf %156, %91 : vector<8x32xf32>
    %170 = arith.addf %168, %169 : vector<8x32xf32>
    %c2_i32 = arith.constant 2 : i32
    %171 = arith.index_cast %c2_i32 : i32 to index
    %c0_51 = arith.constant 0 : index
    %c0_52 = arith.constant 0 : index
    %c0_53 = arith.constant 0 : index
    %172 = vector.load %arg1[%171, %c0_51, %c0_52, %c0_53] : memref<8x3x8x32xf32, #tpu.memory_space<vmem>>, vector<1x3x8x32xf32>
    %173 = vector.shape_cast %172 : vector<1x3x8x32xf32> to vector<3x8x32xf32>
    %174 = vector.extract_strided_slice %173 {offsets = [0, 0, 0], sizes = [1, 8, 32], strides = [1, 1, 1]} : vector<3x8x32xf32> to vector<1x8x32xf32>
    %175 = vector.shape_cast %174 : vector<1x8x32xf32> to vector<8x32xf32>
    %176 = vector.extract_strided_slice %3 {offsets = [0, 0, 0], sizes = [1, 32, 32], strides = [1, 1, 1]} : vector<3x32x32xf32> to vector<1x32x32xf32>
    %177 = vector.shape_cast %176 : vector<1x32x32xf32> to vector<32x32xf32>
    %cst_54 = arith.constant dense<0.000000e+00> : vector<8x32xf32>
    %178 = tpu.matmul %130, %177, %cst_54 {dimension_numbers = #tpu.dot_dimension_numbers<[1], [0], [0], [1], [0, 0, 1, 1], [], []>} : vector<8x32xf32>, vector<32x32xf32>, vector<8x32xf32> -> vector<8x32xf32>
    %179 = arith.addf %175, %178 : vector<8x32xf32>
    %180 = arith.negf %179 : vector<8x32xf32>
    %181 = math.exp %180 : vector<8x32xf32>
    %cst_55 = arith.constant 1.000000e+00 : f32
    %182 = vector.broadcast %cst_55 : f32 to vector<8x32xf32>
    %183 = arith.addf %182, %181 : vector<8x32xf32>
    %184 = arith.divf %182, %183 : vector<8x32xf32>
    %185 = vector.extract_strided_slice %173 {offsets = [1, 0, 0], sizes = [1, 8, 32], strides = [1, 1, 1]} : vector<3x8x32xf32> to vector<1x8x32xf32>
    %186 = vector.shape_cast %185 : vector<1x8x32xf32> to vector<8x32xf32>
    %187 = vector.extract_strided_slice %3 {offsets = [1, 0, 0], sizes = [1, 32, 32], strides = [1, 1, 1]} : vector<3x32x32xf32> to vector<1x32x32xf32>
    %188 = vector.shape_cast %187 : vector<1x32x32xf32> to vector<32x32xf32>
    %cst_56 = arith.constant dense<0.000000e+00> : vector<8x32xf32>
    %189 = tpu.matmul %130, %188, %cst_56 {dimension_numbers = #tpu.dot_dimension_numbers<[1], [0], [0], [1], [0, 0, 1, 1], [], []>} : vector<8x32xf32>, vector<32x32xf32>, vector<8x32xf32> -> vector<8x32xf32>
    %190 = arith.addf %186, %189 : vector<8x32xf32>
    %191 = arith.negf %190 : vector<8x32xf32>
    %192 = math.exp %191 : vector<8x32xf32>
    %cst_57 = arith.constant 1.000000e+00 : f32
    %193 = vector.broadcast %cst_57 : f32 to vector<8x32xf32>
    %194 = arith.addf %193, %192 : vector<8x32xf32>
    %195 = arith.divf %193, %194 : vector<8x32xf32>
    %196 = vector.extract_strided_slice %173 {offsets = [2, 0, 0], sizes = [1, 8, 32], strides = [1, 1, 1]} : vector<3x8x32xf32> to vector<1x8x32xf32>
    %197 = vector.shape_cast %196 : vector<1x8x32xf32> to vector<8x32xf32>
    %198 = vector.extract_strided_slice %3 {offsets = [2, 0, 0], sizes = [1, 32, 32], strides = [1, 1, 1]} : vector<3x32x32xf32> to vector<1x32x32xf32>
    %199 = vector.shape_cast %198 : vector<1x32x32xf32> to vector<32x32xf32>
    %cst_58 = arith.constant dense<0.000000e+00> : vector<8x32xf32>
    %200 = tpu.matmul %130, %199, %cst_58 {dimension_numbers = #tpu.dot_dimension_numbers<[1], [0], [0], [1], [0, 0, 1, 1], [], []>} : vector<8x32xf32>, vector<32x32xf32>, vector<8x32xf32> -> vector<8x32xf32>
    %201 = arith.addf %200, %7 : vector<8x32xf32>
    %202 = arith.mulf %184, %201 : vector<8x32xf32>
    %203 = arith.addf %197, %202 : vector<8x32xf32>
    %204 = math.tanh %203 : vector<8x32xf32>
    %cst_59 = arith.constant 1.000000e+00 : f32
    %205 = vector.broadcast %cst_59 : f32 to vector<8x32xf32>
    %206 = arith.subf %205, %195 : vector<8x32xf32>
    %207 = arith.mulf %206, %204 : vector<8x32xf32>
    %208 = arith.mulf %195, %130 : vector<8x32xf32>
    %209 = arith.addf %207, %208 : vector<8x32xf32>
    %c7_i32_60 = arith.constant 7 : i32
    %210 = arith.subi %c7_i32_60, %c2_i32 : i32
    %211 = arith.index_cast %210 : i32 to index
    %c0_61 = arith.constant 0 : index
    %c0_62 = arith.constant 0 : index
    %c0_63 = arith.constant 0 : index
    %212 = vector.load %arg2[%211, %c0_61, %c0_62, %c0_63] : memref<8x3x8x32xf32, #tpu.memory_space<vmem>>, vector<1x3x8x32xf32>
    %213 = vector.shape_cast %212 : vector<1x3x8x32xf32> to vector<3x8x32xf32>
    %214 = vector.extract_strided_slice %213 {offsets = [0, 0, 0], sizes = [1, 8, 32], strides = [1, 1, 1]} : vector<3x8x32xf32> to vector<1x8x32xf32>
    %215 = vector.shape_cast %214 : vector<1x8x32xf32> to vector<8x32xf32>
    %216 = vector.extract_strided_slice %4 {offsets = [0, 0, 0], sizes = [1, 32, 32], strides = [1, 1, 1]} : vector<3x32x32xf32> to vector<1x32x32xf32>
    %217 = vector.shape_cast %216 : vector<1x32x32xf32> to vector<32x32xf32>
    %cst_64 = arith.constant dense<0.000000e+00> : vector<8x32xf32>
    %218 = tpu.matmul %170, %217, %cst_64 {dimension_numbers = #tpu.dot_dimension_numbers<[1], [0], [0], [1], [0, 0, 1, 1], [], []>} : vector<8x32xf32>, vector<32x32xf32>, vector<8x32xf32> -> vector<8x32xf32>
    %219 = arith.addf %215, %218 : vector<8x32xf32>
    %220 = arith.negf %219 : vector<8x32xf32>
    %221 = math.exp %220 : vector<8x32xf32>
    %cst_65 = arith.constant 1.000000e+00 : f32
    %222 = vector.broadcast %cst_65 : f32 to vector<8x32xf32>
    %223 = arith.addf %222, %221 : vector<8x32xf32>
    %224 = arith.divf %222, %223 : vector<8x32xf32>
    %225 = vector.extract_strided_slice %213 {offsets = [1, 0, 0], sizes = [1, 8, 32], strides = [1, 1, 1]} : vector<3x8x32xf32> to vector<1x8x32xf32>
    %226 = vector.shape_cast %225 : vector<1x8x32xf32> to vector<8x32xf32>
    %227 = vector.extract_strided_slice %4 {offsets = [1, 0, 0], sizes = [1, 32, 32], strides = [1, 1, 1]} : vector<3x32x32xf32> to vector<1x32x32xf32>
    %228 = vector.shape_cast %227 : vector<1x32x32xf32> to vector<32x32xf32>
    %cst_66 = arith.constant dense<0.000000e+00> : vector<8x32xf32>
    %229 = tpu.matmul %170, %228, %cst_66 {dimension_numbers = #tpu.dot_dimension_numbers<[1], [0], [0], [1], [0, 0, 1, 1], [], []>} : vector<8x32xf32>, vector<32x32xf32>, vector<8x32xf32> -> vector<8x32xf32>
    %230 = arith.addf %226, %229 : vector<8x32xf32>
    %231 = arith.negf %230 : vector<8x32xf32>
    %232 = math.exp %231 : vector<8x32xf32>
    %cst_67 = arith.constant 1.000000e+00 : f32
    %233 = vector.broadcast %cst_67 : f32 to vector<8x32xf32>
    %234 = arith.addf %233, %232 : vector<8x32xf32>
    %235 = arith.divf %233, %234 : vector<8x32xf32>
    %236 = vector.extract_strided_slice %213 {offsets = [2, 0, 0], sizes = [1, 8, 32], strides = [1, 1, 1]} : vector<3x8x32xf32> to vector<1x8x32xf32>
    %237 = vector.shape_cast %236 : vector<1x8x32xf32> to vector<8x32xf32>
    %238 = vector.extract_strided_slice %4 {offsets = [2, 0, 0], sizes = [1, 32, 32], strides = [1, 1, 1]} : vector<3x32x32xf32> to vector<1x32x32xf32>
    %239 = vector.shape_cast %238 : vector<1x32x32xf32> to vector<32x32xf32>
    %cst_68 = arith.constant dense<0.000000e+00> : vector<8x32xf32>
    %240 = tpu.matmul %170, %239, %cst_68 {dimension_numbers = #tpu.dot_dimension_numbers<[1], [0], [0], [1], [0, 0, 1, 1], [], []>} : vector<8x32xf32>, vector<32x32xf32>, vector<8x32xf32> -> vector<8x32xf32>
    %241 = arith.addf %240, %10 : vector<8x32xf32>
    %242 = arith.mulf %224, %241 : vector<8x32xf32>
    %243 = arith.addf %237, %242 : vector<8x32xf32>
    %244 = math.tanh %243 : vector<8x32xf32>
    %cst_69 = arith.constant 1.000000e+00 : f32
    %245 = vector.broadcast %cst_69 : f32 to vector<8x32xf32>
    %246 = arith.subf %245, %235 : vector<8x32xf32>
    %247 = arith.mulf %246, %244 : vector<8x32xf32>
    %248 = arith.mulf %235, %170 : vector<8x32xf32>
    %249 = arith.addf %247, %248 : vector<8x32xf32>
    %c3_i32 = arith.constant 3 : i32
    %250 = arith.index_cast %c3_i32 : i32 to index
    %c0_70 = arith.constant 0 : index
    %c0_71 = arith.constant 0 : index
    %c0_72 = arith.constant 0 : index
    %251 = vector.load %arg1[%250, %c0_70, %c0_71, %c0_72] : memref<8x3x8x32xf32, #tpu.memory_space<vmem>>, vector<1x3x8x32xf32>
    %252 = vector.shape_cast %251 : vector<1x3x8x32xf32> to vector<3x8x32xf32>
    %253 = vector.extract_strided_slice %252 {offsets = [0, 0, 0], sizes = [1, 8, 32], strides = [1, 1, 1]} : vector<3x8x32xf32> to vector<1x8x32xf32>
    %254 = vector.shape_cast %253 : vector<1x8x32xf32> to vector<8x32xf32>
    %255 = vector.extract_strided_slice %3 {offsets = [0, 0, 0], sizes = [1, 32, 32], strides = [1, 1, 1]} : vector<3x32x32xf32> to vector<1x32x32xf32>
    %256 = vector.shape_cast %255 : vector<1x32x32xf32> to vector<32x32xf32>
    %cst_73 = arith.constant dense<0.000000e+00> : vector<8x32xf32>
    %257 = tpu.matmul %209, %256, %cst_73 {dimension_numbers = #tpu.dot_dimension_numbers<[1], [0], [0], [1], [0, 0, 1, 1], [], []>} : vector<8x32xf32>, vector<32x32xf32>, vector<8x32xf32> -> vector<8x32xf32>
    %258 = arith.addf %254, %257 : vector<8x32xf32>
    %259 = arith.negf %258 : vector<8x32xf32>
    %260 = math.exp %259 : vector<8x32xf32>
    %cst_74 = arith.constant 1.000000e+00 : f32
    %261 = vector.broadcast %cst_74 : f32 to vector<8x32xf32>
    %262 = arith.addf %261, %260 : vector<8x32xf32>
    %263 = arith.divf %261, %262 : vector<8x32xf32>
    %264 = vector.extract_strided_slice %252 {offsets = [1, 0, 0], sizes = [1, 8, 32], strides = [1, 1, 1]} : vector<3x8x32xf32> to vector<1x8x32xf32>
    %265 = vector.shape_cast %264 : vector<1x8x32xf32> to vector<8x32xf32>
    %266 = vector.extract_strided_slice %3 {offsets = [1, 0, 0], sizes = [1, 32, 32], strides = [1, 1, 1]} : vector<3x32x32xf32> to vector<1x32x32xf32>
    %267 = vector.shape_cast %266 : vector<1x32x32xf32> to vector<32x32xf32>
    %cst_75 = arith.constant dense<0.000000e+00> : vector<8x32xf32>
    %268 = tpu.matmul %209, %267, %cst_75 {dimension_numbers = #tpu.dot_dimension_numbers<[1], [0], [0], [1], [0, 0, 1, 1], [], []>} : vector<8x32xf32>, vector<32x32xf32>, vector<8x32xf32> -> vector<8x32xf32>
    %269 = arith.addf %265, %268 : vector<8x32xf32>
    %270 = arith.negf %269 : vector<8x32xf32>
    %271 = math.exp %270 : vector<8x32xf32>
    %cst_76 = arith.constant 1.000000e+00 : f32
    %272 = vector.broadcast %cst_76 : f32 to vector<8x32xf32>
    %273 = arith.addf %272, %271 : vector<8x32xf32>
    %274 = arith.divf %272, %273 : vector<8x32xf32>
    %275 = vector.extract_strided_slice %252 {offsets = [2, 0, 0], sizes = [1, 8, 32], strides = [1, 1, 1]} : vector<3x8x32xf32> to vector<1x8x32xf32>
    %276 = vector.shape_cast %275 : vector<1x8x32xf32> to vector<8x32xf32>
    %277 = vector.extract_strided_slice %3 {offsets = [2, 0, 0], sizes = [1, 32, 32], strides = [1, 1, 1]} : vector<3x32x32xf32> to vector<1x32x32xf32>
    %278 = vector.shape_cast %277 : vector<1x32x32xf32> to vector<32x32xf32>
    %cst_77 = arith.constant dense<0.000000e+00> : vector<8x32xf32>
    %279 = tpu.matmul %209, %278, %cst_77 {dimension_numbers = #tpu.dot_dimension_numbers<[1], [0], [0], [1], [0, 0, 1, 1], [], []>} : vector<8x32xf32>, vector<32x32xf32>, vector<8x32xf32> -> vector<8x32xf32>
    %280 = arith.addf %279, %7 : vector<8x32xf32>
    %281 = arith.mulf %263, %280 : vector<8x32xf32>
    %282 = arith.addf %276, %281 : vector<8x32xf32>
    %283 = math.tanh %282 : vector<8x32xf32>
    %cst_78 = arith.constant 1.000000e+00 : f32
    %284 = vector.broadcast %cst_78 : f32 to vector<8x32xf32>
    %285 = arith.subf %284, %274 : vector<8x32xf32>
    %286 = arith.mulf %285, %283 : vector<8x32xf32>
    %287 = arith.mulf %274, %209 : vector<8x32xf32>
    %288 = arith.addf %286, %287 : vector<8x32xf32>
    %c7_i32_79 = arith.constant 7 : i32
    %289 = arith.subi %c7_i32_79, %c3_i32 : i32
    %290 = arith.index_cast %289 : i32 to index
    %c0_80 = arith.constant 0 : index
    %c0_81 = arith.constant 0 : index
    %c0_82 = arith.constant 0 : index
    %291 = vector.load %arg2[%290, %c0_80, %c0_81, %c0_82] : memref<8x3x8x32xf32, #tpu.memory_space<vmem>>, vector<1x3x8x32xf32>
    %292 = vector.shape_cast %291 : vector<1x3x8x32xf32> to vector<3x8x32xf32>
    %293 = vector.extract_strided_slice %292 {offsets = [0, 0, 0], sizes = [1, 8, 32], strides = [1, 1, 1]} : vector<3x8x32xf32> to vector<1x8x32xf32>
    %294 = vector.shape_cast %293 : vector<1x8x32xf32> to vector<8x32xf32>
    %295 = vector.extract_strided_slice %4 {offsets = [0, 0, 0], sizes = [1, 32, 32], strides = [1, 1, 1]} : vector<3x32x32xf32> to vector<1x32x32xf32>
    %296 = vector.shape_cast %295 : vector<1x32x32xf32> to vector<32x32xf32>
    %cst_83 = arith.constant dense<0.000000e+00> : vector<8x32xf32>
    %297 = tpu.matmul %249, %296, %cst_83 {dimension_numbers = #tpu.dot_dimension_numbers<[1], [0], [0], [1], [0, 0, 1, 1], [], []>} : vector<8x32xf32>, vector<32x32xf32>, vector<8x32xf32> -> vector<8x32xf32>
    %298 = arith.addf %294, %297 : vector<8x32xf32>
    %299 = arith.negf %298 : vector<8x32xf32>
    %300 = math.exp %299 : vector<8x32xf32>
    %cst_84 = arith.constant 1.000000e+00 : f32
    %301 = vector.broadcast %cst_84 : f32 to vector<8x32xf32>
    %302 = arith.addf %301, %300 : vector<8x32xf32>
    %303 = arith.divf %301, %302 : vector<8x32xf32>
    %304 = vector.extract_strided_slice %292 {offsets = [1, 0, 0], sizes = [1, 8, 32], strides = [1, 1, 1]} : vector<3x8x32xf32> to vector<1x8x32xf32>
    %305 = vector.shape_cast %304 : vector<1x8x32xf32> to vector<8x32xf32>
    %306 = vector.extract_strided_slice %4 {offsets = [1, 0, 0], sizes = [1, 32, 32], strides = [1, 1, 1]} : vector<3x32x32xf32> to vector<1x32x32xf32>
    %307 = vector.shape_cast %306 : vector<1x32x32xf32> to vector<32x32xf32>
    %cst_85 = arith.constant dense<0.000000e+00> : vector<8x32xf32>
    %308 = tpu.matmul %249, %307, %cst_85 {dimension_numbers = #tpu.dot_dimension_numbers<[1], [0], [0], [1], [0, 0, 1, 1], [], []>} : vector<8x32xf32>, vector<32x32xf32>, vector<8x32xf32> -> vector<8x32xf32>
    %309 = arith.addf %305, %308 : vector<8x32xf32>
    %310 = arith.negf %309 : vector<8x32xf32>
    %311 = math.exp %310 : vector<8x32xf32>
    %cst_86 = arith.constant 1.000000e+00 : f32
    %312 = vector.broadcast %cst_86 : f32 to vector<8x32xf32>
    %313 = arith.addf %312, %311 : vector<8x32xf32>
    %314 = arith.divf %312, %313 : vector<8x32xf32>
    %315 = vector.extract_strided_slice %292 {offsets = [2, 0, 0], sizes = [1, 8, 32], strides = [1, 1, 1]} : vector<3x8x32xf32> to vector<1x8x32xf32>
    %316 = vector.shape_cast %315 : vector<1x8x32xf32> to vector<8x32xf32>
    %317 = vector.extract_strided_slice %4 {offsets = [2, 0, 0], sizes = [1, 32, 32], strides = [1, 1, 1]} : vector<3x32x32xf32> to vector<1x32x32xf32>
    %318 = vector.shape_cast %317 : vector<1x32x32xf32> to vector<32x32xf32>
    %cst_87 = arith.constant dense<0.000000e+00> : vector<8x32xf32>
    %319 = tpu.matmul %249, %318, %cst_87 {dimension_numbers = #tpu.dot_dimension_numbers<[1], [0], [0], [1], [0, 0, 1, 1], [], []>} : vector<8x32xf32>, vector<32x32xf32>, vector<8x32xf32> -> vector<8x32xf32>
    %320 = arith.addf %319, %10 : vector<8x32xf32>
    %321 = arith.mulf %303, %320 : vector<8x32xf32>
    %322 = arith.addf %316, %321 : vector<8x32xf32>
    %323 = math.tanh %322 : vector<8x32xf32>
    %cst_88 = arith.constant 1.000000e+00 : f32
    %324 = vector.broadcast %cst_88 : f32 to vector<8x32xf32>
    %325 = arith.subf %324, %314 : vector<8x32xf32>
    %326 = arith.mulf %325, %323 : vector<8x32xf32>
    %327 = arith.mulf %314, %249 : vector<8x32xf32>
    %328 = arith.addf %326, %327 : vector<8x32xf32>
    %c4_i32 = arith.constant 4 : i32
    %329 = arith.index_cast %c4_i32 : i32 to index
    %c0_89 = arith.constant 0 : index
    %c0_90 = arith.constant 0 : index
    %c0_91 = arith.constant 0 : index
    %330 = vector.load %arg1[%329, %c0_89, %c0_90, %c0_91] : memref<8x3x8x32xf32, #tpu.memory_space<vmem>>, vector<1x3x8x32xf32>
    %331 = vector.shape_cast %330 : vector<1x3x8x32xf32> to vector<3x8x32xf32>
    %332 = vector.extract_strided_slice %331 {offsets = [0, 0, 0], sizes = [1, 8, 32], strides = [1, 1, 1]} : vector<3x8x32xf32> to vector<1x8x32xf32>
    %333 = vector.shape_cast %332 : vector<1x8x32xf32> to vector<8x32xf32>
    %334 = vector.extract_strided_slice %3 {offsets = [0, 0, 0], sizes = [1, 32, 32], strides = [1, 1, 1]} : vector<3x32x32xf32> to vector<1x32x32xf32>
    %335 = vector.shape_cast %334 : vector<1x32x32xf32> to vector<32x32xf32>
    %cst_92 = arith.constant dense<0.000000e+00> : vector<8x32xf32>
    %336 = tpu.matmul %288, %335, %cst_92 {dimension_numbers = #tpu.dot_dimension_numbers<[1], [0], [0], [1], [0, 0, 1, 1], [], []>} : vector<8x32xf32>, vector<32x32xf32>, vector<8x32xf32> -> vector<8x32xf32>
    %337 = arith.addf %333, %336 : vector<8x32xf32>
    %338 = arith.negf %337 : vector<8x32xf32>
    %339 = math.exp %338 : vector<8x32xf32>
    %cst_93 = arith.constant 1.000000e+00 : f32
    %340 = vector.broadcast %cst_93 : f32 to vector<8x32xf32>
    %341 = arith.addf %340, %339 : vector<8x32xf32>
    %342 = arith.divf %340, %341 : vector<8x32xf32>
    %343 = vector.extract_strided_slice %331 {offsets = [1, 0, 0], sizes = [1, 8, 32], strides = [1, 1, 1]} : vector<3x8x32xf32> to vector<1x8x32xf32>
    %344 = vector.shape_cast %343 : vector<1x8x32xf32> to vector<8x32xf32>
    %345 = vector.extract_strided_slice %3 {offsets = [1, 0, 0], sizes = [1, 32, 32], strides = [1, 1, 1]} : vector<3x32x32xf32> to vector<1x32x32xf32>
    %346 = vector.shape_cast %345 : vector<1x32x32xf32> to vector<32x32xf32>
    %cst_94 = arith.constant dense<0.000000e+00> : vector<8x32xf32>
    %347 = tpu.matmul %288, %346, %cst_94 {dimension_numbers = #tpu.dot_dimension_numbers<[1], [0], [0], [1], [0, 0, 1, 1], [], []>} : vector<8x32xf32>, vector<32x32xf32>, vector<8x32xf32> -> vector<8x32xf32>
    %348 = arith.addf %344, %347 : vector<8x32xf32>
    %349 = arith.negf %348 : vector<8x32xf32>
    %350 = math.exp %349 : vector<8x32xf32>
    %cst_95 = arith.constant 1.000000e+00 : f32
    %351 = vector.broadcast %cst_95 : f32 to vector<8x32xf32>
    %352 = arith.addf %351, %350 : vector<8x32xf32>
    %353 = arith.divf %351, %352 : vector<8x32xf32>
    %354 = vector.extract_strided_slice %331 {offsets = [2, 0, 0], sizes = [1, 8, 32], strides = [1, 1, 1]} : vector<3x8x32xf32> to vector<1x8x32xf32>
    %355 = vector.shape_cast %354 : vector<1x8x32xf32> to vector<8x32xf32>
    %356 = vector.extract_strided_slice %3 {offsets = [2, 0, 0], sizes = [1, 32, 32], strides = [1, 1, 1]} : vector<3x32x32xf32> to vector<1x32x32xf32>
    %357 = vector.shape_cast %356 : vector<1x32x32xf32> to vector<32x32xf32>
    %cst_96 = arith.constant dense<0.000000e+00> : vector<8x32xf32>
    %358 = tpu.matmul %288, %357, %cst_96 {dimension_numbers = #tpu.dot_dimension_numbers<[1], [0], [0], [1], [0, 0, 1, 1], [], []>} : vector<8x32xf32>, vector<32x32xf32>, vector<8x32xf32> -> vector<8x32xf32>
    %359 = arith.addf %358, %7 : vector<8x32xf32>
    %360 = arith.mulf %342, %359 : vector<8x32xf32>
    %361 = arith.addf %355, %360 : vector<8x32xf32>
    %362 = math.tanh %361 : vector<8x32xf32>
    %cst_97 = arith.constant 1.000000e+00 : f32
    %363 = vector.broadcast %cst_97 : f32 to vector<8x32xf32>
    %364 = arith.subf %363, %353 : vector<8x32xf32>
    %365 = arith.mulf %364, %362 : vector<8x32xf32>
    %366 = arith.mulf %353, %288 : vector<8x32xf32>
    %367 = arith.addf %365, %366 : vector<8x32xf32>
    %c7_i32_98 = arith.constant 7 : i32
    %368 = arith.subi %c7_i32_98, %c4_i32 : i32
    %369 = arith.index_cast %368 : i32 to index
    %c0_99 = arith.constant 0 : index
    %c0_100 = arith.constant 0 : index
    %c0_101 = arith.constant 0 : index
    %370 = vector.load %arg2[%369, %c0_99, %c0_100, %c0_101] : memref<8x3x8x32xf32, #tpu.memory_space<vmem>>, vector<1x3x8x32xf32>
    %371 = vector.shape_cast %370 : vector<1x3x8x32xf32> to vector<3x8x32xf32>
    %372 = vector.extract_strided_slice %371 {offsets = [0, 0, 0], sizes = [1, 8, 32], strides = [1, 1, 1]} : vector<3x8x32xf32> to vector<1x8x32xf32>
    %373 = vector.shape_cast %372 : vector<1x8x32xf32> to vector<8x32xf32>
    %374 = vector.extract_strided_slice %4 {offsets = [0, 0, 0], sizes = [1, 32, 32], strides = [1, 1, 1]} : vector<3x32x32xf32> to vector<1x32x32xf32>
    %375 = vector.shape_cast %374 : vector<1x32x32xf32> to vector<32x32xf32>
    %cst_102 = arith.constant dense<0.000000e+00> : vector<8x32xf32>
    %376 = tpu.matmul %328, %375, %cst_102 {dimension_numbers = #tpu.dot_dimension_numbers<[1], [0], [0], [1], [0, 0, 1, 1], [], []>} : vector<8x32xf32>, vector<32x32xf32>, vector<8x32xf32> -> vector<8x32xf32>
    %377 = arith.addf %373, %376 : vector<8x32xf32>
    %378 = arith.negf %377 : vector<8x32xf32>
    %379 = math.exp %378 : vector<8x32xf32>
    %cst_103 = arith.constant 1.000000e+00 : f32
    %380 = vector.broadcast %cst_103 : f32 to vector<8x32xf32>
    %381 = arith.addf %380, %379 : vector<8x32xf32>
    %382 = arith.divf %380, %381 : vector<8x32xf32>
    %383 = vector.extract_strided_slice %371 {offsets = [1, 0, 0], sizes = [1, 8, 32], strides = [1, 1, 1]} : vector<3x8x32xf32> to vector<1x8x32xf32>
    %384 = vector.shape_cast %383 : vector<1x8x32xf32> to vector<8x32xf32>
    %385 = vector.extract_strided_slice %4 {offsets = [1, 0, 0], sizes = [1, 32, 32], strides = [1, 1, 1]} : vector<3x32x32xf32> to vector<1x32x32xf32>
    %386 = vector.shape_cast %385 : vector<1x32x32xf32> to vector<32x32xf32>
    %cst_104 = arith.constant dense<0.000000e+00> : vector<8x32xf32>
    %387 = tpu.matmul %328, %386, %cst_104 {dimension_numbers = #tpu.dot_dimension_numbers<[1], [0], [0], [1], [0, 0, 1, 1], [], []>} : vector<8x32xf32>, vector<32x32xf32>, vector<8x32xf32> -> vector<8x32xf32>
    %388 = arith.addf %384, %387 : vector<8x32xf32>
    %389 = arith.negf %388 : vector<8x32xf32>
    %390 = math.exp %389 : vector<8x32xf32>
    %cst_105 = arith.constant 1.000000e+00 : f32
    %391 = vector.broadcast %cst_105 : f32 to vector<8x32xf32>
    %392 = arith.addf %391, %390 : vector<8x32xf32>
    %393 = arith.divf %391, %392 : vector<8x32xf32>
    %394 = vector.extract_strided_slice %371 {offsets = [2, 0, 0], sizes = [1, 8, 32], strides = [1, 1, 1]} : vector<3x8x32xf32> to vector<1x8x32xf32>
    %395 = vector.shape_cast %394 : vector<1x8x32xf32> to vector<8x32xf32>
    %396 = vector.extract_strided_slice %4 {offsets = [2, 0, 0], sizes = [1, 32, 32], strides = [1, 1, 1]} : vector<3x32x32xf32> to vector<1x32x32xf32>
    %397 = vector.shape_cast %396 : vector<1x32x32xf32> to vector<32x32xf32>
    %cst_106 = arith.constant dense<0.000000e+00> : vector<8x32xf32>
    %398 = tpu.matmul %328, %397, %cst_106 {dimension_numbers = #tpu.dot_dimension_numbers<[1], [0], [0], [1], [0, 0, 1, 1], [], []>} : vector<8x32xf32>, vector<32x32xf32>, vector<8x32xf32> -> vector<8x32xf32>
    %399 = arith.addf %398, %10 : vector<8x32xf32>
    %400 = arith.mulf %382, %399 : vector<8x32xf32>
    %401 = arith.addf %395, %400 : vector<8x32xf32>
    %402 = math.tanh %401 : vector<8x32xf32>
    %cst_107 = arith.constant 1.000000e+00 : f32
    %403 = vector.broadcast %cst_107 : f32 to vector<8x32xf32>
    %404 = arith.subf %403, %393 : vector<8x32xf32>
    %405 = arith.mulf %404, %402 : vector<8x32xf32>
    %406 = arith.mulf %393, %328 : vector<8x32xf32>
    %407 = arith.addf %405, %406 : vector<8x32xf32>
    %c5_i32 = arith.constant 5 : i32
    %408 = arith.index_cast %c5_i32 : i32 to index
    %c0_108 = arith.constant 0 : index
    %c0_109 = arith.constant 0 : index
    %c0_110 = arith.constant 0 : index
    %409 = vector.load %arg1[%408, %c0_108, %c0_109, %c0_110] : memref<8x3x8x32xf32, #tpu.memory_space<vmem>>, vector<1x3x8x32xf32>
    %410 = vector.shape_cast %409 : vector<1x3x8x32xf32> to vector<3x8x32xf32>
    %411 = vector.extract_strided_slice %410 {offsets = [0, 0, 0], sizes = [1, 8, 32], strides = [1, 1, 1]} : vector<3x8x32xf32> to vector<1x8x32xf32>
    %412 = vector.shape_cast %411 : vector<1x8x32xf32> to vector<8x32xf32>
    %413 = vector.extract_strided_slice %3 {offsets = [0, 0, 0], sizes = [1, 32, 32], strides = [1, 1, 1]} : vector<3x32x32xf32> to vector<1x32x32xf32>
    %414 = vector.shape_cast %413 : vector<1x32x32xf32> to vector<32x32xf32>
    %cst_111 = arith.constant dense<0.000000e+00> : vector<8x32xf32>
    %415 = tpu.matmul %367, %414, %cst_111 {dimension_numbers = #tpu.dot_dimension_numbers<[1], [0], [0], [1], [0, 0, 1, 1], [], []>} : vector<8x32xf32>, vector<32x32xf32>, vector<8x32xf32> -> vector<8x32xf32>
    %416 = arith.addf %412, %415 : vector<8x32xf32>
    %417 = arith.negf %416 : vector<8x32xf32>
    %418 = math.exp %417 : vector<8x32xf32>
    %cst_112 = arith.constant 1.000000e+00 : f32
    %419 = vector.broadcast %cst_112 : f32 to vector<8x32xf32>
    %420 = arith.addf %419, %418 : vector<8x32xf32>
    %421 = arith.divf %419, %420 : vector<8x32xf32>
    %422 = vector.extract_strided_slice %410 {offsets = [1, 0, 0], sizes = [1, 8, 32], strides = [1, 1, 1]} : vector<3x8x32xf32> to vector<1x8x32xf32>
    %423 = vector.shape_cast %422 : vector<1x8x32xf32> to vector<8x32xf32>
    %424 = vector.extract_strided_slice %3 {offsets = [1, 0, 0], sizes = [1, 32, 32], strides = [1, 1, 1]} : vector<3x32x32xf32> to vector<1x32x32xf32>
    %425 = vector.shape_cast %424 : vector<1x32x32xf32> to vector<32x32xf32>
    %cst_113 = arith.constant dense<0.000000e+00> : vector<8x32xf32>
    %426 = tpu.matmul %367, %425, %cst_113 {dimension_numbers = #tpu.dot_dimension_numbers<[1], [0], [0], [1], [0, 0, 1, 1], [], []>} : vector<8x32xf32>, vector<32x32xf32>, vector<8x32xf32> -> vector<8x32xf32>
    %427 = arith.addf %423, %426 : vector<8x32xf32>
    %428 = arith.negf %427 : vector<8x32xf32>
    %429 = math.exp %428 : vector<8x32xf32>
    %cst_114 = arith.constant 1.000000e+00 : f32
    %430 = vector.broadcast %cst_114 : f32 to vector<8x32xf32>
    %431 = arith.addf %430, %429 : vector<8x32xf32>
    %432 = arith.divf %430, %431 : vector<8x32xf32>
    %433 = vector.extract_strided_slice %410 {offsets = [2, 0, 0], sizes = [1, 8, 32], strides = [1, 1, 1]} : vector<3x8x32xf32> to vector<1x8x32xf32>
    %434 = vector.shape_cast %433 : vector<1x8x32xf32> to vector<8x32xf32>
    %435 = vector.extract_strided_slice %3 {offsets = [2, 0, 0], sizes = [1, 32, 32], strides = [1, 1, 1]} : vector<3x32x32xf32> to vector<1x32x32xf32>
    %436 = vector.shape_cast %435 : vector<1x32x32xf32> to vector<32x32xf32>
    %cst_115 = arith.constant dense<0.000000e+00> : vector<8x32xf32>
    %437 = tpu.matmul %367, %436, %cst_115 {dimension_numbers = #tpu.dot_dimension_numbers<[1], [0], [0], [1], [0, 0, 1, 1], [], []>} : vector<8x32xf32>, vector<32x32xf32>, vector<8x32xf32> -> vector<8x32xf32>
    %438 = arith.addf %437, %7 : vector<8x32xf32>
    %439 = arith.mulf %421, %438 : vector<8x32xf32>
    %440 = arith.addf %434, %439 : vector<8x32xf32>
    %441 = math.tanh %440 : vector<8x32xf32>
    %cst_116 = arith.constant 1.000000e+00 : f32
    %442 = vector.broadcast %cst_116 : f32 to vector<8x32xf32>
    %443 = arith.subf %442, %432 : vector<8x32xf32>
    %444 = arith.mulf %443, %441 : vector<8x32xf32>
    %445 = arith.mulf %432, %367 : vector<8x32xf32>
    %446 = arith.addf %444, %445 : vector<8x32xf32>
    %c7_i32_117 = arith.constant 7 : i32
    %447 = arith.subi %c7_i32_117, %c5_i32 : i32
    %448 = arith.index_cast %447 : i32 to index
    %c0_118 = arith.constant 0 : index
    %c0_119 = arith.constant 0 : index
    %c0_120 = arith.constant 0 : index
    %449 = vector.load %arg2[%448, %c0_118, %c0_119, %c0_120] : memref<8x3x8x32xf32, #tpu.memory_space<vmem>>, vector<1x3x8x32xf32>
    %450 = vector.shape_cast %449 : vector<1x3x8x32xf32> to vector<3x8x32xf32>
    %451 = vector.extract_strided_slice %450 {offsets = [0, 0, 0], sizes = [1, 8, 32], strides = [1, 1, 1]} : vector<3x8x32xf32> to vector<1x8x32xf32>
    %452 = vector.shape_cast %451 : vector<1x8x32xf32> to vector<8x32xf32>
    %453 = vector.extract_strided_slice %4 {offsets = [0, 0, 0], sizes = [1, 32, 32], strides = [1, 1, 1]} : vector<3x32x32xf32> to vector<1x32x32xf32>
    %454 = vector.shape_cast %453 : vector<1x32x32xf32> to vector<32x32xf32>
    %cst_121 = arith.constant dense<0.000000e+00> : vector<8x32xf32>
    %455 = tpu.matmul %407, %454, %cst_121 {dimension_numbers = #tpu.dot_dimension_numbers<[1], [0], [0], [1], [0, 0, 1, 1], [], []>} : vector<8x32xf32>, vector<32x32xf32>, vector<8x32xf32> -> vector<8x32xf32>
    %456 = arith.addf %452, %455 : vector<8x32xf32>
    %457 = arith.negf %456 : vector<8x32xf32>
    %458 = math.exp %457 : vector<8x32xf32>
    %cst_122 = arith.constant 1.000000e+00 : f32
    %459 = vector.broadcast %cst_122 : f32 to vector<8x32xf32>
    %460 = arith.addf %459, %458 : vector<8x32xf32>
    %461 = arith.divf %459, %460 : vector<8x32xf32>
    %462 = vector.extract_strided_slice %450 {offsets = [1, 0, 0], sizes = [1, 8, 32], strides = [1, 1, 1]} : vector<3x8x32xf32> to vector<1x8x32xf32>
    %463 = vector.shape_cast %462 : vector<1x8x32xf32> to vector<8x32xf32>
    %464 = vector.extract_strided_slice %4 {offsets = [1, 0, 0], sizes = [1, 32, 32], strides = [1, 1, 1]} : vector<3x32x32xf32> to vector<1x32x32xf32>
    %465 = vector.shape_cast %464 : vector<1x32x32xf32> to vector<32x32xf32>
    %cst_123 = arith.constant dense<0.000000e+00> : vector<8x32xf32>
    %466 = tpu.matmul %407, %465, %cst_123 {dimension_numbers = #tpu.dot_dimension_numbers<[1], [0], [0], [1], [0, 0, 1, 1], [], []>} : vector<8x32xf32>, vector<32x32xf32>, vector<8x32xf32> -> vector<8x32xf32>
    %467 = arith.addf %463, %466 : vector<8x32xf32>
    %468 = arith.negf %467 : vector<8x32xf32>
    %469 = math.exp %468 : vector<8x32xf32>
    %cst_124 = arith.constant 1.000000e+00 : f32
    %470 = vector.broadcast %cst_124 : f32 to vector<8x32xf32>
    %471 = arith.addf %470, %469 : vector<8x32xf32>
    %472 = arith.divf %470, %471 : vector<8x32xf32>
    %473 = vector.extract_strided_slice %450 {offsets = [2, 0, 0], sizes = [1, 8, 32], strides = [1, 1, 1]} : vector<3x8x32xf32> to vector<1x8x32xf32>
    %474 = vector.shape_cast %473 : vector<1x8x32xf32> to vector<8x32xf32>
    %475 = vector.extract_strided_slice %4 {offsets = [2, 0, 0], sizes = [1, 32, 32], strides = [1, 1, 1]} : vector<3x32x32xf32> to vector<1x32x32xf32>
    %476 = vector.shape_cast %475 : vector<1x32x32xf32> to vector<32x32xf32>
    %cst_125 = arith.constant dense<0.000000e+00> : vector<8x32xf32>
    %477 = tpu.matmul %407, %476, %cst_125 {dimension_numbers = #tpu.dot_dimension_numbers<[1], [0], [0], [1], [0, 0, 1, 1], [], []>} : vector<8x32xf32>, vector<32x32xf32>, vector<8x32xf32> -> vector<8x32xf32>
    %478 = arith.addf %477, %10 : vector<8x32xf32>
    %479 = arith.mulf %461, %478 : vector<8x32xf32>
    %480 = arith.addf %474, %479 : vector<8x32xf32>
    %481 = math.tanh %480 : vector<8x32xf32>
    %cst_126 = arith.constant 1.000000e+00 : f32
    %482 = vector.broadcast %cst_126 : f32 to vector<8x32xf32>
    %483 = arith.subf %482, %472 : vector<8x32xf32>
    %484 = arith.mulf %483, %481 : vector<8x32xf32>
    %485 = arith.mulf %472, %407 : vector<8x32xf32>
    %486 = arith.addf %484, %485 : vector<8x32xf32>
    %c6_i32 = arith.constant 6 : i32
    %487 = arith.index_cast %c6_i32 : i32 to index
    %c0_127 = arith.constant 0 : index
    %c0_128 = arith.constant 0 : index
    %c0_129 = arith.constant 0 : index
    %488 = vector.load %arg1[%487, %c0_127, %c0_128, %c0_129] : memref<8x3x8x32xf32, #tpu.memory_space<vmem>>, vector<1x3x8x32xf32>
    %489 = vector.shape_cast %488 : vector<1x3x8x32xf32> to vector<3x8x32xf32>
    %490 = vector.extract_strided_slice %489 {offsets = [0, 0, 0], sizes = [1, 8, 32], strides = [1, 1, 1]} : vector<3x8x32xf32> to vector<1x8x32xf32>
    %491 = vector.shape_cast %490 : vector<1x8x32xf32> to vector<8x32xf32>
    %492 = vector.extract_strided_slice %3 {offsets = [0, 0, 0], sizes = [1, 32, 32], strides = [1, 1, 1]} : vector<3x32x32xf32> to vector<1x32x32xf32>
    %493 = vector.shape_cast %492 : vector<1x32x32xf32> to vector<32x32xf32>
    %cst_130 = arith.constant dense<0.000000e+00> : vector<8x32xf32>
    %494 = tpu.matmul %446, %493, %cst_130 {dimension_numbers = #tpu.dot_dimension_numbers<[1], [0], [0], [1], [0, 0, 1, 1], [], []>} : vector<8x32xf32>, vector<32x32xf32>, vector<8x32xf32> -> vector<8x32xf32>
    %495 = arith.addf %491, %494 : vector<8x32xf32>
    %496 = arith.negf %495 : vector<8x32xf32>
    %497 = math.exp %496 : vector<8x32xf32>
    %cst_131 = arith.constant 1.000000e+00 : f32
    %498 = vector.broadcast %cst_131 : f32 to vector<8x32xf32>
    %499 = arith.addf %498, %497 : vector<8x32xf32>
    %500 = arith.divf %498, %499 : vector<8x32xf32>
    %501 = vector.extract_strided_slice %489 {offsets = [1, 0, 0], sizes = [1, 8, 32], strides = [1, 1, 1]} : vector<3x8x32xf32> to vector<1x8x32xf32>
    %502 = vector.shape_cast %501 : vector<1x8x32xf32> to vector<8x32xf32>
    %503 = vector.extract_strided_slice %3 {offsets = [1, 0, 0], sizes = [1, 32, 32], strides = [1, 1, 1]} : vector<3x32x32xf32> to vector<1x32x32xf32>
    %504 = vector.shape_cast %503 : vector<1x32x32xf32> to vector<32x32xf32>
    %cst_132 = arith.constant dense<0.000000e+00> : vector<8x32xf32>
    %505 = tpu.matmul %446, %504, %cst_132 {dimension_numbers = #tpu.dot_dimension_numbers<[1], [0], [0], [1], [0, 0, 1, 1], [], []>} : vector<8x32xf32>, vector<32x32xf32>, vector<8x32xf32> -> vector<8x32xf32>
    %506 = arith.addf %502, %505 : vector<8x32xf32>
    %507 = arith.negf %506 : vector<8x32xf32>
    %508 = math.exp %507 : vector<8x32xf32>
    %cst_133 = arith.constant 1.000000e+00 : f32
    %509 = vector.broadcast %cst_133 : f32 to vector<8x32xf32>
    %510 = arith.addf %509, %508 : vector<8x32xf32>
    %511 = arith.divf %509, %510 : vector<8x32xf32>
    %512 = vector.extract_strided_slice %489 {offsets = [2, 0, 0], sizes = [1, 8, 32], strides = [1, 1, 1]} : vector<3x8x32xf32> to vector<1x8x32xf32>
    %513 = vector.shape_cast %512 : vector<1x8x32xf32> to vector<8x32xf32>
    %514 = vector.extract_strided_slice %3 {offsets = [2, 0, 0], sizes = [1, 32, 32], strides = [1, 1, 1]} : vector<3x32x32xf32> to vector<1x32x32xf32>
    %515 = vector.shape_cast %514 : vector<1x32x32xf32> to vector<32x32xf32>
    %cst_134 = arith.constant dense<0.000000e+00> : vector<8x32xf32>
    %516 = tpu.matmul %446, %515, %cst_134 {dimension_numbers = #tpu.dot_dimension_numbers<[1], [0], [0], [1], [0, 0, 1, 1], [], []>} : vector<8x32xf32>, vector<32x32xf32>, vector<8x32xf32> -> vector<8x32xf32>
    %517 = arith.addf %516, %7 : vector<8x32xf32>
    %518 = arith.mulf %500, %517 : vector<8x32xf32>
    %519 = arith.addf %513, %518 : vector<8x32xf32>
    %520 = math.tanh %519 : vector<8x32xf32>
    %cst_135 = arith.constant 1.000000e+00 : f32
    %521 = vector.broadcast %cst_135 : f32 to vector<8x32xf32>
    %522 = arith.subf %521, %511 : vector<8x32xf32>
    %523 = arith.mulf %522, %520 : vector<8x32xf32>
    %524 = arith.mulf %511, %446 : vector<8x32xf32>
    %525 = arith.addf %523, %524 : vector<8x32xf32>
    %c7_i32_136 = arith.constant 7 : i32
    %526 = arith.subi %c7_i32_136, %c6_i32 : i32
    %527 = arith.index_cast %526 : i32 to index
    %c0_137 = arith.constant 0 : index
    %c0_138 = arith.constant 0 : index
    %c0_139 = arith.constant 0 : index
    %528 = vector.load %arg2[%527, %c0_137, %c0_138, %c0_139] : memref<8x3x8x32xf32, #tpu.memory_space<vmem>>, vector<1x3x8x32xf32>
    %529 = vector.shape_cast %528 : vector<1x3x8x32xf32> to vector<3x8x32xf32>
    %530 = vector.extract_strided_slice %529 {offsets = [0, 0, 0], sizes = [1, 8, 32], strides = [1, 1, 1]} : vector<3x8x32xf32> to vector<1x8x32xf32>
    %531 = vector.shape_cast %530 : vector<1x8x32xf32> to vector<8x32xf32>
    %532 = vector.extract_strided_slice %4 {offsets = [0, 0, 0], sizes = [1, 32, 32], strides = [1, 1, 1]} : vector<3x32x32xf32> to vector<1x32x32xf32>
    %533 = vector.shape_cast %532 : vector<1x32x32xf32> to vector<32x32xf32>
    %cst_140 = arith.constant dense<0.000000e+00> : vector<8x32xf32>
    %534 = tpu.matmul %486, %533, %cst_140 {dimension_numbers = #tpu.dot_dimension_numbers<[1], [0], [0], [1], [0, 0, 1, 1], [], []>} : vector<8x32xf32>, vector<32x32xf32>, vector<8x32xf32> -> vector<8x32xf32>
    %535 = arith.addf %531, %534 : vector<8x32xf32>
    %536 = arith.negf %535 : vector<8x32xf32>
    %537 = math.exp %536 : vector<8x32xf32>
    %cst_141 = arith.constant 1.000000e+00 : f32
    %538 = vector.broadcast %cst_141 : f32 to vector<8x32xf32>
    %539 = arith.addf %538, %537 : vector<8x32xf32>
    %540 = arith.divf %538, %539 : vector<8x32xf32>
    %541 = vector.extract_strided_slice %529 {offsets = [1, 0, 0], sizes = [1, 8, 32], strides = [1, 1, 1]} : vector<3x8x32xf32> to vector<1x8x32xf32>
    %542 = vector.shape_cast %541 : vector<1x8x32xf32> to vector<8x32xf32>
    %543 = vector.extract_strided_slice %4 {offsets = [1, 0, 0], sizes = [1, 32, 32], strides = [1, 1, 1]} : vector<3x32x32xf32> to vector<1x32x32xf32>
    %544 = vector.shape_cast %543 : vector<1x32x32xf32> to vector<32x32xf32>
    %cst_142 = arith.constant dense<0.000000e+00> : vector<8x32xf32>
    %545 = tpu.matmul %486, %544, %cst_142 {dimension_numbers = #tpu.dot_dimension_numbers<[1], [0], [0], [1], [0, 0, 1, 1], [], []>} : vector<8x32xf32>, vector<32x32xf32>, vector<8x32xf32> -> vector<8x32xf32>
    %546 = arith.addf %542, %545 : vector<8x32xf32>
    %547 = arith.negf %546 : vector<8x32xf32>
    %548 = math.exp %547 : vector<8x32xf32>
    %cst_143 = arith.constant 1.000000e+00 : f32
    %549 = vector.broadcast %cst_143 : f32 to vector<8x32xf32>
    %550 = arith.addf %549, %548 : vector<8x32xf32>
    %551 = arith.divf %549, %550 : vector<8x32xf32>
    %552 = vector.extract_strided_slice %529 {offsets = [2, 0, 0], sizes = [1, 8, 32], strides = [1, 1, 1]} : vector<3x8x32xf32> to vector<1x8x32xf32>
    %553 = vector.shape_cast %552 : vector<1x8x32xf32> to vector<8x32xf32>
    %554 = vector.extract_strided_slice %4 {offsets = [2, 0, 0], sizes = [1, 32, 32], strides = [1, 1, 1]} : vector<3x32x32xf32> to vector<1x32x32xf32>
    %555 = vector.shape_cast %554 : vector<1x32x32xf32> to vector<32x32xf32>
    %cst_144 = arith.constant dense<0.000000e+00> : vector<8x32xf32>
    %556 = tpu.matmul %486, %555, %cst_144 {dimension_numbers = #tpu.dot_dimension_numbers<[1], [0], [0], [1], [0, 0, 1, 1], [], []>} : vector<8x32xf32>, vector<32x32xf32>, vector<8x32xf32> -> vector<8x32xf32>
    %557 = arith.addf %556, %10 : vector<8x32xf32>
    %558 = arith.mulf %540, %557 : vector<8x32xf32>
    %559 = arith.addf %553, %558 : vector<8x32xf32>
    %560 = math.tanh %559 : vector<8x32xf32>
    %cst_145 = arith.constant 1.000000e+00 : f32
    %561 = vector.broadcast %cst_145 : f32 to vector<8x32xf32>
    %562 = arith.subf %561, %551 : vector<8x32xf32>
    %563 = arith.mulf %562, %560 : vector<8x32xf32>
    %564 = arith.mulf %551, %486 : vector<8x32xf32>
    %565 = arith.addf %563, %564 : vector<8x32xf32>
    %c7_i32_146 = arith.constant 7 : i32
    %566 = arith.index_cast %c7_i32_146 : i32 to index
    %c0_147 = arith.constant 0 : index
    %c0_148 = arith.constant 0 : index
    %c0_149 = arith.constant 0 : index
    %567 = vector.load %arg1[%566, %c0_147, %c0_148, %c0_149] : memref<8x3x8x32xf32, #tpu.memory_space<vmem>>, vector<1x3x8x32xf32>
    %568 = vector.shape_cast %567 : vector<1x3x8x32xf32> to vector<3x8x32xf32>
    %569 = vector.extract_strided_slice %568 {offsets = [0, 0, 0], sizes = [1, 8, 32], strides = [1, 1, 1]} : vector<3x8x32xf32> to vector<1x8x32xf32>
    %570 = vector.shape_cast %569 : vector<1x8x32xf32> to vector<8x32xf32>
    %571 = vector.extract_strided_slice %3 {offsets = [0, 0, 0], sizes = [1, 32, 32], strides = [1, 1, 1]} : vector<3x32x32xf32> to vector<1x32x32xf32>
    %572 = vector.shape_cast %571 : vector<1x32x32xf32> to vector<32x32xf32>
    %cst_150 = arith.constant dense<0.000000e+00> : vector<8x32xf32>
    %573 = tpu.matmul %525, %572, %cst_150 {dimension_numbers = #tpu.dot_dimension_numbers<[1], [0], [0], [1], [0, 0, 1, 1], [], []>} : vector<8x32xf32>, vector<32x32xf32>, vector<8x32xf32> -> vector<8x32xf32>
    %574 = arith.addf %570, %573 : vector<8x32xf32>
    %575 = arith.negf %574 : vector<8x32xf32>
    %576 = math.exp %575 : vector<8x32xf32>
    %cst_151 = arith.constant 1.000000e+00 : f32
    %577 = vector.broadcast %cst_151 : f32 to vector<8x32xf32>
    %578 = arith.addf %577, %576 : vector<8x32xf32>
    %579 = arith.divf %577, %578 : vector<8x32xf32>
    %580 = vector.extract_strided_slice %568 {offsets = [1, 0, 0], sizes = [1, 8, 32], strides = [1, 1, 1]} : vector<3x8x32xf32> to vector<1x8x32xf32>
    %581 = vector.shape_cast %580 : vector<1x8x32xf32> to vector<8x32xf32>
    %582 = vector.extract_strided_slice %3 {offsets = [1, 0, 0], sizes = [1, 32, 32], strides = [1, 1, 1]} : vector<3x32x32xf32> to vector<1x32x32xf32>
    %583 = vector.shape_cast %582 : vector<1x32x32xf32> to vector<32x32xf32>
    %cst_152 = arith.constant dense<0.000000e+00> : vector<8x32xf32>
    %584 = tpu.matmul %525, %583, %cst_152 {dimension_numbers = #tpu.dot_dimension_numbers<[1], [0], [0], [1], [0, 0, 1, 1], [], []>} : vector<8x32xf32>, vector<32x32xf32>, vector<8x32xf32> -> vector<8x32xf32>
    %585 = arith.addf %581, %584 : vector<8x32xf32>
    %586 = arith.negf %585 : vector<8x32xf32>
    %587 = math.exp %586 : vector<8x32xf32>
    %cst_153 = arith.constant 1.000000e+00 : f32
    %588 = vector.broadcast %cst_153 : f32 to vector<8x32xf32>
    %589 = arith.addf %588, %587 : vector<8x32xf32>
    %590 = arith.divf %588, %589 : vector<8x32xf32>
    %591 = vector.extract_strided_slice %568 {offsets = [2, 0, 0], sizes = [1, 8, 32], strides = [1, 1, 1]} : vector<3x8x32xf32> to vector<1x8x32xf32>
    %592 = vector.shape_cast %591 : vector<1x8x32xf32> to vector<8x32xf32>
    %593 = vector.extract_strided_slice %3 {offsets = [2, 0, 0], sizes = [1, 32, 32], strides = [1, 1, 1]} : vector<3x32x32xf32> to vector<1x32x32xf32>
    %594 = vector.shape_cast %593 : vector<1x32x32xf32> to vector<32x32xf32>
    %cst_154 = arith.constant dense<0.000000e+00> : vector<8x32xf32>
    %595 = tpu.matmul %525, %594, %cst_154 {dimension_numbers = #tpu.dot_dimension_numbers<[1], [0], [0], [1], [0, 0, 1, 1], [], []>} : vector<8x32xf32>, vector<32x32xf32>, vector<8x32xf32> -> vector<8x32xf32>
    %596 = arith.addf %595, %7 : vector<8x32xf32>
    %597 = arith.mulf %579, %596 : vector<8x32xf32>
    %598 = arith.addf %592, %597 : vector<8x32xf32>
    %599 = math.tanh %598 : vector<8x32xf32>
    %cst_155 = arith.constant 1.000000e+00 : f32
    %600 = vector.broadcast %cst_155 : f32 to vector<8x32xf32>
    %601 = arith.subf %600, %590 : vector<8x32xf32>
    %602 = arith.mulf %601, %599 : vector<8x32xf32>
    %603 = arith.mulf %590, %525 : vector<8x32xf32>
    %604 = arith.addf %602, %603 : vector<8x32xf32>
    %c7_i32_156 = arith.constant 7 : i32
    %605 = arith.subi %c7_i32_156, %c7_i32_146 : i32
    %606 = arith.index_cast %605 : i32 to index
    %c0_157 = arith.constant 0 : index
    %c0_158 = arith.constant 0 : index
    %c0_159 = arith.constant 0 : index
    %607 = vector.load %arg2[%606, %c0_157, %c0_158, %c0_159] : memref<8x3x8x32xf32, #tpu.memory_space<vmem>>, vector<1x3x8x32xf32>
    %608 = vector.shape_cast %607 : vector<1x3x8x32xf32> to vector<3x8x32xf32>
    %609 = vector.extract_strided_slice %608 {offsets = [0, 0, 0], sizes = [1, 8, 32], strides = [1, 1, 1]} : vector<3x8x32xf32> to vector<1x8x32xf32>
    %610 = vector.shape_cast %609 : vector<1x8x32xf32> to vector<8x32xf32>
    %611 = vector.extract_strided_slice %4 {offsets = [0, 0, 0], sizes = [1, 32, 32], strides = [1, 1, 1]} : vector<3x32x32xf32> to vector<1x32x32xf32>
    %612 = vector.shape_cast %611 : vector<1x32x32xf32> to vector<32x32xf32>
    %cst_160 = arith.constant dense<0.000000e+00> : vector<8x32xf32>
    %613 = tpu.matmul %565, %612, %cst_160 {dimension_numbers = #tpu.dot_dimension_numbers<[1], [0], [0], [1], [0, 0, 1, 1], [], []>} : vector<8x32xf32>, vector<32x32xf32>, vector<8x32xf32> -> vector<8x32xf32>
    %614 = arith.addf %610, %613 : vector<8x32xf32>
    %615 = arith.negf %614 : vector<8x32xf32>
    %616 = math.exp %615 : vector<8x32xf32>
    %cst_161 = arith.constant 1.000000e+00 : f32
    %617 = vector.broadcast %cst_161 : f32 to vector<8x32xf32>
    %618 = arith.addf %617, %616 : vector<8x32xf32>
    %619 = arith.divf %617, %618 : vector<8x32xf32>
    %620 = vector.extract_strided_slice %608 {offsets = [1, 0, 0], sizes = [1, 8, 32], strides = [1, 1, 1]} : vector<3x8x32xf32> to vector<1x8x32xf32>
    %621 = vector.shape_cast %620 : vector<1x8x32xf32> to vector<8x32xf32>
    %622 = vector.extract_strided_slice %4 {offsets = [1, 0, 0], sizes = [1, 32, 32], strides = [1, 1, 1]} : vector<3x32x32xf32> to vector<1x32x32xf32>
    %623 = vector.shape_cast %622 : vector<1x32x32xf32> to vector<32x32xf32>
    %cst_162 = arith.constant dense<0.000000e+00> : vector<8x32xf32>
    %624 = tpu.matmul %565, %623, %cst_162 {dimension_numbers = #tpu.dot_dimension_numbers<[1], [0], [0], [1], [0, 0, 1, 1], [], []>} : vector<8x32xf32>, vector<32x32xf32>, vector<8x32xf32> -> vector<8x32xf32>
    %625 = arith.addf %621, %624 : vector<8x32xf32>
    %626 = arith.negf %625 : vector<8x32xf32>
    %627 = math.exp %626 : vector<8x32xf32>
    %cst_163 = arith.constant 1.000000e+00 : f32
    %628 = vector.broadcast %cst_163 : f32 to vector<8x32xf32>
    %629 = arith.addf %628, %627 : vector<8x32xf32>
    %630 = arith.divf %628, %629 : vector<8x32xf32>
    %631 = vector.extract_strided_slice %608 {offsets = [2, 0, 0], sizes = [1, 8, 32], strides = [1, 1, 1]} : vector<3x8x32xf32> to vector<1x8x32xf32>
    %632 = vector.shape_cast %631 : vector<1x8x32xf32> to vector<8x32xf32>
    %633 = vector.extract_strided_slice %4 {offsets = [2, 0, 0], sizes = [1, 32, 32], strides = [1, 1, 1]} : vector<3x32x32xf32> to vector<1x32x32xf32>
    %634 = vector.shape_cast %633 : vector<1x32x32xf32> to vector<32x32xf32>
    %cst_164 = arith.constant dense<0.000000e+00> : vector<8x32xf32>
    %635 = tpu.matmul %565, %634, %cst_164 {dimension_numbers = #tpu.dot_dimension_numbers<[1], [0], [0], [1], [0, 0, 1, 1], [], []>} : vector<8x32xf32>, vector<32x32xf32>, vector<8x32xf32> -> vector<8x32xf32>
    %636 = arith.addf %635, %10 : vector<8x32xf32>
    %637 = arith.mulf %619, %636 : vector<8x32xf32>
    %638 = arith.addf %632, %637 : vector<8x32xf32>
    %639 = math.tanh %638 : vector<8x32xf32>
    %cst_165 = arith.constant 1.000000e+00 : f32
    %640 = vector.broadcast %cst_165 : f32 to vector<8x32xf32>
    %641 = arith.subf %640, %630 : vector<8x32xf32>
    %642 = arith.mulf %641, %639 : vector<8x32xf32>
    %643 = arith.mulf %630, %565 : vector<8x32xf32>
    %644 = arith.addf %642, %643 : vector<8x32xf32>
    %c8_i32 = arith.constant 8 : i32
    %c0_166 = arith.constant 0 : index
    %c0_167 = arith.constant 0 : index
    %645 = vector.load %arg11[%c0_166, %c0_167] : memref<8x32xf32, #tpu.memory_space<vmem>>, vector<8x32xf32>
    tpu.vector_store %arg11[%c0_166, %c0_167], %604 {strides = array<i32>} : memref<8x32xf32, #tpu.memory_space<vmem>>, vector<8x32xf32>,
    %c0_168 = arith.constant 0 : index
    %c0_169 = arith.constant 0 : index
    %646 = vector.load %arg12[%c0_168, %c0_169] : memref<8x32xf32, #tpu.memory_space<vmem>>, vector<8x32xf32>
    tpu.vector_store %arg12[%c0_168, %c0_169], %644 {strides = array<i32>} : memref<8x32xf32, #tpu.memory_space<vmem>>, vector<8x32xf32>,
    %c0_i32_170 = arith.constant 0 : i32
    %647 = arith.cmpi eq, %arg0, %c0_i32_170 : i32
    %648 = arith.extui %647 : i1 to i32
    %c0_i32_171 = arith.constant 0 : i32
    %649 = arith.cmpi ne, %648, %c0_i32_171 : i32
    scf.if %649 {
      %c0_172 = arith.constant 0 : index
      %c0_173 = arith.constant 0 : index
      %650 = vector.load %arg7[%c0_172, %c0_173] : memref<32x1xf32, #tpu.memory_space<vmem>>, vector<32x1xf32>
      %cst_174 = arith.constant dense<0.000000e+00> : vector<8x1xf32>
      %651 = tpu.matmul %604, %650, %cst_174 {dimension_numbers = #tpu.dot_dimension_numbers<[1], [0], [0], [1], [0, 0, 1, 1], [], []>} : vector<8x32xf32>, vector<32x1xf32>, vector<8x1xf32> -> vector<8x1xf32>
      %c0_175 = arith.constant 0 : index
      %c0_176 = arith.constant 0 : index
      %652 = vector.load %arg8[%c0_175, %c0_176] : memref<32x1xf32, #tpu.memory_space<vmem>>, vector<32x1xf32>
      %cst_177 = arith.constant dense<0.000000e+00> : vector<8x1xf32>
      %653 = tpu.matmul %644, %652, %cst_177 {dimension_numbers = #tpu.dot_dimension_numbers<[1], [0], [0], [1], [0, 0, 1, 1], [], []>} : vector<8x32xf32>, vector<32x1xf32>, vector<8x1xf32> -> vector<8x1xf32>
      %654 = arith.addf %651, %653 : vector<8x1xf32>
      %c0_178 = arith.constant 0 : index
      %c0_179 = arith.constant 0 : index
      %655 = vector.load %arg9[%c0_178, %c0_179] : memref<1x1xf32, #tpu.memory_space<vmem>>, vector<1x1xf32>
      %656 = vector.broadcast %655 : vector<1x1xf32> to vector<8x1xf32>
      %657 = arith.addf %654, %656 : vector<8x1xf32>
      %c0_180 = arith.constant 0 : index
      %c0_181 = arith.constant 0 : index
      %658 = vector.load %arg10[%c0_180, %c0_181] : memref<8x1xf32, #tpu.memory_space<vmem>>, vector<8x1xf32>
      tpu.vector_store %arg10[%c0_180, %c0_181], %657 {strides = array<i32>} : memref<8x1xf32, #tpu.memory_space<vmem>>, vector<8x1xf32>,
    } else {
    }
    return
  }
  func.func @transform_0(%arg0: i32) -> (i32, i32, i32, i32) {
    %c0_i32 = arith.constant 0 : i32
    %c0_i32_0 = arith.constant 0 : i32
    %c0_i32_1 = arith.constant 0 : i32
    %c0_i32_2 = arith.constant 0 : i32
    return %arg0, %c0_i32, %c0_i32_0, %c0_i32_1 : i32, i32, i32, i32
  }
  func.func @transform_1(%arg0: i32) -> (i32, i32, i32, i32) {
    %c0_i32 = arith.constant 0 : i32
    %0 = arith.subi %c0_i32, %arg0 : i32
    %c0_i32_0 = arith.constant 0 : i32
    %c0_i32_1 = arith.constant 0 : i32
    %c0_i32_2 = arith.constant 0 : i32
    %c0_i32_3 = arith.constant 0 : i32
    return %0, %c0_i32_0, %c0_i32_1, %c0_i32_2 : i32, i32, i32, i32
  }
  func.func @transform_2(%arg0: i32) -> (i32, i32, i32) {
    %c0_i32 = arith.constant 0 : i32
    %c0_i32_0 = arith.constant 0 : i32
    %c0_i32_1 = arith.constant 0 : i32
    %c0_i32_2 = arith.constant 0 : i32
    return %c0_i32, %c0_i32_0, %c0_i32_1 : i32, i32, i32
  }
  func.func @transform_3(%arg0: i32) -> (i32, i32, i32) {
    %c0_i32 = arith.constant 0 : i32
    %c0_i32_0 = arith.constant 0 : i32
    %c0_i32_1 = arith.constant 0 : i32
    %c0_i32_2 = arith.constant 0 : i32
    return %c0_i32, %c0_i32_0, %c0_i32_1 : i32, i32, i32
  }
  func.func @transform_4(%arg0: i32) -> (i32, i32) {
    %c0_i32 = arith.constant 0 : i32
    %c0_i32_0 = arith.constant 0 : i32
    %c0_i32_1 = arith.constant 0 : i32
    return %c0_i32, %c0_i32_0 : i32, i32
  }
  func.func @transform_5(%arg0: i32) -> (i32, i32) {
    %c0_i32 = arith.constant 0 : i32
    %c0_i32_0 = arith.constant 0 : i32
    %c0_i32_1 = arith.constant 0 : i32
    return %c0_i32, %c0_i32_0 : i32, i32
  }
  func.func @transform_6(%arg0: i32) -> (i32, i32) {
    %c0_i32 = arith.constant 0 : i32
    %c0_i32_0 = arith.constant 0 : i32
    %c0_i32_1 = arith.constant 0 : i32
    return %c0_i32, %c0_i32_0 : i32, i32
  }
  func.func @transform_7(%arg0: i32) -> (i32, i32) {
    %c0_i32 = arith.constant 0 : i32
    %c0_i32_0 = arith.constant 0 : i32
    %c0_i32_1 = arith.constant 0 : i32
    return %c0_i32, %c0_i32_0 : i32, i32
  }
  func.func @transform_8(%arg0: i32) -> (i32, i32) {
    %c0_i32 = arith.constant 0 : i32
    %c0_i32_0 = arith.constant 0 : i32
    %c0_i32_1 = arith.constant 0 : i32
    return %c0_i32, %c0_i32_0 : i32, i32
  }
  func.func @transform_9(%arg0: i32) -> (i32, i32) {
    %c0_i32 = arith.constant 0 : i32
    %c0_i32_0 = arith.constant 0 : i32
    %c0_i32_1 = arith.constant 0 : i32
    return %c0_i32, %c0_i32_0 : i32, i32
  }
}

</mosaic_0001>

<bundles_post_ra>
// kernel: gru_model_pallas.2
= control target key start
LH: loop header
LB: loop body
LE: loop exit
PB: predicated region body
PF: predicated region fallthrough
CT: control target
= control target key end

     0   :  { %vm35_vm0 = vcmask 64512   ;;  %vm147_vm1 = vcmask 261120   ;;  %s374_s20 = smov 96   ;;  %s697_s1 = inlined_call_operand.vmem [shape: f32[8,96], index: 1, kind: input, shape index: {}]   ;;  %s698_s2 = inlined_call_operand.vmem [shape: f32[8,96], index: 2, kind: input, shape index: {}]   ;;  %s699_s0 = inlined_call_operand.vmem [shape: f32[8,8,8], index: 0, kind: input, shape index: {}]   ;;  %s700_s3 = inlined_call_operand.vmem [shape: f32[1,96], index: 3, kind: input, shape index: {}]   ;;  %s701_s4 = inlined_call_operand.vmem [shape: f32[1,96], index: 4, kind: input, shape index: {}]   ;;  %s702_s5 = inlined_call_operand.vmem [shape: f32[8,3,8,32], index: 5, kind: output, shape index: {0}]   ;;  %s703_s6 = inlined_call_operand.vmem [shape: f32[8,3,8,32], index: 6, kind: output, shape index: {1}]  }
   0x1   :  { %v30_v0 = vld [vmem:[%s697_s1] sm:$0xff]  ;;  %v23_v4 = vld [vmem:[%s699_s0 + $0x8] sm:$0xff]  ;;  %v24_v6 = vld [vmem:[%s699_s0 + $0x10] sm:$0xff] }
   0x2   :  { %v101_v1 = vld [vmem:[%s698_s2] sm:$0xff]  ;;  %75 = vmatpush.msra.mxu0 %v30_v0  ;;  %368 = vmatpush.msra.mxu2 %v30_v0  ;;  %v27_v5 = vld [vmem:[%s699_s0 + $0x28] sm:$0xff]  ;;  %v28_v7 = vld [vmem:[%s699_s0 + $0x30] sm:$0xff] }
   0x3   :  { %v22_v2 = vld [vmem:[%s699_s0] sm:$0xff]  ;;  %121 = vmatpush.msra.mxu1 %v101_v1  ;;  %369 = vmatpush.msra.mxu3 %v101_v1  ;;  %v25_v8 = vld [vmem:[%s699_s0 + $0x18] sm:$0xff] }
   0x4   :  { %v26_v3 = vld [vmem:[%s699_s0 + $0x20] sm:$0xff]  ;;  %320 = vmatmul.msk.f32.vlgmr.msra.gmra.mxu0 %vm35_vm0, %v22_v2  ;;  %328 = vmatmul.msk.f32.vlgmr.msra.gmra.mxu1 %vm35_vm0, %v22_v2  ;;  %v29_v9 = vld [vmem:[%s699_s0 + $0x38] sm:$0xff] }
   0x5   :  { %324 = vmatmul.msk.f32.vlgmr.msra.gmra.mxu2 %vm35_vm0, %v26_v3  ;;  %332 = vmatmul.msk.f32.vlgmr.msra.gmra.mxu3 %vm35_vm0, %v26_v3  ;;  %v372_v10 = vld [vmem:[%s700_s3] ss:$0 sm:$0xff]  ;;  %s375_s3 = smov 64  }
   0x6   :  { %v463_v11 = vld [vmem:[%s701_s4] ss:$0 sm:$0xff] }
   0xc   :  { %329 = vmatmul.msk.f32.gmra.mxu1 %vm35_vm0, %v23_v4  ;;  %321 = vmatmul.msk.f32.gmra.mxu0 %vm35_vm0, %v23_v4 }
   0xd   :  { %333 = vmatmul.msk.f32.gmra.mxu3 %vm35_vm0, %v27_v5  ;;  %325 = vmatmul.msk.f32.gmra.mxu2 %vm35_vm0, %v27_v5 }
  0x14   :  { %322 = vmatmul.msk.f32.gmra.mxu0 %vm35_vm0, %v24_v6  ;;  %330 = vmatmul.msk.f32.gmra.mxu1 %vm35_vm0, %v24_v6 }
  0x15   :  { %326 = vmatmul.msk.f32.gmra.mxu2 %vm35_vm0, %v28_v7  ;;  %334 = vmatmul.msk.f32.gmra.mxu3 %vm35_vm0, %v28_v7 }
  0x1c   :  { %323 = vmatmul.msk.f32.gmra.mxu0 %vm35_vm0, %v25_v8  ;;  %331 = vmatmul.msk.f32.gmra.mxu1 %vm35_vm0, %v25_v8 }
  0x1d   :  { %327 = vmatmul.msk.f32.gmra.mxu2 %vm35_vm0, %v29_v9  ;;  %335 = vmatmul.msk.f32.gmra.mxu3 %vm35_vm0, %v29_v9 }
  0x81   :  { %v77_v12 = vpop.f32.mrf.mxu0  ;;  %v123_v13 = vpop.f32.mrf.mxu1 }
  0x82   :  { %v78_v14 = vadd.f32 %v372_v10, %v77_v12  ;;  %v124_v15 = vadd.f32 %v463_v11, %v123_v13 }
  0x84   :  { %148 = vst.msk [vmem:[%s702_s5] sm:$0xff] %vm147_vm1, %v78_v14  ;;  %213 = vrot.lane.b32.xlu2 %v124_v15, %s374_s20  ;;  %246 = vrot.lane.b32.xlu1 %v78_v14, %s375_s3 }
  0x85   :  { %156 = vst.msk [vmem:[%s703_s6] sm:$0xff] %vm147_vm1, %v124_v15  ;;  %172 = vrot.lane.b32.xlu0 %v78_v14, %s374_s20 }
  0x88   :  { %v89_v16 = vpop.f32.mrf.mxu2  ;;  %v135_v17 = vpop.f32.mrf.mxu3 }
  0x89   :  { %v90_v18 = vadd.f32 %v372_v10, %v89_v16  ;;  %v136_v19 = vadd.f32 %v463_v11, %v135_v17  ;;  %v126_v20 = vpop.f32.mrf.mxu1  ;;  %v80_v21 = vpop.f32.mrf.mxu0 }
  0x8a   :  { %v127_v22 = vadd.f32 %v463_v11, %v126_v20  ;;  %v81_v23 = vadd.f32 %v372_v10, %v80_v21 }
  0x8b   :  { %152 = vst.msk [vmem:[%s702_s5 + $0x60] sm:$0xff] %vm147_vm1, %v90_v18 }
  0x8c   :  { %180 = vrot.lane.b32.xlu2 %v90_v18, %s374_s20  ;;  %287 = vrot.lane.b32.xlu1 %v136_v19, %s375_s3  ;;  %160 = vst.msk [vmem:[%s703_s6 + $0x60] sm:$0xff] %vm147_vm1, %v136_v19 }
  0x8d   :  { %279 = vrot.lane.b32.xlu0 %v124_v15, %s375_s3  ;;  %157 = vst.msk [vmem:[%s703_s6 + $0x18] sm:$0xff] %vm147_vm1, %v127_v22 }
  0x8e   :  { %149 = vst.msk [vmem:[%s702_s5 + $0x18] sm:$0xff] %vm147_vm1, %v81_v23 }
  0x90   :  { %v138_v24 = vpop.f32.mrf.mxu3  ;;  %v92_v25 = vpop.f32.mrf.mxu2 }
  0x91   :  { %v139_v26 = vadd.f32 %v463_v11, %v138_v24  ;;  %v83_v27 = vpop.f32.mrf.mxu0  ;;  %v129_v28 = vpop.f32.mrf.mxu1  ;;  %v93_v31 = vadd.f32 %v372_v10, %v92_v25 }
  0x92   :  { %v84_v29 = vadd.f32 %v372_v10, %v83_v27  ;;  %v130_v30 = vadd.f32 %v463_v11, %v129_v28 }
  0x93   :  { %161 = vst.msk [vmem:[%s703_s6 + $0x78] sm:$0xff] %vm147_vm1, %v139_v26 }
  0x94   :  { %254 = vrot.lane.b32.xlu2 %v90_v18, %s375_s3  ;;  %281 = vrot.lane.b32.xlu1 %v127_v22, %s375_s3  ;;  %150 = vst.msk [vmem:[%s702_s5 + $0x30] sm:$0xff] %vm147_vm1, %v84_v29 }
  0x95   :  { %221 = vrot.lane.b32.xlu0 %v136_v19, %s374_s20  ;;  %153 = vst.msk [vmem:[%s702_s5 + $0x78] sm:$0xff] %vm147_vm1, %v93_v31 }
  0x96   :  { %158 = vst.msk [vmem:[%s703_s6 + $0x30] sm:$0xff] %vm147_vm1, %v130_v30 }
  0x98   :  { %v95_v32 = vpop.f32.mrf.mxu2  ;;  %v141_v33 = vpop.f32.mrf.mxu3 }
  0x99   :  { %v96_v34 = vadd.f32 %v372_v10, %v95_v32  ;;  %v86_v35 = vpop.f32.mrf.mxu0  ;;  %v132_v36 = vpop.f32.mrf.mxu1  ;;  %v142_v37 = vadd.f32 %v463_v11, %v141_v33 }
  0x9a   :  { %v87_v38 = vadd.f32 %v372_v10, %v86_v35  ;;  %v133_v39 = vadd.f32 %v463_v11, %v132_v36 }
  0x9b   :  { %154 = vst.msk [vmem:[%s702_s5 + $0x90] sm:$0xff] %vm147_vm1, %v96_v34 }
  0x9c   :  { %248 = vrot.lane.b32.xlu2 %v81_v23, %s375_s3  ;;  %223 = vrot.lane.b32.xlu1 %v139_v26, %s374_s20  ;;  %162 = vst.msk [vmem:[%s703_s6 + $0x90] sm:$0xff] %vm147_vm1, %v142_v37 }
  0x9d   :  { %174 = vrot.lane.b32.xlu0 %v81_v23, %s374_s20  ;;  %151 = vst.msk [vmem:[%s702_s5 + $0x48] sm:$0xff] %vm147_vm1, %v87_v38 }
  0x9e   :  { %159 = vst.msk [vmem:[%s703_s6 + $0x48] sm:$0xff] %vm147_vm1, %v133_v39 }
  0xa0   :  { %v98_v40 = vpop.f32.mrf.mxu2  ;;  %v144_v42 = vpop.f32.mrf.mxu3 }
  0xa1   :  { %v99_v41 = vadd.f32 %v372_v10, %v98_v40  ;;  %v145_v43 = vadd.f32 %v463_v11, %v144_v42 }
  0xa3   :  { %155 = vst.msk [vmem:[%s702_s5 + $0xa8] sm:$0xff] %vm147_vm1, %v99_v41 }
  0xa4   :  { %182 = vrot.lane.b32.xlu2 %v93_v31, %s374_s20  ;;  %176 = vrot.lane.b32.xlu1 %v84_v29, %s374_s20  ;;  %163 = vst.msk [vmem:[%s703_s6 + $0xa8] sm:$0xff] %vm147_vm1, %v145_v43 }
  0xa5   :  { %215 = vrot.lane.b32.xlu0 %v127_v22, %s374_s20 }
  0xac   :  { %283 = vrot.lane.b32.xlu2 %v130_v30, %s375_s3  ;;  %217 = vrot.lane.b32.xlu1 %v130_v30, %s374_s20 }
  0xad   :  { %256 = vrot.lane.b32.xlu0 %v93_v31, %s375_s3 }
  0xb4   :  { %225 = vrot.lane.b32.xlu2 %v142_v37, %s374_s20  ;;  %258 = vrot.lane.b32.xlu1 %v96_v34, %s375_s3 }
  0xb5   :  { %250 = vrot.lane.b32.xlu0 %v84_v29, %s375_s3 }
  0xbc   :  { %219 = vrot.lane.b32.xlu2 %v133_v39, %s374_s20  ;;  %178 = vrot.lane.b32.xlu1 %v87_v38, %s374_s20 }
  0xbd   :  { %184 = vrot.lane.b32.xlu0 %v96_v34, %s374_s20 }
  0xc4   :  { %260 = vrot.lane.b32.xlu2 %v99_v41, %s375_s3  ;;  %252 = vrot.lane.b32.xlu1 %v87_v38, %s375_s3 }
  0xc5   :  { %285 = vrot.lane.b32.xlu0 %v133_v39, %s375_s3 }
  0xcc   :  { %289 = vrot.lane.b32.xlu2 %v139_v26, %s375_s3  ;;  %186 = vrot.lane.b32.xlu1 %v99_v41, %s374_s20 }
  0xcd   :  { %227 = vrot.lane.b32.xlu0 %v145_v43, %s374_s20 }
  0xd4   :  { %293 = vrot.lane.b32.xlu1 %v145_v43, %s375_s3 }
  0xd5   :  { %291 = vrot.lane.b32.xlu0 %v142_v37, %s375_s3 }
  0xde   :  { %v214_v44 = vpop.permute.xlu2 %213 }
  0xdf   :  { %344 = vst.msk [vmem:[%s703_s6 + $0x8] sm:$0xff] %vm147_vm1, %v214_v44 }
  0xe6   :  { %v181_v45 = vpop.permute.xlu2 %180 }
  0xe7   :  { %340 = vst.msk [vmem:[%s702_s5 + $0x68] sm:$0xff] %vm147_vm1, %v181_v45 }
  0xee   :  { %v255_v46 = vpop.permute.xlu2 %254 }
  0xef   :  { %356 = vst.msk [vmem:[%s702_s5 + $0x70] sm:$0xff] %vm147_vm1, %v255_v46 }
  0xf6   :  { %v249_v47 = vpop.permute.xlu2 %248  ;;  %v247_v48 = vpop.permute.xlu1 %246 }
  0xf7   :  { %353 = vst.msk [vmem:[%s702_s5 + $0x28] sm:$0xff] %vm147_vm1, %v249_v47  ;;  %v173_v49 = vpop.permute.xlu0 %172 }
  0xf8   :  { %352 = vst.msk [vmem:[%s702_s5 + $0x10] sm:$0xff] %vm147_vm1, %v247_v48 }
  0xf9   :  { %336 = vst.msk [vmem:[%s702_s5 + $0x8] sm:$0xff] %vm147_vm1, %v173_v49 }
  0xfe   :  { %v183_v50 = vpop.permute.xlu2 %182  ;;  %v288_v51 = vpop.permute.xlu1 %287 }
  0xff   :  { %341 = vst.msk [vmem:[%s702_s5 + $0x80] sm:$0xff] %vm147_vm1, %v183_v50  ;;  %v280_v52 = vpop.permute.xlu0 %279 }
 0x100   :  { %364 = vst.msk [vmem:[%s703_s6 + $0x70] sm:$0xff] %vm147_vm1, %v288_v51 }
 0x101   :  { %360 = vst.msk [vmem:[%s703_s6 + $0x10] sm:$0xff] %vm147_vm1, %v280_v52 }
 0x106   :  { %v284_v53 = vpop.permute.xlu2 %283  ;;  %v282_v54 = vpop.permute.xlu1 %281 }
 0x107   :  { %362 = vst.msk [vmem:[%s703_s6 + $0x40] sm:$0xff] %vm147_vm1, %v284_v53  ;;  %v222_v55 = vpop.permute.xlu0 %221 }
 0x108   :  { %361 = vst.msk [vmem:[%s703_s6 + $0x28] sm:$0xff] %vm147_vm1, %v282_v54 }
 0x109   :  { %348 = vst.msk [vmem:[%s703_s6 + $0x68] sm:$0xff] %vm147_vm1, %v222_v55 }
 0x10e   :  { %v226_v56 = vpop.permute.xlu2 %225  ;;  %v224_v57 = vpop.permute.xlu1 %223 }
 0x10f   :  { %350 = vst.msk [vmem:[%s703_s6 + $0x98] sm:$0xff] %vm147_vm1, %v226_v56  ;;  %v175_v58 = vpop.permute.xlu0 %174 }
 0x110   :  { %349 = vst.msk [vmem:[%s703_s6 + $0x80] sm:$0xff] %vm147_vm1, %v224_v57 }
 0x111   :  { %337 = vst.msk [vmem:[%s702_s5 + $0x20] sm:$0xff] %vm147_vm1, %v175_v58 }
 0x116   :  { %v220_v59 = vpop.permute.xlu2 %219  ;;  %v177_v60 = vpop.permute.xlu1 %176 }
 0x117   :  { %347 = vst.msk [vmem:[%s703_s6 + $0x50] sm:$0xff] %vm147_vm1, %v220_v59  ;;  %v216_v61 = vpop.permute.xlu0 %215 }
 0x118   :  { %338 = vst.msk [vmem:[%s702_s5 + $0x38] sm:$0xff] %vm147_vm1, %v177_v60 }
 0x119   :  { %345 = vst.msk [vmem:[%s703_s6 + $0x20] sm:$0xff] %vm147_vm1, %v216_v61 }
 0x11e   :  { %v261_v62 = vpop.permute.xlu2 %260  ;;  %v218_v63 = vpop.permute.xlu1 %217 }
 0x11f   :  { %359 = vst.msk [vmem:[%s702_s5 + $0xb8] sm:$0xff] %vm147_vm1, %v261_v62  ;;  %v257_v0 = vpop.permute.xlu0 %256 }
 0x120   :  { %346 = vst.msk [vmem:[%s703_s6 + $0x38] sm:$0xff] %vm147_vm1, %v218_v63 }
 0x121   :  { %357 = vst.msk [vmem:[%s702_s5 + $0x88] sm:$0xff] %vm147_vm1, %v257_v0 }
 0x126   :  { %v290_v1 = vpop.permute.xlu2 %289  ;;  %v259_v2 = vpop.permute.xlu1 %258 }
 0x127   :  { %365 = vst.msk [vmem:[%s703_s6 + $0x88] sm:$0xff] %vm147_vm1, %v290_v1  ;;  %v251_v3 = vpop.permute.xlu0 %250 }
 0x128   :  { %358 = vst.msk [vmem:[%s702_s5 + $0xa0] sm:$0xff] %vm147_vm1, %v259_v2 }
 0x129   :  { %354 = vst.msk [vmem:[%s702_s5 + $0x40] sm:$0xff] %vm147_vm1, %v251_v3 }
 0x12e   :  { %v179_v4 = vpop.permute.xlu1 %178 }
 0x12f   :  { %339 = vst.msk [vmem:[%s702_s5 + $0x50] sm:$0xff] %vm147_vm1, %v179_v4  ;;  %v185_v5 = vpop.permute.xlu0 %184 }
 0x130   :  { %342 = vst.msk [vmem:[%s702_s5 + $0x98] sm:$0xff] %vm147_vm1, %v185_v5 }
 0x136   :  { %v253_v6 = vpop.permute.xlu1 %252 }
 0x137   :  { %355 = vst.msk [vmem:[%s702_s5 + $0x58] sm:$0xff] %vm147_vm1, %v253_v6  ;;  %v286_v7 = vpop.permute.xlu0 %285 }
 0x138   :  { %363 = vst.msk [vmem:[%s703_s6 + $0x58] sm:$0xff] %vm147_vm1, %v286_v7 }
 0x13e   :  { %v187_v8 = vpop.permute.xlu1 %186 }
 0x13f   :  { %343 = vst.msk [vmem:[%s702_s5 + $0xb0] sm:$0xff] %vm147_vm1, %v187_v8  ;;  %v228_v9 = vpop.permute.xlu0 %227 }
 0x140   :  { %351 = vst.msk [vmem:[%s703_s6 + $0xb0] sm:$0xff] %vm147_vm1, %v228_v9 }
 0x146   :  { %v294_v10 = vpop.permute.xlu1 %293 }
 0x147   :  { %367 = vst.msk [vmem:[%s703_s6 + $0xb8] sm:$0xff] %vm147_vm1, %v294_v10  ;;  %v292_v11 = vpop.permute.xlu0 %291 }
 0x148   :  { %366 = vst.msk [vmem:[%s703_s6 + $0xa0] sm:$0xff] %vm147_vm1, %v292_v11 }

// kernel: gru_model_pallas.3
= control target key start
LH: loop header
LB: loop body
LE: loop exit
PB: predicated region body
PF: predicated region fallthrough
CT: control target
= control target key end

     0   :  { %vm63_vm0 = vcmask 261120   ;;  %v2313_v3 = vmov 0.0   ;;  %s3268_s2 = inlined_call_operand.vmem [shape: f32[3,32,32], index: 2, kind: input, shape index: {}]   ;;  %s3269_s3 = inlined_call_operand.vmem [shape: f32[3,32,32], index: 3, kind: input, shape index: {}]   ;;  %s3270_s4 = inlined_call_operand.vmem [shape: f32[1,32], index: 4, kind: input, shape index: {}]   ;;  %s3271_s5 = inlined_call_operand.vmem [shape: f32[1,32], index: 5, kind: input, shape index: {}]   ;;  %s3272_s0 = inlined_call_operand.vmem [shape: f32[8,3,8,32], index: 0, kind: input, shape index: {}]   ;;  %s3273_s1 = inlined_call_operand.vmem [shape: f32[8,3,8,32], index: 1, kind: input, shape index: {}]   ;;  %s3274_s7 = inlined_call_operand.vmem [shape: f32[32,1], index: 7, kind: input, shape index: {}]   ;;  %s3275_s6 = inlined_call_operand.vmem [shape: f32[32,1], index: 6, kind: input, shape index: {}]   ;;  %s3276_s8 = inlined_call_operand.<no memory space> [shape: f32[1,1], index: 8, kind: input, shape index: {}]   ;;  %s3277_s9 = inlined_call_operand.vmem [shape: f32[8,1], index: 9, kind: output, shape index: {}]  }
   0x1   :  { %v2367_v0 = vld [vmem:[%s3268_s2 + $0x18] sm:$0xff]  ;;  %64 = vst.msk [vmem:[#allocation2] sm:$0xff] %vm63_vm0, %v2313_v3  ;;  %v2385_v4 = vld [vmem:[%s3268_s2 + $0x10] sm:$0xff]  ;;  %v2402_v7 = vld [vmem:[%s3268_s2 + $0x8] sm:$0xff] }
   0x2   :  { %v2372_v1 = vld [vmem:[%s3268_s2 + $0x38] sm:$0xff]  ;;  %119 = vmatpush.msra.mxu0 %v2367_v0  ;;  %v2390_v5 = vld [vmem:[%s3268_s2 + $0x30] sm:$0xff]  ;;  %65 = vst.msk [vmem:[#allocation3] sm:$0xff] %vm63_vm0, %v2313_v3  ;;  %v2407_v8 = vld [vmem:[%s3268_s2 + $0x28] sm:$0xff] }
   0x3   :  { %v2377_v2 = vld [vmem:[%s3269_s3 + $0x18] sm:$0xff]  ;;  %159 = vmatpush.msra.mxu1 %v2372_v1  ;;  %v2395_v6 = vld [vmem:[%s3269_s3 + $0x10] sm:$0xff]  ;;  %v2414_v9 = vld [vmem:[%s3269_s3 + $0x8] sm:$0xff] }
   0x4   :  { %233 = vmatpush.msra.mxu3 %v2377_v2  ;;  %120 = vmatpush.msra.mxu0 %v2385_v4  ;;  %v2420_v10 = vld [vmem:[%s3268_s2] sm:$0xff]  ;;  %v2437_v13 = vld [vmem:[%s3268_s2 + $0x58] sm:$0xff]  ;;  %v2453_v16 = vld [vmem:[%s3268_s2 + $0x50] sm:$0xff] }
   0x5   :  { %160 = vmatpush.msra.mxu1 %v2390_v5  ;;  %v2425_v11 = vld [vmem:[%s3268_s2 + $0x20] sm:$0xff]  ;;  %199 = vmatpush.msra.mxu2 %v2437_v13  ;;  %v2448_v15 = vld [vmem:[%s3269_s3 + $0x38] sm:$0xff]  ;;  %v2472_v19 = vld [vmem:[%s3269_s3 + $0x30] sm:$0xff] }
   0x6   :  { %234 = vmatpush.msra.mxu3 %v2395_v6  ;;  %121 = vmatpush.msra.mxu0 %v2402_v7  ;;  %v2432_v12 = vld [vmem:[%s3269_s3] sm:$0xff]  ;;  %v2463_v18 = vld [vmem:[%s3269_s3 + $0x58] sm:$0xff]  ;;  %v2477_v20 = vld [vmem:[%s3268_s2 + $0x48] sm:$0xff] }
   0x7   :  { %161 = vmatpush.msra.mxu1 %v2407_v8  ;;  %200 = vmatpush.msra.mxu2 %v2453_v16  ;;  %v2484_v21 = vld [vmem:[%s3269_s3 + $0x50] sm:$0xff]  ;;  %v2489_v22 = vld [vmem:[%s3269_s3 + $0x28] sm:$0xff]  ;;  %v2494_v23 = vld [vmem:[%s3268_s2 + $0x40] sm:$0xff] }
   0x8   :  { %235 = vmatpush.msra.mxu3 %v2414_v9  ;;  %122 = vmatpush.msra.mxu0 %v2420_v10  ;;  %v2443_v14 = vld [vmem:[#allocation2] sm:$0xff]  ;;  %v2503_v24 = vld [vmem:[%s3269_s3 + $0x48] sm:$0xff]  ;;  %v2005_v37 = vld [vmem:[%s3273_s1 + $0xb0] sm:$0xff] }
   0x9   :  { %162 = vmatpush.msra.mxu1 %v2425_v11  ;;  %1999 = vmatmul.msk.f32.vlgmr.msra.gmra.mxu0 %vm63_vm0, %v2443_v14  ;;  %v2458_v17 = vld [vmem:[#allocation3] sm:$0xff]  ;;  %v2508_v25 = vld [vmem:[%s3269_s3 + $0x20] sm:$0xff] }
   0xa   :  { %236 = vmatpush.msra.mxu3 %v2432_v12  ;;  %2001 = vmatmul.msk.f32.vlgmr.msra.gmra.mxu1 %vm63_vm0, %v2443_v14  ;;  %v2517_v26 = vld [vmem:[%s3269_s3 + $0x40] sm:$0xff]  ;;  %v101_v28 = vld [vmem:[%s3272_s0 + $0x8] sm:$0xff] }
   0xb   :  { %2007 = vmatmul.msk.f32.vlgmr.msra.gmra.mxu3 %vm63_vm0, %v2458_v17  ;;  %273 = vmatpush.msrb.mxu0 %v2448_v15  ;;  %v100_v27 = vld [vmem:[%s3272_s0] sm:$0xff]  ;;  %v2004_v35 = vld [vmem:[%s3273_s1 + $0xa8] sm:$0xff] }
   0xc   :  { %313 = vmatpush.msrb.mxu1 %v2463_v18  ;;  %387 = vmatpush.msrb.mxu3 %v2372_v1  ;;  %v2582_v57 = vld [vmem:[%s3270_s4] ss:$0 sm:$0xff] }
   0xd   :  { %274 = vmatpush.msrb.mxu0 %v2472_v19  ;;  %201 = vmatpush.msra.mxu2 %v2477_v20 }
   0xe   :  { %314 = vmatpush.msrb.mxu1 %v2484_v21  ;;  %388 = vmatpush.msrb.mxu3 %v2390_v5 }
   0xf   :  { %275 = vmatpush.msrb.mxu0 %v2489_v22  ;;  %202 = vmatpush.msra.mxu2 %v2494_v23 }
  0x10   :  { %2003 = vmatmul.msk.f32.vlgmr.msra.gmra.mxu2 %vm63_vm0, %v2443_v14  ;;  %315 = vmatpush.msrb.mxu1 %v2503_v24 }
  0x11   :  { %276 = vmatpush.msrb.mxu0 %v2508_v25  ;;  %347 = vmatpush.msrb.mxu2 %v2367_v0 }
  0x12   :  { %2009 = vmatmul.msk.f32.vlgmr.msrb.gmra.mxu0 %vm63_vm0, %v2458_v17  ;;  %316 = vmatpush.msrb.mxu1 %v2517_v26 }
  0x13   :  { %2011 = vmatmul.msk.f32.vlgmr.msrb.gmra.mxu1 %vm63_vm0, %v2458_v17  ;;  %427 = vmatpush.msra.mxu0 %v2437_v13 }
  0x14   :  { %348 = vmatpush.msrb.mxu2 %v2385_v4  ;;  %389 = vmatpush.msrb.mxu3 %v2407_v8 }
  0x15   :  { %428 = vmatpush.msra.mxu0 %v2453_v16  ;;  %461 = vmatpush.msra.mxu1 %v2377_v2 }
  0x16   :  { %349 = vmatpush.msrb.mxu2 %v2402_v7  ;;  %390 = vmatpush.msrb.mxu3 %v2425_v11 }
  0x17   :  { %429 = vmatpush.msra.mxu0 %v2477_v20  ;;  %462 = vmatpush.msra.mxu1 %v2395_v6 }
  0x18   :  { %350 = vmatpush.msrb.mxu2 %v2420_v10  ;;  %541 = vmatpush.msra.mxu3 %v2463_v18 }
  0x19   :  { %430 = vmatpush.msra.mxu0 %v2494_v23  ;;  %463 = vmatpush.msra.mxu1 %v2414_v9 }
  0x1a   :  { %501 = vmatpush.msra.mxu2 %v2448_v15  ;;  %542 = vmatpush.msra.mxu3 %v2484_v21 }
  0x1b   :  { %575 = vmatpush.msrb.mxu0 %v2367_v0  ;;  %464 = vmatpush.msra.mxu1 %v2432_v12 }
  0x1c   :  { %502 = vmatpush.msra.mxu2 %v2472_v19  ;;  %543 = vmatpush.msra.mxu3 %v2503_v24 }
  0x1d   :  { %615 = vmatpush.msrb.mxu1 %v2372_v1  ;;  %576 = vmatpush.msrb.mxu0 %v2385_v4 }
  0x1e   :  { %503 = vmatpush.msra.mxu2 %v2489_v22  ;;  %544 = vmatpush.msra.mxu3 %v2517_v26 }
  0x1f   :  { %616 = vmatpush.msrb.mxu1 %v2390_v5  ;;  %577 = vmatpush.msrb.mxu0 %v2402_v7 }
  0x20   :  { %504 = vmatpush.msra.mxu2 %v2508_v25 }
  0x21   :  { %617 = vmatpush.msrb.mxu1 %v2407_v8  ;;  %578 = vmatpush.msrb.mxu0 %v2420_v10 }
  0x23   :  { %618 = vmatpush.msrb.mxu1 %v2425_v11 }
  0x86   :  { %v124_v29 = vpop.f32.mrf.mxu0 }
  0x87   :  { %v127_v30 = vadd.f32 %v124_v29, %v100_v27  ;;  %v164_v31 = vpop.f32.mrf.mxu1 }
  0x88   :  { %v167_v32 = vadd.f32 %v164_v31, %v101_v28 }
  0x89   :  { %v2000_v33 = vmul.f32 -1.442695, %v127_v30  ;;  %v2591_v30 = vld [vmem:[%s3271_s5] ss:$0 sm:$0xff] }
  0x8a   :  { %v2002_v34 = vmul.f32 -1.442695, %v167_v32 }
  0x8b   :  { %2127 = vpow2.f32 %v2000_v33 }
  0x8c   :  { %2129 = vpow2.f32 %v2002_v34 }
  0x8e   :  { %v238_v36 = vpop.f32.mrf.mxu3 }
  0x8f   :  { %v241_v38 = vadd.f32 %v2004_v35, %v238_v36  ;;  %v278_v39 = vpop.f32.mrf.mxu0 }
  0x90   :  { %v281_v41 = vadd.f32 %v2005_v37, %v278_v39  ;;  %v318_v34 = vpop.f32.mrf.mxu1  ;;  %v102_v37 = vld [vmem:[%s3272_s0 + $0x10] sm:$0xff] }
  0x91   :  { %v2008_v40 = vmul.f32 -1.442695, %v241_v38  ;;  %v2128_v42 = vpop.eup %2127 }
  0x92   :  { %v2130_v43 = vpop.eup %2129  ;;  %v131_v44 = vadd.f32 1.0, %v2128_v42  ;;  %v2010_v45 = vmul.f32 -1.442695, %v281_v41 }
  0x93   :  { %2131 = vpow2.f32 %v2008_v40  ;;  %v2570_v46 = vadd.f32 1.0, %v2130_v43  ;;  %v204_v60 = vpop.f32.mrf.mxu2 }
  0x94   :  { %2133 = vrcp.f32 %v131_v44  ;;  %v141_v58 = vand.u32 2147483647, %v131_v44  ;;  %v143_v59 = vand.u32 2147483648, %v131_v44  ;;  %vm137_vm2 = vweird.f32 %v131_v44 }
  0x95   :  { %2135 = vrcp.f32 %v2570_v46  ;;  %v205_v27 = vadd.f32 %v2582_v57, %v204_v60  ;;  %vm177_vm3 = vweird.f32 %v2570_v46  ;;  %v183_v35 = vand.u32 2147483648, %v2570_v46 }
  0x96   :  { %2137 = vpow2.f32 %v2010_v45  ;;  %vm142_vm5 = vcmp.eq.f32.partialorder %v141_v58, 8.507059e+37  ;;  %v144_v29 = vor.u32 1.1754944e-38, %v143_v59  ;;  %v181_v45 = vand.u32 2147483647, %v2570_v46 }
  0x98   :  { %vm182_vm14 = vcmp.eq.f32.partialorder %v181_v45, 8.507059e+37 }
  0x99   :  { %v2132_v47 = vpop.eup %2131 }
  0x9a   :  { %v245_v48 = vadd.f32 1.0, %v2132_v47  ;;  %v2134_v49 = vpop.eup %2133 }
  0x9b   :  { %v2573_v50 = vpop.eup %2135  ;;  %v133_v51 = vmul.f32 %v2134_v49, %v131_v44  ;;  %vm138_vm1 = vweird.f32 %v2134_v49  ;;  %v319_v44 = vadd.f32 %v2591_v30, %v318_v34 }
  0x9c   :  { %2139 = vrcp.f32 %v245_v48  ;;  %v2138_v52 = vpop.eup %2137  ;;  %v173_v53 = vmul.f32 %v2573_v50, %v2570_v46  ;;  %vm139_vm4 = vmor %vm137_vm2, %vm138_vm1  ;;  %v255_v33 = vand.u32 2147483647, %v245_v48  ;;  %v257_v39 = vand.u32 2147483648, %v245_v48  ;;  %v2006_v46 = vld [vmem:[%s3273_s1 + $0xb8] sm:$0xff] }
  0x9d   :  { %v2577_v54 = vadd.f32 1.0, %v2138_v52  ;;  %v134_v55 = vsub.f32 1.0, %v133_v51  ;;  %vm178_vm6 = vweird.f32 %v2573_v50  ;;  %vm251_vm8 = vweird.f32 %v245_v48 }
  0x9e   :  { %v174_v56 = vsub.f32 1.0, %v173_v53  ;;  %vm2604_vm9 = vmor %vm177_vm3, %vm178_vm6  ;;  %v258_v53 = vor.u32 1.1754944e-38, %v257_v39  ;;  %vm256_vm11 = vcmp.eq.f32.partialorder %v255_v33, 8.507059e+37  ;;  %v2013_v39 = vld [vmem:[%s3272_s0 + $0x20] sm:$0xff] }
  0x9f   :  { %2141 = vrcp.f32 %v2577_v54  ;;  %v135_v61 = vmul.f32 %v2134_v49, %v134_v55  ;;  %vm291_vm12 = vweird.f32 %v2577_v54 }
  0xa0   :  { %v175_v63 = vmul.f32 %v2573_v50, %v174_v56  ;;  %v184_v56 = vor.u32 1.1754944e-38, %v183_v35 }
  0xa1   :  { %v136_v3 = vadd.f32 %v2134_v49, %v135_v61  ;;  %v297_v61 = vand.u32 2147483648, %v2577_v54 }
  0xa2   :  { %v2140_v62 = vpop.eup %2139  ;;  %v176_v40 = vadd.f32 %v2573_v50, %v175_v63 }
  0xa3   :  { %v247_v28 = vmul.f32 %v2140_v62, %v245_v48  ;;  %v140_v31 = vsel %vm139_vm4, %v2134_v49, %v136_v3  ;;  %vm252_vm7 = vweird.f32 %v2140_v62 }
  0xa4   :  { %v145_v38 = vsel %vm142_vm5, %v144_v29, %v140_v31  ;;  %vm253_vm10 = vmor %vm251_vm8, %vm252_vm7  ;;  %v180_v55 = vsel %vm2604_vm9, %v2573_v50, %v176_v40  ;;  %v295_v50 = vand.u32 2147483647, %v2577_v54  ;;  %v298_v31 = vor.u32 1.1754944e-38, %v297_v61  ;;  %v2020_v40 = vld [vmem:[%s3273_s1 + $0x90] sm:$0xff] }
  0xa5   :  { %v248_v32 = vsub.f32 1.0, %v247_v28  ;;  %v2142_v36 = vpop.eup %2141  ;;  %v207_v42 = vmul.f32 %v205_v27, %v145_v38  ;;  %v185_v3 = vsel %vm182_vm14, %v184_v56, %v180_v55 }
  0xa6   :  { %v287_v41 = vmul.f32 %v2142_v36, %v2577_v54  ;;  %vm292_vm13 = vweird.f32 %v2142_v36  ;;  %v210_v28 = vsub.f32 1.0, %v185_v3  ;;  %vm296_vm1 = vcmp.eq.f32.partialorder %v295_v50, 8.507059e+37 }
  0xa7   :  { %v249_v43 = vmul.f32 %v2140_v62, %v248_v32  ;;  %v208_v49 = vadd.f32 %v207_v42, %v102_v37  ;;  %vm293_vm15 = vmor %vm291_vm12, %vm292_vm13  ;;  %v212_v33 = vmul.f32 %v185_v3, %v2443_v14 }
  0xa8   :  { %v288_v47 = vsub.f32 1.0, %v287_v41 }
  0xa9   :  { %v250_v51 = vadd.f32 %v2140_v62, %v249_v43  ;;  %2143 = vtanh.f32 %v208_v49 }
  0xaa   :  { %v289_v58 = vmul.f32 %v2142_v36, %v288_v47 }
  0xab   :  { %v254_v59 = vsel %vm253_vm10, %v2140_v62, %v250_v51 }
  0xac   :  { %v259_v48 = vsel %vm256_vm11, %v258_v53, %v254_v59  ;;  %v290_v60 = vadd.f32 %v2142_v36, %v289_v58  ;;  %v2021_v53 = vld [vmem:[%s3273_s1 + $0x98] sm:$0xff] }
  0xad   :  { %v321_v63 = vmul.f32 %v319_v44, %v259_v48 }
  0xae   :  { %v294_v62 = vsel %vm293_vm15, %v2142_v36, %v290_v60 }
  0xaf   :  { %v322_v27 = vadd.f32 %v2006_v46, %v321_v63  ;;  %v2144_v29 = vpop.eup %2143  ;;  %v299_v34 = vsel %vm296_vm1, %v298_v31, %v294_v62 }
  0xb0   :  { %v211_v32 = vmul.f32 %v2144_v29, %v210_v28  ;;  %v324_v37 = vsub.f32 1.0, %v299_v34  ;;  %v326_v38 = vmul.f32 %v299_v34, %v2458_v17  ;;  %v2012_v17 = vld [vmem:[%s3272_s0 + $0x18] sm:$0xff] }
  0xb1   :  { %2145 = vtanh.f32 %v322_v27 }
  0xb2   :  { %v2618_v35 = vadd.f32 %v212_v33, %v211_v32 }
  0xb4   :  { %2015 = vmatmul.msk.f32.vlgmr.msrb.gmra.mxu2 %vm63_vm0, %v2618_v35  ;;  %2017 = vmatmul.msk.f32.vlgmr.msrb.gmra.mxu3 %vm63_vm0, %v2618_v35 }
  0xb5   :  { %2019 = vmatmul.msk.f32.vlgmr.msra.gmra.mxu0 %vm63_vm0, %v2618_v35  ;;  %689 = vmatpush.msrb.mxu3 %v2377_v2 }
  0xb6   :  { %655 = vmatpush.msrb.mxu2 %v2437_v13  ;;  %729 = vmatpush.msra.mxu0 %v2448_v15 }
  0xb7   :  { %v2146_v54 = vpop.eup %2145  ;;  %690 = vmatpush.msrb.mxu3 %v2395_v6 }
  0xb8   :  { %v325_v36 = vmul.f32 %v2146_v54, %v324_v37  ;;  %656 = vmatpush.msrb.mxu2 %v2453_v16  ;;  %730 = vmatpush.msra.mxu0 %v2472_v19 }
  0xb9   :  { %691 = vmatpush.msrb.mxu3 %v2414_v9 }
  0xba   :  { %v2631_v14 = vadd.f32 %v326_v38, %v325_v36  ;;  %657 = vmatpush.msrb.mxu2 %v2477_v20  ;;  %731 = vmatpush.msra.mxu0 %v2489_v22 }
  0xbb   :  { %692 = vmatpush.msrb.mxu3 %v2432_v12 }
  0xbc   :  { %2023 = vmatmul.msk.f32.vlgmr.msra.gmra.mxu1 %vm63_vm0, %v2631_v14  ;;  %2025 = vmatmul.msk.f32.vlgmr.msra.gmra.mxu2 %vm63_vm0, %v2631_v14 }
  0xbd   :  { %769 = vmatpush.msra.mxu1 %v2463_v18  ;;  %2027 = vmatmul.msk.f32.vlgmr.msra.gmra.mxu3 %vm63_vm0, %v2631_v14 }
  0xbe   :  { %658 = vmatpush.msrb.mxu2 %v2494_v23  ;;  %843 = vmatpush.msra.mxu3 %v2372_v1 }
  0xbf   :  { %770 = vmatpush.msra.mxu1 %v2484_v21  ;;  %732 = vmatpush.msra.mxu0 %v2508_v25 }
  0xc0   :  { %803 = vmatpush.msra.mxu2 %v2367_v0  ;;  %844 = vmatpush.msra.mxu3 %v2390_v5 }
  0xc1   :  { %771 = vmatpush.msra.mxu1 %v2503_v24 }
  0xc2   :  { %804 = vmatpush.msra.mxu2 %v2385_v4  ;;  %845 = vmatpush.msra.mxu3 %v2407_v8 }
  0xc3   :  { %772 = vmatpush.msra.mxu1 %v2517_v26 }
  0xc4   :  { %805 = vmatpush.msra.mxu2 %v2402_v7  ;;  %846 = vmatpush.msra.mxu3 %v2425_v11 }
  0xc6   :  { %806 = vmatpush.msra.mxu2 %v2420_v10 }
 0x132   :  { %v432_v31 = vpop.f32.mrf.mxu0 }
 0x137   :  { %v352_v41 = vpop.f32.mrf.mxu2  ;;  %v392_v42 = vpop.f32.mrf.mxu3 }
 0x138   :  { %v355_v43 = vadd.f32 %v2012_v17, %v352_v41  ;;  %v395_v44 = vadd.f32 %v2013_v39, %v392_v42  ;;  %v433_v39 = vadd.f32 %v2582_v57, %v432_v31 }
 0x139   :  { %v466_v45 = vpop.f32.mrf.mxu1 }
 0x13a   :  { %v469_v47 = vadd.f32 %v2020_v40, %v466_v45  ;;  %v2016_v49 = vmul.f32 -1.442695, %v355_v43  ;;  %v2018_v51 = vmul.f32 -1.442695, %v395_v44 }
 0x13c   :  { %v2024_v52 = vmul.f32 -1.442695, %v469_v47  ;;  %2147 = vpow2.f32 %v2016_v49 }
 0x13d   :  { %2149 = vpow2.f32 %v2018_v51 }
 0x13e   :  { %2151 = vpow2.f32 %v2024_v52 }
 0x13f   :  { %v506_v55 = vpop.f32.mrf.mxu2 }
 0x140   :  { %v509_v56 = vadd.f32 %v2021_v53, %v506_v55  ;;  %v546_v33 = vpop.f32.mrf.mxu3 }
 0x141   :  { %v547_v41 = vadd.f32 %v2591_v30, %v546_v33 }
 0x142   :  { %v2148_v58 = vpop.eup %2147  ;;  %v2026_v59 = vmul.f32 -1.442695, %v509_v56 }
 0x143   :  { %v2150_v46 = vpop.eup %2149  ;;  %v359_v48 = vadd.f32 1.0, %v2148_v58 }
 0x144   :  { %v2152_v60 = vpop.eup %2151  ;;  %v2671_v61 = vadd.f32 1.0, %v2150_v46  ;;  %2153 = vpow2.f32 %v2026_v59  ;;  %v2014_v59 = vld [vmem:[%s3272_s0 + $0x28] sm:$0xff] }
 0x145   :  { %2155 = vrcp.f32 %v359_v48  ;;  %v473_v63 = vadd.f32 1.0, %v2152_v60  ;;  %v369_v37 = vand.u32 2147483647, %v359_v48  ;;  %v371_v54 = vand.u32 2147483648, %v359_v48 }
 0x146   :  { %2157 = vrcp.f32 %v2671_v61  ;;  %vm365_vm3 = vweird.f32 %v359_v48  ;;  %vm405_vm4 = vweird.f32 %v2671_v61  ;;  %v411_v58 = vand.u32 2147483648, %v2671_v61 }
 0x147   :  { %2159 = vrcp.f32 %v473_v63  ;;  %vm370_vm6 = vcmp.eq.f32.partialorder %v369_v37, 8.507059e+37  ;;  %v372_v45 = vor.u32 1.1754944e-38, %v371_v54  ;;  %v483_v47 = vand.u32 2147483647, %v473_v63  ;;  %v2022_v54 = vld [vmem:[%s3273_s1 + $0xa0] sm:$0xff] }
 0x148   :  { %v485_v49 = vand.u32 2147483648, %v473_v63  ;;  %vm479_vm9 = vweird.f32 %v473_v63  ;;  %v412_v37 = vor.u32 1.1754944e-38, %v411_v58 }
 0x149   :  { %vm484_vm11 = vcmp.eq.f32.partialorder %v483_v47, 8.507059e+37 }
 0x14a   :  { %v2154_v3 = vpop.eup %2153 }
 0x14b   :  { %v2156_v50 = vpop.eup %2155  ;;  %v2674_v27 = vadd.f32 1.0, %v2154_v3  ;;  %v409_v3 = vand.u32 2147483647, %v2671_v61 }
 0x14c   :  { %v2676_v62 = vpop.eup %2157  ;;  %v361_v28 = vmul.f32 %v2156_v50, %v359_v48  ;;  %vm366_vm2 = vweird.f32 %v2156_v50 }
 0x14d   :  { %v401_v29 = vmul.f32 %v2676_v62, %v2671_v61  ;;  %2161 = vrcp.f32 %v2674_v27  ;;  %v2160_v34 = vpop.eup %2159  ;;  %vm367_vm5 = vmor %vm365_vm3, %vm366_vm2  ;;  %vm406_vm8 = vweird.f32 %v2676_v62  ;;  %vm519_vm14 = vweird.f32 %v2674_v27 }
 0x14e   :  { %v362_v32 = vsub.f32 1.0, %v361_v28  ;;  %v475_v17 = vmul.f32 %v2160_v34, %v473_v63  ;;  %vm480_vm7 = vweird.f32 %v2160_v34  ;;  %v486_v28 = vor.u32 1.1754944e-38, %v485_v49  ;;  %vm2696_vm12 = vmor %vm405_vm4, %vm406_vm8 }
 0x14f   :  { %v402_v36 = vsub.f32 1.0, %v401_v29  ;;  %vm481_vm10 = vmor %vm479_vm9, %vm480_vm7  ;;  %v523_v63 = vand.u32 2147483647, %v2674_v27  ;;  %vm410_vm15 = vcmp.eq.f32.partialorder %v409_v3, 8.507059e+37  ;;  %v2036_v3 = vld [vmem:[%s3273_s1 + $0x78] sm:$0xff] }
 0x150   :  { %v363_v38 = vmul.f32 %v2156_v50, %v362_v32  ;;  %v476_v43 = vsub.f32 1.0, %v475_v17 }
 0x151   :  { %v403_v40 = vmul.f32 %v2676_v62, %v402_v36  ;;  %vm524_vm2 = vcmp.eq.f32.partialorder %v523_v63, 8.507059e+37 }
 0x152   :  { %v364_v42 = vadd.f32 %v2156_v50, %v363_v38  ;;  %v477_v53 = vmul.f32 %v2160_v34, %v476_v43 }
 0x153   :  { %v2162_v44 = vpop.eup %2161  ;;  %v404_v56 = vadd.f32 %v2676_v62, %v403_v40 }
 0x154   :  { %v368_v51 = vsel %vm367_vm5, %v2156_v50, %v364_v42  ;;  %v515_v52 = vmul.f32 %v2162_v44, %v2674_v27  ;;  %v478_v60 = vadd.f32 %v2160_v34, %v477_v53  ;;  %v525_v50 = vand.u32 2147483648, %v2674_v27 }
 0x155   :  { %v373_v55 = vsel %vm370_vm6, %v372_v45, %v368_v51  ;;  %vm520_vm13 = vweird.f32 %v2162_v44  ;;  %v408_v61 = vsel %vm2696_vm12, %v2676_v62, %v404_v56 }
 0x156   :  { %v435_v46 = vmul.f32 %v433_v39, %v373_v55  ;;  %v516_v48 = vsub.f32 1.0, %v515_v52  ;;  %v482_v32 = vsel %vm481_vm10, %v2160_v34, %v478_v60  ;;  %vm521_vm1 = vmor %vm519_vm14, %vm520_vm13  ;;  %v526_v34 = vor.u32 1.1754944e-38, %v525_v50  ;;  %v2037_v60 = vld [vmem:[%s3273_s1 + $0x80] sm:$0xff] }
 0x157   :  { %v487_v36 = vsel %vm484_vm11, %v486_v28, %v482_v32  ;;  %v413_v42 = vsel %vm410_vm15, %v412_v37, %v408_v61 }
 0x158   :  { %v517_v31 = vmul.f32 %v2162_v44, %v516_v48  ;;  %v436_v33 = vadd.f32 %v2014_v59, %v435_v46  ;;  %v549_v17 = vmul.f32 %v547_v41, %v487_v36  ;;  %v438_v45 = vsub.f32 1.0, %v413_v42 }
 0x159   :  { %v440_v62 = vmul.f32 %v413_v42, %v2618_v35  ;;  %v2028_v35 = vld [vmem:[%s3272_s0 + $0x30] sm:$0xff] }
 0x15a   :  { %v518_v38 = vadd.f32 %v2162_v44, %v517_v31  ;;  %2163 = vtanh.f32 %v436_v33  ;;  %v550_v40 = vadd.f32 %v2022_v54, %v549_v17 }
 0x15c   :  { %v522_v39 = vsel %vm521_vm1, %v2162_v44, %v518_v38  ;;  %2165 = vtanh.f32 %v550_v40 }
 0x15d   :  { %v527_v43 = vsel %vm524_vm2, %v526_v34, %v522_v39 }
 0x15e   :  { %v552_v49 = vsub.f32 1.0, %v527_v43  ;;  %v554_v44 = vmul.f32 %v527_v43, %v2631_v14  ;;  %v2029_v14 = vld [vmem:[%s3272_s0 + $0x38] sm:$0xff] }
 0x160   :  { %v2164_v47 = vpop.eup %2163 }
 0x161   :  { %v439_v51 = vmul.f32 %v2164_v47, %v438_v45 }
 0x162   :  { %v2166_v27 = vpop.eup %2165 }
 0x163   :  { %v2709_v52 = vadd.f32 %v440_v62, %v439_v51  ;;  %v553_v41 = vmul.f32 %v2166_v27, %v552_v49 }
 0x165   :  { %2031 = vmatmul.msk.f32.vlgmr.msrb.gmra.mxu0 %vm63_vm0, %v2709_v52  ;;  %2033 = vmatmul.msk.f32.vlgmr.msrb.gmra.mxu1 %vm63_vm0, %v2709_v52  ;;  %v2719_v53 = vadd.f32 %v554_v44, %v553_v41 }
 0x166   :  { %2035 = vmatmul.msk.f32.vlgmr.msrb.gmra.mxu2 %vm63_vm0, %v2709_v52  ;;  %883 = vmatpush.msrb.mxu0 %v2437_v13 }
 0x167   :  { %917 = vmatpush.msrb.mxu1 %v2377_v2  ;;  %957 = vmatpush.msrb.mxu2 %v2448_v15 }
 0x168   :  { %884 = vmatpush.msrb.mxu0 %v2453_v16  ;;  %2039 = vmatmul.msk.f32.vlgmr.msrb.gmra.mxu3 %vm63_vm0, %v2719_v53 }
 0x169   :  { %918 = vmatpush.msrb.mxu1 %v2395_v6  ;;  %997 = vmatpush.msrb.mxu3 %v2463_v18 }
 0x16a   :  { %885 = vmatpush.msrb.mxu0 %v2477_v20  ;;  %958 = vmatpush.msrb.mxu2 %v2472_v19 }
 0x16b   :  { %919 = vmatpush.msrb.mxu1 %v2414_v9  ;;  %998 = vmatpush.msrb.mxu3 %v2484_v21 }
 0x16c   :  { %886 = vmatpush.msrb.mxu0 %v2494_v23  ;;  %959 = vmatpush.msrb.mxu2 %v2489_v22 }
 0x16d   :  { %2041 = vmatmul.msk.f32.vlgmr.msra.gmra.mxu0 %vm63_vm0, %v2719_v53  ;;  %2043 = vmatmul.msk.f32.vlgmr.msra.gmra.mxu1 %vm63_vm0, %v2719_v53 }
 0x16e   :  { %920 = vmatpush.msrb.mxu1 %v2432_v12  ;;  %999 = vmatpush.msrb.mxu3 %v2503_v24 }
 0x16f   :  { %1031 = vmatpush.msra.mxu0 %v2367_v0  ;;  %960 = vmatpush.msrb.mxu2 %v2508_v25 }
 0x170   :  { %1071 = vmatpush.msra.mxu1 %v2372_v1  ;;  %1000 = vmatpush.msrb.mxu3 %v2517_v26 }
 0x171   :  { %1032 = vmatpush.msra.mxu0 %v2385_v4 }
 0x172   :  { %1072 = vmatpush.msra.mxu1 %v2390_v5 }
 0x173   :  { %1033 = vmatpush.msra.mxu0 %v2402_v7 }
 0x174   :  { %1073 = vmatpush.msra.mxu1 %v2407_v8 }
 0x175   :  { %1034 = vmatpush.msra.mxu0 %v2420_v10 }
 0x176   :  { %1074 = vmatpush.msra.mxu1 %v2425_v11 }
 0x1e2   :  { %v580_v55 = vpop.f32.mrf.mxu0  ;;  %v620_v56 = vpop.f32.mrf.mxu1 }
 0x1e3   :  { %v583_v58 = vadd.f32 %v2028_v35, %v580_v55  ;;  %v623_v59 = vadd.f32 %v2029_v14, %v620_v56 }
 0x1e5   :  { %v2032_v46 = vmul.f32 -1.442695, %v583_v58  ;;  %v2034_v48 = vmul.f32 -1.442695, %v623_v59 }
 0x1e7   :  { %2167 = vpow2.f32 %v2032_v46  ;;  %v2030_v46 = vld [vmem:[%s3272_s0 + $0x40] sm:$0xff] }
 0x1e8   :  { %2169 = vpow2.f32 %v2034_v48 }
 0x1e9   :  { %v660_v41 = vpop.f32.mrf.mxu2 }
 0x1ea   :  { %v734_v50 = vpop.f32.mrf.mxu0  ;;  %v661_v56 = vadd.f32 %v2582_v57, %v660_v41 }
 0x1eb   :  { %v737_v28 = vadd.f32 %v2037_v60, %v734_v50  ;;  %v694_v29 = vpop.f32.mrf.mxu3 }
 0x1ec   :  { %v697_v32 = vadd.f32 %v2036_v3, %v694_v29 }
 0x1ed   :  { %v2168_v31 = vpop.eup %2167  ;;  %v2042_v33 = vmul.f32 -1.442695, %v737_v28 }
 0x1ee   :  { %v2170_v37 = vpop.eup %2169  ;;  %v587_v63 = vadd.f32 1.0, %v2168_v31  ;;  %v2040_v36 = vmul.f32 -1.442695, %v697_v32 }
 0x1ef   :  { %v627_v54 = vadd.f32 1.0, %v2170_v37  ;;  %2171 = vpow2.f32 %v2042_v33 }
 0x1f0   :  { %2173 = vrcp.f32 %v587_v63  ;;  %v599_v49 = vand.u32 2147483648, %v587_v63  ;;  %v597_v62 = vand.u32 2147483647, %v587_v63  ;;  %vm593_vm4 = vweird.f32 %v587_v63 }
 0x1f1   :  { %2175 = vrcp.f32 %v627_v54  ;;  %v639_v3 = vand.u32 2147483648, %v627_v54  ;;  %vm633_vm8 = vweird.f32 %v627_v54  ;;  %v637_v28 = vand.u32 2147483647, %v627_v54 }
 0x1f2   :  { %2177 = vpow2.f32 %v2040_v36  ;;  %v600_v14 = vor.u32 1.1754944e-38, %v599_v49  ;;  %vm598_vm6 = vcmp.eq.f32.partialorder %v597_v62, 8.507059e+37 }
 0x1f3   :  { %vm638_vm10 = vcmp.eq.f32.partialorder %v637_v28, 8.507059e+37 }
 0x1f5   :  { %v2172_v61 = vpop.eup %2171 }
 0x1f6   :  { %v2174_v38 = vpop.eup %2173  ;;  %v2762_v17 = vadd.f32 1.0, %v2172_v61 }
 0x1f7   :  { %v2176_v34 = vpop.eup %2175  ;;  %v589_v39 = vmul.f32 %v2174_v38, %v587_v63  ;;  %vm594_vm3 = vweird.f32 %v2174_v38  ;;  %v640_v63 = vor.u32 1.1754944e-38, %v639_v3 }
 0x1f8   :  { %v2178_v40 = vpop.eup %2177  ;;  %v629_v42 = vmul.f32 %v2176_v34, %v627_v54  ;;  %2179 = vrcp.f32 %v2762_v17  ;;  %vm595_vm5 = vmor %vm593_vm4, %vm594_vm3  ;;  %vm634_vm7 = vweird.f32 %v2176_v34  ;;  %vm747_vm1 = vweird.f32 %v2762_v17 }
 0x1f9   :  { %v590_v43 = vsub.f32 1.0, %v589_v39  ;;  %v701_v45 = vadd.f32 1.0, %v2178_v40  ;;  %vm635_vm9 = vmor %vm633_vm8, %vm634_vm7 }
 0x1fa   :  { %v630_v47 = vsub.f32 1.0, %v629_v42  ;;  %v774_v42 = vpop.f32.mrf.mxu1 }
 0x1fb   :  { %v591_v51 = vmul.f32 %v2174_v38, %v590_v43  ;;  %2181 = vrcp.f32 %v701_v45  ;;  %v713_v36 = vand.u32 2147483648, %v701_v45  ;;  %vm707_vm12 = vweird.f32 %v701_v45 }
 0x1fc   :  { %v631_v27 = vmul.f32 %v2176_v34, %v630_v47 }
 0x1fd   :  { %v592_v44 = vadd.f32 %v2174_v38, %v591_v51  ;;  %v714_v54 = vor.u32 1.1754944e-38, %v713_v36 }
 0x1fe   :  { %v2765_v35 = vpop.eup %2179  ;;  %v632_v59 = vadd.f32 %v2176_v34, %v631_v27  ;;  %v2038_v27 = vld [vmem:[%s3273_s1 + $0x88] sm:$0xff] }
 0x1ff   :  { %v596_v55 = vsel %vm595_vm5, %v2174_v38, %v592_v44  ;;  %v743_v58 = vmul.f32 %v2765_v35, %v2762_v17  ;;  %v711_v38 = vand.u32 2147483647, %v701_v45  ;;  %vm748_vm15 = vweird.f32 %v2765_v35 }
 0x200   :  { %v601_v48 = vsel %vm598_vm6, %v600_v14, %v596_v55  ;;  %v636_v33 = vsel %vm635_vm9, %v2176_v34, %v632_v59  ;;  %v775_v34 = vadd.f32 %v2591_v30, %v774_v42  ;;  %vm749_vm2 = vmor %vm747_vm1, %vm748_vm15 }
 0x201   :  { %v2182_v60 = vpop.eup %2181  ;;  %v663_v50 = vmul.f32 %v661_v56, %v601_v48  ;;  %v744_v32 = vsub.f32 1.0, %v743_v58  ;;  %v641_v39 = vsel %vm638_vm10, %v640_v63, %v636_v33  ;;  %vm712_vm14 = vcmp.eq.f32.partialorder %v711_v38, 8.507059e+37 }
 0x202   :  { %v703_v29 = vmul.f32 %v2182_v60, %v701_v45  ;;  %vm708_vm11 = vweird.f32 %v2182_v60  ;;  %v666_v47 = vsub.f32 1.0, %v641_v39  ;;  %v753_v45 = vand.u32 2147483648, %v2762_v17 }
 0x203   :  { %v664_v31 = vadd.f32 %v2030_v46, %v663_v50  ;;  %v745_v40 = vmul.f32 %v2765_v35, %v744_v32  ;;  %vm709_vm13 = vmor %vm707_vm12, %vm708_vm11  ;;  %v668_v55 = vmul.f32 %v641_v39, %v2709_v52  ;;  %v751_v56 = vand.u32 2147483647, %v2762_v17 }
 0x204   :  { %v704_v37 = vsub.f32 1.0, %v703_v29  ;;  %v754_v48 = vor.u32 1.1754944e-38, %v753_v45  ;;  %v2046_v45 = vld [vmem:[%s3272_s0 + $0x58] sm:$0xff] }
 0x205   :  { %2183 = vtanh.f32 %v664_v31  ;;  %v746_v62 = vadd.f32 %v2765_v35, %v745_v40  ;;  %vm752_vm3 = vcmp.eq.f32.partialorder %v751_v56, 8.507059e+37 }
 0x206   :  { %v705_v61 = vmul.f32 %v2182_v60, %v704_v37 }
 0x207   :  { %v750_v46 = vsel %vm749_vm2, %v2765_v35, %v746_v62 }
 0x208   :  { %v706_v43 = vadd.f32 %v2182_v60, %v705_v61  ;;  %v755_v52 = vsel %vm752_vm3, %v754_v48, %v750_v46 }
 0x209   :  { %v780_v17 = vsub.f32 1.0, %v755_v52 }
 0x20a   :  { %v710_v49 = vsel %vm709_vm13, %v2182_v60, %v706_v43  ;;  %v782_v60 = vmul.f32 %v755_v52, %v2719_v53 }
 0x20b   :  { %v2184_v51 = vpop.eup %2183  ;;  %v715_v41 = vsel %vm712_vm14, %v714_v54, %v710_v49 }
 0x20c   :  { %v667_v44 = vmul.f32 %v2184_v51, %v666_v47  ;;  %v777_v14 = vmul.f32 %v775_v34, %v715_v41 }
 0x20e   :  { %v778_v58 = vadd.f32 %v2038_v27, %v777_v14  ;;  %v2784_v59 = vadd.f32 %v668_v55, %v667_v44 }
 0x210   :  { %2185 = vtanh.f32 %v778_v58  ;;  %2047 = vmatmul.msk.f32.vlgmr.msra.gmra.mxu2 %vm63_vm0, %v2784_v59  ;;  %2049 = vmatmul.msk.f32.vlgmr.msra.gmra.mxu3 %vm63_vm0, %v2784_v59 }
 0x211   :  { %2051 = vmatmul.msk.f32.vlgmr.msrb.gmra.mxu0 %vm63_vm0, %v2784_v59  ;;  %1145 = vmatpush.msra.mxu3 %v2377_v2 }
 0x212   :  { %1111 = vmatpush.msra.mxu2 %v2437_v13  ;;  %1185 = vmatpush.msrb.mxu0 %v2448_v15 }
 0x213   :  { %1146 = vmatpush.msra.mxu3 %v2395_v6 }
 0x214   :  { %1112 = vmatpush.msra.mxu2 %v2453_v16  ;;  %1186 = vmatpush.msrb.mxu0 %v2472_v19  ;;  %v2053_v16 = vld [vmem:[%s3273_s1 + $0x68] sm:$0xff] }
 0x215   :  { %1147 = vmatpush.msra.mxu3 %v2414_v9 }
 0x216   :  { %v2186_v35 = vpop.eup %2185  ;;  %1113 = vmatpush.msra.mxu2 %v2477_v20  ;;  %1187 = vmatpush.msrb.mxu0 %v2489_v22 }
 0x217   :  { %v781_v2 = vmul.f32 %v2186_v35, %v780_v17  ;;  %1148 = vmatpush.msra.mxu3 %v2432_v12 }
 0x218   :  { %1114 = vmatpush.msra.mxu2 %v2494_v23  ;;  %1188 = vmatpush.msrb.mxu0 %v2508_v25 }
 0x219   :  { %v2806_v6 = vadd.f32 %v782_v60, %v781_v2 }
 0x21b   :  { %2055 = vmatmul.msk.f32.vlgmr.msrb.gmra.mxu1 %vm63_vm0, %v2806_v6  ;;  %2057 = vmatmul.msk.f32.vlgmr.msrb.gmra.mxu2 %vm63_vm0, %v2806_v6 }
 0x21c   :  { %2059 = vmatmul.msk.f32.vlgmr.msrb.gmra.mxu3 %vm63_vm0, %v2806_v6  ;;  %1225 = vmatpush.msrb.mxu1 %v2463_v18 }
 0x21d   :  { %1259 = vmatpush.msrb.mxu2 %v2367_v0  ;;  %1299 = vmatpush.msrb.mxu3 %v2372_v1  ;;  %v2044_v0 = vld [vmem:[%s3272_s0 + $0x48] sm:$0xff]  ;;  %v2045_v1 = vld [vmem:[%s3272_s0 + $0x50] sm:$0xff] }
 0x21e   :  { %1226 = vmatpush.msrb.mxu1 %v2484_v21 }
 0x21f   :  { %1260 = vmatpush.msrb.mxu2 %v2385_v4  ;;  %1300 = vmatpush.msrb.mxu3 %v2390_v5 }
 0x220   :  { %1227 = vmatpush.msrb.mxu1 %v2503_v24 }
 0x221   :  { %1261 = vmatpush.msrb.mxu2 %v2402_v7  ;;  %1301 = vmatpush.msrb.mxu3 %v2407_v8 }
 0x222   :  { %1228 = vmatpush.msrb.mxu1 %v2517_v26 }
 0x223   :  { %1262 = vmatpush.msrb.mxu2 %v2420_v10  ;;  %1302 = vmatpush.msrb.mxu3 %v2425_v11  ;;  %v2052_v10 = vld [vmem:[%s3273_s1 + $0x60] sm:$0xff] }
 0x28e   :  { %v888_v36 = vpop.f32.mrf.mxu0 }
 0x28f   :  { %v889_v43 = vadd.f32 %v2582_v57, %v888_v36  ;;  %v2939_v36 = vld [vmem:[%s3269_s3 + $0x50] sm:$0xff] }
 0x293   :  { %v808_v4 = vpop.f32.mrf.mxu2  ;;  %v848_v5 = vpop.f32.mrf.mxu3 }
 0x294   :  { %v811_v9 = vadd.f32 %v2044_v0, %v808_v4  ;;  %v851_v7 = vadd.f32 %v2045_v1, %v848_v5  ;;  %v2054_v1 = vld [vmem:[%s3273_s1 + $0x70] sm:$0xff] }
 0x296   :  { %v2048_v12 = vmul.f32 -1.442695, %v811_v9  ;;  %v2050_v8 = vmul.f32 -1.442695, %v851_v7 }
 0x298   :  { %2187 = vpow2.f32 %v2048_v12  ;;  %v922_v11 = vpop.f32.mrf.mxu1 }
 0x299   :  { %2189 = vpow2.f32 %v2050_v8  ;;  %v925_v13 = vadd.f32 %v2052_v10, %v922_v11 }
 0x29b   :  { %v2056_v15 = vmul.f32 -1.442695, %v925_v13 }
 0x29d   :  { %2191 = vpow2.f32 %v2056_v15 }
 0x29e   :  { %v2188_v18 = vpop.eup %2187  ;;  %v962_v19 = vpop.f32.mrf.mxu2 }
 0x29f   :  { %v2190_v20 = vpop.eup %2189  ;;  %v815_v21 = vadd.f32 1.0, %v2188_v18  ;;  %v965_v22 = vadd.f32 %v2053_v16, %v962_v19  ;;  %v1002_v44 = vpop.f32.mrf.mxu3 }
 0x2a0   :  { %v855_v23 = vadd.f32 1.0, %v2190_v20  ;;  %v1003_v52 = vadd.f32 %v2591_v30, %v1002_v44 }
 0x2a1   :  { %2193 = vrcp.f32 %v815_v21  ;;  %v2058_v25 = vmul.f32 -1.442695, %v965_v22  ;;  %v825_v32 = vand.u32 2147483647, %v815_v21  ;;  %v827_v33 = vand.u32 2147483648, %v815_v21 }
 0x2a2   :  { %2195 = vrcp.f32 %v855_v23  ;;  %vm821_vm5 = vweird.f32 %v815_v21  ;;  %vm861_vm10 = vweird.f32 %v855_v23  ;;  %v867_v57 = vand.u32 2147483648, %v855_v23 }
 0x2a3   :  { %v2192_v24 = vpop.eup %2191  ;;  %2197 = vpow2.f32 %v2058_v25  ;;  %vm826_vm7 = vcmp.eq.f32.partialorder %v825_v32, 8.507059e+37  ;;  %v828_v54 = vor.u32 1.1754944e-38, %v827_v33  ;;  %v865_v56 = vand.u32 2147483647, %v855_v23  ;;  %v2911_v32 = vld [vmem:[%s3269_s3 + $0x58] sm:$0xff]  ;;  %v2917_v33 = vld [vmem:[%s3269_s3 + $0x8] sm:$0xff] }
 0x2a4   :  { %v929_v26 = vadd.f32 1.0, %v2192_v24  ;;  %v868_v0 = vor.u32 1.1754944e-38, %v867_v57 }
 0x2a5   :  { %vm866_vm15 = vcmp.eq.f32.partialorder %v865_v56, 8.507059e+37 }
 0x2a6   :  { %2199 = vrcp.f32 %v929_v26  ;;  %v939_v34 = vand.u32 2147483647, %v929_v26  ;;  %v941_v51 = vand.u32 2147483648, %v929_v26  ;;  %vm935_vm12 = vweird.f32 %v929_v26 }
 0x2a7   :  { %v2194_v53 = vpop.eup %2193 }
 0x2a8   :  { %v2196_v3 = vpop.eup %2195  ;;  %v817_v50 = vmul.f32 %v2194_v53, %v815_v21  ;;  %vm822_vm4 = vweird.f32 %v2194_v53  ;;  %v942_v48 = vor.u32 1.1754944e-38, %v941_v51  ;;  %vm940_vm14 = vcmp.eq.f32.partialorder %v939_v34, 8.507059e+37  ;;  %v2999_v34 = vld [vmem:[%s3268_s2 + $0x28] sm:$0xff]  ;;  %v3005_v51 = vld [vmem:[%s3268_s2] sm:$0xff] }
 0x2a9   :  { %v857_v28 = vmul.f32 %v2196_v3, %v855_v23  ;;  %v2198_v31 = vpop.eup %2197  ;;  %vm823_vm6 = vmor %vm821_vm5, %vm822_vm4  ;;  %vm862_vm8 = vweird.f32 %v2196_v3 }
 0x2aa   :  { %v818_v29 = vsub.f32 1.0, %v817_v50  ;;  %v969_v38 = vadd.f32 1.0, %v2198_v31  ;;  %vm2842_vm11 = vmor %vm861_vm10, %vm862_vm8  ;;  %v2885_v50 = vld [vmem:[%s3268_s2 + $0x50] sm:$0xff]  ;;  %v2905_v31 = vld [vmem:[%s3268_s2 + $0x48] sm:$0xff] }
 0x2ab   :  { %v858_v37 = vsub.f32 1.0, %v857_v28  ;;  %v2891_v28 = vld [vmem:[%s3269_s3 + $0x10] sm:$0xff] }
 0x2ac   :  { %v2200_v63 = vpop.eup %2199  ;;  %v819_v61 = vmul.f32 %v2194_v53, %v818_v29  ;;  %2201 = vrcp.f32 %v969_v38  ;;  %v981_v7 = vand.u32 2147483648, %v969_v38  ;;  %v979_v8 = vand.u32 2147483647, %v969_v38  ;;  %v2897_v29 = vld [vmem:[%s3269_s3 + $0x30] sm:$0xff] }
 0x2ad   :  { %v859_v39 = vmul.f32 %v2196_v3, %v858_v37  ;;  %v931_v40 = vmul.f32 %v2200_v63, %v929_v26  ;;  %vm936_vm9 = vweird.f32 %v2200_v63  ;;  %vm975_vm2 = vweird.f32 %v969_v38  ;;  %v2923_v37 = vld [vmem:[%s3268_s2 + $0x40] sm:$0xff] }
 0x2ae   :  { %v820_v42 = vadd.f32 %v2194_v53, %v819_v61  ;;  %vm937_vm13 = vmor %vm935_vm12, %vm936_vm9  ;;  %v982_v16 = vor.u32 1.1754944e-38, %v981_v7  ;;  %vm980_vm4 = vcmp.eq.f32.partialorder %v979_v8, 8.507059e+37  ;;  %v2945_v61 = vld [vmem:[%s3269_s3] sm:$0xff] }
 0x2af   :  { %v932_v47 = vsub.f32 1.0, %v931_v40  ;;  %v860_v27 = vadd.f32 %v2196_v3, %v859_v39  ;;  %v2957_v39 = vld [vmem:[%s3268_s2 + $0x18] sm:$0xff]  ;;  %v2963_v40 = vld [vmem:[%s3269_s3 + $0x48] sm:$0xff] }
 0x2b0   :  { %v824_v49 = vsel %vm823_vm6, %v2194_v53, %v820_v42  ;;  %v2871_v53 = vld [vmem:[%s3269_s3 + $0x18] sm:$0xff] }
 0x2b1   :  { %v829_v62 = vsel %vm826_vm7, %v828_v54, %v824_v49  ;;  %v933_v41 = vmul.f32 %v2200_v63, %v932_v47  ;;  %v864_v60 = vsel %vm2842_vm11, %v2196_v3, %v860_v27  ;;  %v2877_v3 = vld [vmem:[%s3269_s3 + $0x38] sm:$0xff]  ;;  %v2981_v54 = vld [vmem:[%s3269_s3 + $0x40] sm:$0xff]  ;;  %v2987_v47 = vld [vmem:[%s3268_s2 + $0x30] sm:$0xff] }
 0x2b2   :  { %v891_v14 = vmul.f32 %v889_v43, %v829_v62  ;;  %v2202_v46 = vpop.eup %2201  ;;  %v869_v12 = vsel %vm866_vm15, %v868_v0, %v864_v60  ;;  %v2969_v42 = vld [vmem:[%s3268_s2 + $0x38] sm:$0xff]  ;;  %v2975_v43 = vld [vmem:[%s3268_s2 + $0x10] sm:$0xff]  ;;  %v2993_v49 = vld [vmem:[%s3268_s2 + $0x8] sm:$0xff] }
 0x2b3   :  { %v934_v58 = vadd.f32 %v2200_v63, %v933_v41  ;;  %v971_v35 = vmul.f32 %v2202_v46, %v969_v38  ;;  %vm976_vm1 = vweird.f32 %v2202_v46  ;;  %v894_v13 = vsub.f32 1.0, %v869_v12  ;;  %v2951_v38 = vld [vmem:[%s3269_s3 + $0x20] sm:$0xff]  ;;  %v2061_v41 = vld [vmem:[%s3272_s0 + $0x68] sm:$0xff] }
 0x2b4   :  { %v892_v17 = vadd.f32 %v2046_v45, %v891_v14  ;;  %vm977_vm3 = vmor %vm975_vm2, %vm976_vm1  ;;  %v896_v20 = vmul.f32 %v869_v12, %v2784_v59  ;;  %v2865_v59 = vld [vmem:[%s3268_s2 + $0x58] sm:$0xff]  ;;  %v3011_v62 = vld [vmem:[%s3268_s2 + $0x20] sm:$0xff] }
 0x2b5   :  { %v938_v2 = vsel %vm937_vm13, %v2200_v63, %v934_v58  ;;  %v972_v5 = vsub.f32 1.0, %v971_v35  ;;  %v2929_v63 = vld [vmem:[%s3269_s3 + $0x28] sm:$0xff]  ;;  %v2060_v27 = vld [vmem:[%s3272_s0 + $0x60] sm:$0xff]  ;;  %v2069_v58 = vld [vmem:[%s3273_s1 + $0x50] sm:$0xff] }
 0x2b6   :  { %v943_v4 = vsel %vm940_vm14, %v942_v48, %v938_v2  ;;  %2203 = vtanh.f32 %v892_v17  ;;  %v2068_v48 = vld [vmem:[%s3273_s1 + $0x48] sm:$0xff] }
 0x2b7   :  { %v1005_v9 = vmul.f32 %v1003_v52, %v943_v4  ;;  %v973_v30 = vmul.f32 %v2202_v46, %v972_v5 }
 0x2b9   :  { %v1006_v10 = vadd.f32 %v2054_v1, %v1005_v9  ;;  %v974_v11 = vadd.f32 %v2202_v46, %v973_v30 }
 0x2bb   :  { %2205 = vtanh.f32 %v1006_v10  ;;  %v978_v18 = vsel %vm977_vm3, %v2202_v46, %v974_v11 }
 0x2bc   :  { %v2204_v15 = vpop.eup %2203  ;;  %v983_v21 = vsel %vm980_vm4, %v982_v16, %v978_v18 }
 0x2bd   :  { %v895_v19 = vmul.f32 %v2204_v15, %v894_v13  ;;  %v1008_v22 = vsub.f32 1.0, %v983_v21  ;;  %v1010_v26 = vmul.f32 %v983_v21, %v2806_v6 }
 0x2bf   :  { %v2853_v23 = vadd.f32 %v896_v20, %v895_v19 }
 0x2c1   :  { %v2206_v24 = vpop.eup %2205  ;;  %2063 = vmatmul.msk.f32.vlgmr.msra.gmra.mxu0 %vm63_vm0, %v2853_v23  ;;  %2065 = vmatmul.msk.f32.vlgmr.msra.gmra.mxu1 %vm63_vm0, %v2853_v23 }
 0x2c2   :  { %v1009_v25 = vmul.f32 %v2206_v24, %v1008_v22  ;;  %2067 = vmatmul.msk.f32.vlgmr.msra.gmra.mxu2 %vm63_vm0, %v2853_v23  ;;  %1339 = vmatpush.msra.mxu0 %v2865_v59 }
 0x2c3   :  { %1373 = vmatpush.msra.mxu1 %v2871_v53  ;;  %1413 = vmatpush.msra.mxu2 %v2877_v3 }
 0x2c4   :  { %v2880_v6 = vadd.f32 %v1010_v26, %v1009_v25  ;;  %1340 = vmatpush.msra.mxu0 %v2885_v50 }
 0x2c5   :  { %1374 = vmatpush.msra.mxu1 %v2891_v28  ;;  %1414 = vmatpush.msra.mxu2 %v2897_v29 }
 0x2c6   :  { %2071 = vmatmul.msk.f32.vlgmr.msra.gmra.mxu3 %vm63_vm0, %v2880_v6  ;;  %1341 = vmatpush.msra.mxu0 %v2905_v31 }
 0x2c7   :  { %1453 = vmatpush.msra.mxu3 %v2911_v32  ;;  %1375 = vmatpush.msra.mxu1 %v2917_v33 }
 0x2c8   :  { %1342 = vmatpush.msra.mxu0 %v2923_v37  ;;  %1415 = vmatpush.msra.mxu2 %v2929_v63 }
 0x2c9   :  { %2073 = vmatmul.msk.f32.vlgmr.msrb.gmra.mxu0 %vm63_vm0, %v2880_v6  ;;  %2075 = vmatmul.msk.f32.vlgmr.msrb.gmra.mxu1 %vm63_vm0, %v2880_v6 }
 0x2ca   :  { %1454 = vmatpush.msra.mxu3 %v2939_v36  ;;  %1376 = vmatpush.msra.mxu1 %v2945_v61 }
 0x2cb   :  { %1416 = vmatpush.msra.mxu2 %v2951_v38  ;;  %1487 = vmatpush.msrb.mxu0 %v2957_v39 }
 0x2cc   :  { %1455 = vmatpush.msra.mxu3 %v2963_v40  ;;  %1527 = vmatpush.msrb.mxu1 %v2969_v42 }
 0x2cd   :  { %1488 = vmatpush.msrb.mxu0 %v2975_v43 }
 0x2ce   :  { %1456 = vmatpush.msra.mxu3 %v2981_v54  ;;  %1528 = vmatpush.msrb.mxu1 %v2987_v47 }
 0x2cf   :  { %1489 = vmatpush.msrb.mxu0 %v2993_v49 }
 0x2d0   :  { %1529 = vmatpush.msrb.mxu1 %v2999_v34 }
 0x2d1   :  { %1490 = vmatpush.msrb.mxu0 %v3005_v51 }
 0x2d2   :  { %1530 = vmatpush.msrb.mxu1 %v3011_v62 }
 0x33e   :  { %v1036_v44 = vpop.f32.mrf.mxu0  ;;  %v1076_v45 = vpop.f32.mrf.mxu1 }
 0x33f   :  { %v1039_v14 = vadd.f32 %v2060_v27, %v1036_v44  ;;  %v1079_v57 = vadd.f32 %v2061_v41, %v1076_v45  ;;  %v3034_v41 = vld [vmem:[%s3270_s4] ss:$0 sm:$0xff] }
 0x341   :  { %v2064_v55 = vmul.f32 -1.442695, %v1039_v14  ;;  %v2066_v56 = vmul.f32 -1.442695, %v1079_v57  ;;  %v2062_v14 = vld [vmem:[%s3272_s0 + $0x70] sm:$0xff] }
 0x343   :  { %2207 = vpow2.f32 %v2064_v55 }
 0x344   :  { %2209 = vpow2.f32 %v2066_v56 }
 0x345   :  { %v1116_v22 = vpop.f32.mrf.mxu2 }
 0x346   :  { %v1190_v46 = vpop.f32.mrf.mxu0  ;;  %v1117_v44 = vadd.f32 %v3034_v41, %v1116_v22 }
 0x347   :  { %v1193_v52 = vadd.f32 %v2069_v58, %v1190_v46 }
 0x349   :  { %v2208_v17 = vpop.eup %2207  ;;  %v1150_v35 = vpop.f32.mrf.mxu3  ;;  %v2074_v2 = vmul.f32 -1.442695, %v1193_v52 }
 0x34a   :  { %v2210_v60 = vpop.eup %2209  ;;  %v1043_v0 = vadd.f32 1.0, %v2208_v17  ;;  %v1153_v1 = vadd.f32 %v2068_v48, %v1150_v35 }
 0x34b   :  { %v1083_v4 = vadd.f32 1.0, %v2210_v60  ;;  %2211 = vpow2.f32 %v2074_v2 }
 0x34c   :  { %2213 = vrcp.f32 %v1043_v0  ;;  %v2072_v5 = vmul.f32 -1.442695, %v1153_v1  ;;  %v1055_v16 = vand.u32 2147483648, %v1043_v0  ;;  %v1053_v19 = vand.u32 2147483647, %v1043_v0 }
 0x34d   :  { %2215 = vrcp.f32 %v1083_v4  ;;  %vm1049_vm6 = vweird.f32 %v1043_v0  ;;  %v1095_v55 = vand.u32 2147483648, %v1083_v4  ;;  %vm1089_vm10 = vweird.f32 %v1083_v4 }
 0x34e   :  { %2217 = vpow2.f32 %v2072_v5  ;;  %v1056_v26 = vor.u32 1.1754944e-38, %v1055_v16  ;;  %vm1054_vm8 = vcmp.eq.f32.partialorder %v1053_v19, 8.507059e+37  ;;  %v1093_v46 = vand.u32 2147483647, %v1083_v4 }
 0x34f   :  { %v1096_v2 = vor.u32 1.1754944e-38, %v1095_v55 }
 0x350   :  { %vm1094_vm12 = vcmp.eq.f32.partialorder %v1093_v46, 8.507059e+37 }
 0x351   :  { %v2212_v9 = vpop.eup %2211 }
 0x352   :  { %v2214_v7 = vpop.eup %2213  ;;  %v3026_v12 = vadd.f32 1.0, %v2212_v9 }
 0x353   :  { %v2216_v30 = vpop.eup %2215  ;;  %v1045_v8 = vmul.f32 %v2214_v7, %v1043_v0  ;;  %vm1050_vm5 = vweird.f32 %v2214_v7 }
 0x354   :  { %v1085_v10 = vmul.f32 %v2216_v30, %v1083_v4  ;;  %2219 = vrcp.f32 %v3026_v12  ;;  %v2218_v13 = vpop.eup %2217  ;;  %vm1051_vm7 = vmor %vm1049_vm6, %vm1050_vm5  ;;  %vm1090_vm9 = vweird.f32 %v2216_v30  ;;  %vm1203_vm3 = vweird.f32 %v3026_v12 }
 0x355   :  { %v1046_v11 = vsub.f32 1.0, %v1045_v8  ;;  %v1157_v20 = vadd.f32 1.0, %v2218_v13  ;;  %vm1091_vm11 = vmor %vm1089_vm10, %vm1090_vm9  ;;  %v1230_v8 = vpop.f32.mrf.mxu1 }
 0x356   :  { %v1086_v15 = vsub.f32 1.0, %v1085_v10 }
 0x357   :  { %v1047_v18 = vmul.f32 %v2214_v7, %v1046_v11  ;;  %2221 = vrcp.f32 %v1157_v20  ;;  %v1169_v5 = vand.u32 2147483648, %v1157_v20  ;;  %vm1163_vm14 = vweird.f32 %v1157_v20 }
 0x358   :  { %v1087_v21 = vmul.f32 %v2216_v30, %v1086_v15  ;;  %v3046_v15 = vld [vmem:[%s3271_s5] ss:$0 sm:$0xff] }
 0x359   :  { %v1048_v24 = vadd.f32 %v2214_v7, %v1047_v18  ;;  %v1231_v16 = vadd.f32 %v3046_v15, %v1230_v8 }
 0x35a   :  { %v3029_v25 = vpop.eup %2219  ;;  %v1088_v45 = vadd.f32 %v2216_v30, %v1087_v21 }
 0x35b   :  { %v1052_v27 = vsel %vm1051_vm7, %v2214_v7, %v1048_v24  ;;  %v1199_v58 = vmul.f32 %v3029_v25, %v3026_v12  ;;  %v1167_v7 = vand.u32 2147483647, %v1157_v20  ;;  %vm1204_vm2 = vweird.f32 %v3029_v25 }
 0x35c   :  { %v1057_v57 = vsel %vm1054_vm8, %v1056_v26, %v1052_v27  ;;  %v1092_v17 = vsel %vm1091_vm11, %v2216_v30, %v1088_v45  ;;  %v1170_v30 = vor.u32 1.1754944e-38, %v1169_v5  ;;  %v1209_v26 = vand.u32 2147483648, %v3026_v12  ;;  %vm1205_vm4 = vmor %vm1203_vm3, %vm1204_vm2 }
 0x35d   :  { %v1119_v56 = vmul.f32 %v1117_v44, %v1057_v57  ;;  %v2222_v48 = vpop.eup %2221  ;;  %v1200_v60 = vsub.f32 1.0, %v1199_v58  ;;  %v1097_v1 = vsel %vm1094_vm12, %v1096_v2, %v1092_v17  ;;  %vm1168_vm1 = vcmp.eq.f32.partialorder %v1167_v7, 8.507059e+37 }
 0x35e   :  { %v1159_v35 = vmul.f32 %v2222_v48, %v1157_v20  ;;  %vm1164_vm13 = vweird.f32 %v2222_v48  ;;  %v1122_v11 = vsub.f32 1.0, %v1097_v1  ;;  %v1124_v21 = vmul.f32 %v1097_v1, %v2853_v23  ;;  %v2070_v20 = vld [vmem:[%s3273_s1 + $0x58] sm:$0xff] }
 0x35f   :  { %v1120_v52 = vadd.f32 %v2062_v14, %v1119_v56  ;;  %v1201_v10 = vmul.f32 %v3029_v25, %v1200_v60  ;;  %vm1165_vm15 = vmor %vm1163_vm14, %vm1164_vm13  ;;  %v1207_v45 = vand.u32 2147483647, %v3026_v12  ;;  %v1210_v57 = vor.u32 1.1754944e-38, %v1209_v26  ;;  %v2085_v1 = vld [vmem:[%s3273_s1 + $0x38] sm:$0xff] }
 0x360   :  { %v1160_v0 = vsub.f32 1.0, %v1159_v35 }
 0x361   :  { %2223 = vtanh.f32 %v1120_v52  ;;  %v1202_v22 = vadd.f32 %v3029_v25, %v1201_v10  ;;  %vm1208_vm5 = vcmp.eq.f32.partialorder %v1207_v45, 8.507059e+37 }
 0x362   :  { %v1161_v9 = vmul.f32 %v2222_v48, %v1160_v0 }
 0x363   :  { %v1206_v14 = vsel %vm1205_vm4, %v3029_v25, %v1202_v22 }
 0x364   :  { %v1162_v4 = vadd.f32 %v2222_v48, %v1161_v9  ;;  %v1211_v12 = vsel %vm1208_vm5, %v1210_v57, %v1206_v14 }
 0x365   :  { %v1236_v25 = vsub.f32 1.0, %v1211_v12  ;;  %v1238_v58 = vmul.f32 %v1211_v12, %v2880_v6  ;;  %v2076_v6 = vld [vmem:[%s3272_s0 + $0x78] sm:$0xff] }
 0x366   :  { %v1166_v19 = vsel %vm1165_vm15, %v2222_v48, %v1162_v4 }
 0x367   :  { %v2224_v13 = vpop.eup %2223  ;;  %v1171_v24 = vsel %vm1168_vm1, %v1170_v30, %v1166_v19 }
 0x368   :  { %v1123_v18 = vmul.f32 %v2224_v13, %v1122_v11  ;;  %v1233_v27 = vmul.f32 %v1231_v16, %v1171_v24 }
 0x36a   :  { %v3056_v44 = vadd.f32 %v1124_v21, %v1123_v18  ;;  %v1234_v23 = vadd.f32 %v2070_v20, %v1233_v27 }
 0x36c   :  { %2079 = vmatmul.msk.f32.vlgmr.msrb.gmra.mxu2 %vm63_vm0, %v3056_v44  ;;  %2081 = vmatmul.msk.f32.vlgmr.msrb.gmra.mxu3 %vm63_vm0, %v3056_v44  ;;  %2225 = vtanh.f32 %v1234_v23 }
 0x36d   :  { %2083 = vmatmul.msk.f32.vlgmr.msra.gmra.mxu0 %vm63_vm0, %v3056_v44  ;;  %1601 = vmatpush.msrb.mxu3 %v2871_v53 }
 0x36e   :  { %1567 = vmatpush.msrb.mxu2 %v2865_v59  ;;  %1641 = vmatpush.msra.mxu0 %v2877_v3 }
 0x36f   :  { %1602 = vmatpush.msrb.mxu3 %v2891_v28 }
 0x370   :  { %1568 = vmatpush.msrb.mxu2 %v2885_v50  ;;  %1642 = vmatpush.msra.mxu0 %v2897_v29 }
 0x371   :  { %1603 = vmatpush.msrb.mxu3 %v2917_v33 }
 0x372   :  { %1569 = vmatpush.msrb.mxu2 %v2905_v31  ;;  %1643 = vmatpush.msra.mxu0 %v2929_v63  ;;  %v2226_v55 = vpop.eup %2225 }
 0x373   :  { %1604 = vmatpush.msrb.mxu3 %v2945_v61  ;;  %v1237_v56 = vmul.f32 %v2226_v55, %v1236_v25 }
 0x374   :  { %1570 = vmatpush.msrb.mxu2 %v2923_v37  ;;  %1644 = vmatpush.msra.mxu0 %v2951_v38 }
 0x375   :  { %v3080_v46 = vadd.f32 %v1238_v58, %v1237_v56 }
 0x377   :  { %2087 = vmatmul.msk.f32.vlgmr.msra.gmra.mxu1 %vm63_vm0, %v3080_v46  ;;  %2089 = vmatmul.msk.f32.vlgmr.msra.gmra.mxu2 %vm63_vm0, %v3080_v46 }
 0x378   :  { %2091 = vmatmul.msk.f32.vlgmr.msra.gmra.mxu3 %vm63_vm0, %v3080_v46  ;;  %1681 = vmatpush.msra.mxu1 %v2911_v32 }
 0x379   :  { %1715 = vmatpush.msra.mxu2 %v2957_v39  ;;  %1755 = vmatpush.msra.mxu3 %v2969_v42  ;;  %v2077_v39 = vld [vmem:[%s3272_s0 + $0x80] sm:$0xff] }
 0x37a   :  { %1682 = vmatpush.msra.mxu1 %v2939_v36 }
 0x37b   :  { %1716 = vmatpush.msra.mxu2 %v2975_v43  ;;  %1756 = vmatpush.msra.mxu3 %v2987_v47 }
 0x37c   :  { %1683 = vmatpush.msra.mxu1 %v2963_v40 }
 0x37d   :  { %1717 = vmatpush.msra.mxu2 %v2993_v49  ;;  %1757 = vmatpush.msra.mxu3 %v2999_v34 }
 0x37e   :  { %1684 = vmatpush.msra.mxu1 %v2981_v54 }
 0x37f   :  { %1718 = vmatpush.msra.mxu2 %v3005_v51  ;;  %1758 = vmatpush.msra.mxu3 %v3011_v62  ;;  %v2084_v51 = vld [vmem:[%s3273_s1 + $0x30] sm:$0xff] }
 0x3ea   :  { %v1344_v24 = vpop.f32.mrf.mxu0 }
 0x3eb   :  { %v1345_v12 = vadd.f32 %v3034_v41, %v1344_v24 }
 0x3ef   :  { %v1264_v42 = vpop.f32.mrf.mxu2  ;;  %v1304_v43 = vpop.f32.mrf.mxu3 }
 0x3f0   :  { %v1267_v47 = vadd.f32 %v2076_v6, %v1264_v42  ;;  %v1307_v49 = vadd.f32 %v2077_v39, %v1304_v43  ;;  %v2078_v6 = vld [vmem:[%s3272_s0 + $0x88] sm:$0xff] }
 0x3f2   :  { %v2080_v48 = vmul.f32 -1.442695, %v1267_v47  ;;  %v2082_v34 = vmul.f32 -1.442695, %v1307_v49 }
 0x3f4   :  { %2227 = vpow2.f32 %v2080_v48  ;;  %v1378_v62 = vpop.f32.mrf.mxu1 }
 0x3f5   :  { %2229 = vpow2.f32 %v2082_v34  ;;  %v1381_v52 = vadd.f32 %v2084_v51, %v1378_v62 }
 0x3f7   :  { %v2088_v17 = vmul.f32 -1.442695, %v1381_v52 }
 0x3f9   :  { %2231 = vpow2.f32 %v2088_v17 }
 0x3fa   :  { %v2228_v35 = vpop.eup %2227  ;;  %v1418_v5 = vpop.f32.mrf.mxu2 }
 0x3fb   :  { %v2230_v2 = vpop.eup %2229  ;;  %v1271_v60 = vadd.f32 1.0, %v2228_v35  ;;  %v1421_v9 = vadd.f32 %v2085_v1, %v1418_v5  ;;  %v1458_v34 = vpop.f32.mrf.mxu3 }
 0x3fc   :  { %v1311_v0 = vadd.f32 1.0, %v2230_v2 }
 0x3fd   :  { %2233 = vrcp.f32 %v1271_v60  ;;  %v2090_v8 = vmul.f32 -1.442695, %v1421_v9  ;;  %v1283_v18 = vand.u32 2147483648, %v1271_v60  ;;  %v1281_v22 = vand.u32 2147483647, %v1271_v60  ;;  %v2086_v9 = vld [vmem:[%s3273_s1 + $0x40] sm:$0xff] }
 0x3fe   :  { %2235 = vrcp.f32 %v1311_v0  ;;  %vm1277_vm7 = vweird.f32 %v1271_v60  ;;  %vm1317_vm11 = vweird.f32 %v1311_v0  ;;  %v1323_v42 = vand.u32 2147483648, %v1311_v0 }
 0x3ff   :  { %v2232_v7 = vpop.eup %2231  ;;  %2237 = vpow2.f32 %v2090_v8  ;;  %v1284_v14 = vor.u32 1.1754944e-38, %v1283_v18  ;;  %vm1282_vm9 = vcmp.eq.f32.partialorder %v1281_v22, 8.507059e+37  ;;  %v1321_v47 = vand.u32 2147483647, %v1311_v0 }
 0x400   :  { %v1385_v10 = vadd.f32 1.0, %v2232_v7  ;;  %v1324_v2 = vor.u32 1.1754944e-38, %v1323_v42 }
 0x401   :  { %vm1322_vm1 = vcmp.eq.f32.partialorder %v1321_v47, 8.507059e+37 }
 0x402   :  { %2239 = vrcp.f32 %v1385_v10  ;;  %v1397_v43 = vand.u32 2147483648, %v1385_v10  ;;  %v1395_v48 = vand.u32 2147483647, %v1385_v10  ;;  %vm1391_vm14 = vweird.f32 %v1385_v10 }
 0x403   :  { %v2234_v11 = vpop.eup %2233 }
 0x404   :  { %v2236_v4 = vpop.eup %2235  ;;  %v1273_v13 = vmul.f32 %v2234_v11, %v1271_v60  ;;  %vm1278_vm6 = vweird.f32 %v2234_v11  ;;  %v1398_v60 = vor.u32 1.1754944e-38, %v1397_v43  ;;  %vm1396_vm2 = vcmp.eq.f32.partialorder %v1395_v48, 8.507059e+37 }
 0x405   :  { %v1313_v30 = vmul.f32 %v2236_v4, %v1311_v0  ;;  %v2238_v20 = vpop.eup %2237  ;;  %vm1279_vm8 = vmor %vm1277_vm7, %vm1278_vm6  ;;  %vm1318_vm10 = vweird.f32 %v2236_v4  ;;  %v1459_v0 = vadd.f32 %v3046_v15, %v1458_v34 }
 0x406   :  { %v1274_v16 = vsub.f32 1.0, %v1273_v13  ;;  %v1425_v23 = vadd.f32 1.0, %v2238_v20  ;;  %vm3116_vm13 = vmor %vm1317_vm11, %vm1318_vm10 }
 0x407   :  { %v1314_v19 = vsub.f32 1.0, %v1313_v30 }
 0x408   :  { %v1275_v21 = vmul.f32 %v2234_v11, %v1274_v16  ;;  %v2240_v27 = vpop.eup %2239  ;;  %2241 = vrcp.f32 %v1425_v23  ;;  %v1437_v13 = vand.u32 2147483648, %v1425_v23  ;;  %vm1431_vm4 = vweird.f32 %v1425_v23 }
 0x409   :  { %v1315_v26 = vmul.f32 %v2236_v4, %v1314_v19  ;;  %v1387_v57 = vmul.f32 %v2240_v27, %v1385_v10  ;;  %vm1392_vm12 = vweird.f32 %v2240_v27 }
 0x40a   :  { %v1276_v45 = vadd.f32 %v2234_v11, %v1275_v21  ;;  %vm1393_vm15 = vmor %vm1391_vm14, %vm1392_vm12  ;;  %v1438_v24 = vor.u32 1.1754944e-38, %v1437_v13 }
 0x40b   :  { %v1316_v56 = vadd.f32 %v2236_v4, %v1315_v26  ;;  %v1388_v58 = vsub.f32 1.0, %v1387_v57 }
 0x40c   :  { %v1280_v25 = vsel %vm1279_vm8, %v2234_v11, %v1276_v45 }
 0x40d   :  { %v1285_v55 = vsel %vm1282_vm9, %v1284_v14, %v1280_v25  ;;  %v1389_v49 = vmul.f32 %v2240_v27, %v1388_v58  ;;  %v1320_v17 = vsel %vm3116_vm13, %v2236_v4, %v1316_v56  ;;  %v1435_v4 = vand.u32 2147483647, %v1425_v23 }
 0x40e   :  { %v1347_v39 = vmul.f32 %v1345_v12, %v1285_v55  ;;  %v2242_v35 = vpop.eup %2241  ;;  %v1325_v8 = vsel %vm1322_vm1, %v1324_v2, %v1320_v17 }
 0x40f   :  { %v1390_v52 = vadd.f32 %v2240_v27, %v1389_v49  ;;  %v1427_v1 = vmul.f32 %v2242_v35, %v1425_v23  ;;  %vm1432_vm3 = vweird.f32 %v2242_v35  ;;  %v1350_v18 = vsub.f32 1.0, %v1325_v8 }
 0x410   :  { %v1348_v62 = vadd.f32 %v2078_v6, %v1347_v39  ;;  %v1352_v20 = vmul.f32 %v1325_v8, %v3056_v44  ;;  %vm1433_vm5 = vmor %vm1431_vm4, %vm1432_vm3  ;;  %vm1436_vm6 = vcmp.eq.f32.partialorder %v1435_v4, 8.507059e+37  ;;  %v2094_v8 = vld [vmem:[%s3272_s0 + $0xa0] sm:$0xff] }
 0x411   :  { %v1394_v5 = vsel %vm1393_vm15, %v2240_v27, %v1390_v52  ;;  %v1428_v10 = vsub.f32 1.0, %v1427_v1 }
 0x412   :  { %2243 = vtanh.f32 %v1348_v62  ;;  %v1399_v7 = vsel %vm1396_vm2, %v1398_v60, %v1394_v5 }
 0x413   :  { %v1461_v11 = vmul.f32 %v1459_v0, %v1399_v7  ;;  %v1429_v30 = vmul.f32 %v2242_v35, %v1428_v10 }
 0x415   :  { %v1462_v16 = vadd.f32 %v2086_v9, %v1461_v11  ;;  %v1430_v21 = vadd.f32 %v2242_v35, %v1429_v30 }
 0x417   :  { %2245 = vtanh.f32 %v1462_v16  ;;  %v1434_v26 = vsel %vm1433_vm5, %v2242_v35, %v1430_v21 }
 0x418   :  { %v2244_v19 = vpop.eup %2243  ;;  %v1439_v45 = vsel %vm1436_vm6, %v1438_v24, %v1434_v26 }
 0x419   :  { %v1351_v22 = vmul.f32 %v2244_v19, %v1350_v18  ;;  %v1464_v14 = vsub.f32 1.0, %v1439_v45  ;;  %v1466_v57 = vmul.f32 %v1439_v45, %v3080_v46  ;;  %v2100_v46 = vld [vmem:[%s3273_s1 + $0x18] sm:$0xff] }
 0x41b   :  { %v3127_v27 = vadd.f32 %v1352_v20, %v1351_v22 }
 0x41d   :  { %2095 = vmatmul.msk.f32.vlgmr.msrb.gmra.mxu0 %vm63_vm0, %v3127_v27  ;;  %2097 = vmatmul.msk.f32.vlgmr.msrb.gmra.mxu1 %vm63_vm0, %v3127_v27  ;;  %v2246_v44 = vpop.eup %2245 }
 0x41e   :  { %2099 = vmatmul.msk.f32.vlgmr.msrb.gmra.mxu2 %vm63_vm0, %v3127_v27  ;;  %1795 = vmatpush.msrb.mxu0 %v2865_v59  ;;  %v1465_v23 = vmul.f32 %v2246_v44, %v1464_v14  ;;  %v2092_v59 = vld [vmem:[%s3272_s0 + $0x90] sm:$0xff] }
 0x41f   :  { %1828 = vmatpush.msrb.mxu1 %v2871_v53  ;;  %1868 = vmatpush.msrb.mxu2 %v2877_v3  ;;  %v2093_v53 = vld [vmem:[%s3272_s0 + $0x98] sm:$0xff] }
 0x420   :  { %1796 = vmatpush.msrb.mxu0 %v2885_v50  ;;  %v3142_v12 = vadd.f32 %v1466_v57, %v1465_v23 }
 0x421   :  { %1829 = vmatpush.msrb.mxu1 %v2891_v28  ;;  %1869 = vmatpush.msrb.mxu2 %v2897_v29 }
 0x422   :  { %1797 = vmatpush.msrb.mxu0 %v2905_v31  ;;  %2103 = vmatmul.msk.f32.vlgmr.msrb.gmra.mxu3 %vm63_vm0, %v3142_v12 }
 0x423   :  { %1830 = vmatpush.msrb.mxu1 %v2917_v33  ;;  %1870 = vmatpush.msrb.mxu2 %v2929_v63  ;;  %v2101_v33 = vld [vmem:[%s3273_s1 + $0x20] sm:$0xff] }
 0x424   :  { %1798 = vmatpush.msrb.mxu0 %v2923_v37  ;;  %1908 = vmatpush.msrb.mxu3 %v2911_v32 }
 0x425   :  { %2105 = vmatmul.msk.f32.vlgmr.msra.gmra.mxu0 %vm63_vm0, %v3142_v12  ;;  %2107 = vmatmul.msk.f32.vlgmr.msra.gmra.mxu1 %vm63_vm0, %v3142_v12 }
 0x426   :  { %1831 = vmatpush.msrb.mxu1 %v2945_v61  ;;  %1871 = vmatpush.msrb.mxu2 %v2951_v38 }
 0x427   :  { %1909 = vmatpush.msrb.mxu3 %v2939_v36 }
 0x429   :  { %1910 = vmatpush.msrb.mxu3 %v2963_v40 }
 0x42b   :  { %1911 = vmatpush.msrb.mxu3 %v2981_v54 }
 0x49a   :  { %v1492_v3 = vpop.f32.mrf.mxu0  ;;  %v1532_v50 = vpop.f32.mrf.mxu1 }
 0x49b   :  { %v1495_v28 = vadd.f32 %v2092_v59, %v1492_v3  ;;  %v1535_v29 = vadd.f32 %v2093_v53, %v1532_v50 }
 0x49d   :  { %v2096_v31 = vmul.f32 -1.442695, %v1495_v28  ;;  %v2098_v32 = vmul.f32 -1.442695, %v1535_v29 }
 0x49f   :  { %2247 = vpow2.f32 %v2096_v31 }
 0x4a0   :  { %2249 = vpow2.f32 %v2098_v32 }
 0x4a1   :  { %v1572_v35 = vpop.f32.mrf.mxu2 }
 0x4a2   :  { %v1646_v37 = vpop.f32.mrf.mxu0  ;;  %v1573_v5 = vadd.f32 %v3034_v41, %v1572_v35  ;;  %v1686_v53 = vpop.f32.mrf.mxu1 }
 0x4a3   :  { %v1649_v63 = vadd.f32 %v2101_v33, %v1646_v37  ;;  %v1687_v32 = vadd.f32 %v3046_v15, %v1686_v53 }
 0x4a5   :  { %v2248_v36 = vpop.eup %2247  ;;  %v2106_v61 = vmul.f32 -1.442695, %v1649_v63  ;;  %v1606_v25 = vpop.f32.mrf.mxu3  ;;  %v2102_v63 = vld [vmem:[%s3273_s1 + $0x28] sm:$0xff] }
 0x4a6   :  { %v2250_v38 = vpop.eup %2249  ;;  %v1499_v40 = vadd.f32 1.0, %v2248_v36  ;;  %v1609_v55 = vadd.f32 %v2100_v46, %v1606_v25 }
 0x4a7   :  { %v1539_v54 = vadd.f32 1.0, %v2250_v38  ;;  %2251 = vpow2.f32 %v2106_v61 }
 0x4a8   :  { %2253 = vrcp.f32 %v1499_v40  ;;  %v2104_v56 = vmul.f32 -1.442695, %v1609_v55  ;;  %v1511_v34 = vand.u32 2147483648, %v1499_v40  ;;  %v1509_v62 = vand.u32 2147483647, %v1499_v40 }
 0x4a9   :  { %2255 = vrcp.f32 %v1539_v54  ;;  %vm1505_vm8 = vweird.f32 %v1499_v40  ;;  %v1551_v11 = vand.u32 2147483648, %v1539_v54  ;;  %vm1545_vm12 = vweird.f32 %v1539_v54 }
 0x4aa   :  { %2257 = vpow2.f32 %v2104_v56  ;;  %v1512_v0 = vor.u32 1.1754944e-38, %v1511_v34  ;;  %vm1510_vm10 = vcmp.eq.f32.partialorder %v1509_v62, 8.507059e+37  ;;  %v1549_v13 = vand.u32 2147483647, %v1539_v54  ;;  %v1810_v62 = vld [vmem:[%s3273_s1] sm:$0xff] }
 0x4ab   :  { %v1552_v21 = vor.u32 1.1754944e-38, %v1551_v11  ;;  %v1931_v11 = vld [vmem:[%s3275_s6 + $0x18] sm:$0xff] }
 0x4ac   :  { %vm1550_vm14 = vcmp.eq.f32.partialorder %v1549_v13, 8.507059e+37  ;;  %1974 = vmatpush.msra.mxu1 %v1931_v11  ;;  %v1934_v13 = vld [vmem:[%s3274_s7 + $0x10] sm:$0xff] }
 0x4ad   :  { %v2252_v58 = vpop.eup %2251 }
 0x4ae   :  { %v2254_v6 = vpop.eup %2253  ;;  %v3172_v39 = vadd.f32 1.0, %v2252_v58 }
 0x4af   :  { %v2256_v42 = vpop.eup %2255  ;;  %v1501_v43 = vmul.f32 %v2254_v6, %v1499_v40  ;;  %vm1506_vm7 = vweird.f32 %v2254_v6 }
 0x4b0   :  { %v1541_v47 = vmul.f32 %v2256_v42, %v1539_v54  ;;  %2259 = vrcp.f32 %v3172_v39  ;;  %v2258_v52 = vpop.eup %2257  ;;  %vm1507_vm9 = vmor %vm1505_vm8, %vm1506_vm7  ;;  %vm1546_vm11 = vweird.f32 %v2256_v42  ;;  %v1665_v61 = vand.u32 2147483648, %v3172_v39 }
 0x4b1   :  { %v1502_v49 = vsub.f32 1.0, %v1501_v43  ;;  %v1613_v60 = vadd.f32 1.0, %v2258_v52  ;;  %vm1547_vm13 = vmor %vm1545_vm12, %vm1546_vm11  ;;  %vm1659_vm5 = vweird.f32 %v3172_v39  ;;  %v2109_v43 = vld [vmem:[%s3272_s0 + $0xb0] sm:$0xff] }
 0x4b2   :  { %v1542_v48 = vsub.f32 1.0, %v1541_v47  ;;  %v1666_v46 = vor.u32 1.1754944e-38, %v1665_v61  ;;  %v2110_v61 = vld [vmem:[%s3272_s0 + $0xb8] sm:$0xff] }
 0x4b3   :  { %v1503_v51 = vmul.f32 %v2254_v6, %v1502_v49  ;;  %2261 = vrcp.f32 %v1613_v60  ;;  %v1625_v45 = vand.u32 2147483648, %v1613_v60  ;;  %v1623_v23 = vand.u32 2147483647, %v1613_v60 }
 0x4b4   :  { %v1543_v17 = vmul.f32 %v2256_v42, %v1542_v48  ;;  %vm1619_vm1 = vweird.f32 %v1613_v60 }
 0x4b5   :  { %v1504_v2 = vadd.f32 %v2254_v6, %v1503_v51  ;;  %v1626_v29 = vor.u32 1.1754944e-38, %v1625_v45  ;;  %vm1624_vm3 = vcmp.eq.f32.partialorder %v1623_v23, 8.507059e+37 }
 0x4b6   :  { %v2260_v9 = vpop.eup %2259  ;;  %v1544_v7 = vadd.f32 %v2256_v42, %v1543_v17 }
 0x4b7   :  { %v1508_v1 = vsel %vm1507_vm9, %v2254_v6, %v1504_v2  ;;  %v1655_v16 = vmul.f32 %v2260_v9, %v3172_v39  ;;  %vm1660_vm4 = vweird.f32 %v2260_v9 }
 0x4b8   :  { %v1513_v10 = vsel %vm1510_vm10, %v1512_v0, %v1508_v1  ;;  %v1548_v18 = vsel %vm1547_vm13, %v2256_v42, %v1544_v7  ;;  %vm1661_vm6 = vmor %vm1659_vm5, %vm1660_vm4 }
 0x4b9   :  { %v1575_v4 = vmul.f32 %v1573_v5, %v1513_v10  ;;  %v2262_v19 = vpop.eup %2261  ;;  %v1553_v20 = vsel %vm1550_vm14, %v1552_v21, %v1548_v18  ;;  %v1656_v24 = vsub.f32 1.0, %v1655_v16  ;;  %v1811_v5 = vld [vmem:[%s3273_s1 + $0x8] sm:$0xff]  ;;  %v1935_v10 = vld [vmem:[%s3274_s7 + $0x18] sm:$0xff] }
 0x4ba   :  { %v1615_v22 = vmul.f32 %v2262_v19, %v1613_v60  ;;  %v1578_v14 = vsub.f32 1.0, %v1553_v20  ;;  %vm1620_vm15 = vweird.f32 %v2262_v19  ;;  %v1580_v28 = vmul.f32 %v1553_v20, %v3127_v27  ;;  %1951 = vmatpush.msra.mxu0 %v1935_v10  ;;  %v1929_v21 = vld [vmem:[%s3275_s6 + $0x8] sm:$0xff] }
 0x4bb   :  { %v1576_v30 = vadd.f32 %v2094_v8, %v1575_v4  ;;  %v1657_v59 = vmul.f32 %v2260_v9, %v1656_v24  ;;  %vm1621_vm2 = vmor %vm1619_vm1, %vm1620_vm15  ;;  %v1663_v27 = vand.u32 2147483647, %v3172_v39  ;;  %v2108_v39 = vld [vmem:[%s3272_s0 + $0xa8] sm:$0xff]  ;;  %v1932_v24 = vld [vmem:[%s3274_s7] sm:$0xff] }
 0x4bc   :  { %v1616_v26 = vsub.f32 1.0, %v1615_v22  ;;  %1952 = vmatpush.msra.mxu0 %v1934_v13 }
 0x4bd   :  { %2263 = vtanh.f32 %v1576_v30  ;;  %v1658_v37 = vadd.f32 %v2260_v9, %v1657_v59  ;;  %vm1664_vm7 = vcmp.eq.f32.partialorder %v1663_v27, 8.507059e+37  ;;  %v1930_v30 = vld [vmem:[%s3275_s6 + $0x10] sm:$0xff] }
 0x4be   :  { %v1617_v44 = vmul.f32 %v2262_v19, %v1616_v26  ;;  %1975 = vmatpush.msra.mxu1 %v1930_v30  ;;  %v1928_v26 = vld [vmem:[%s3275_s6] sm:$0xff] }
 0x4bf   :  { %v1662_v54 = vsel %vm1661_vm6, %v2260_v9, %v1658_v37 }
 0x4c0   :  { %v1618_v50 = vadd.f32 %v2262_v19, %v1617_v44  ;;  %v1667_v25 = vsel %vm1664_vm7, %v1666_v46, %v1662_v54  ;;  %1976 = vmatpush.msra.mxu1 %v1929_v21 }
 0x4c1   :  { %v1692_v55 = vsub.f32 1.0, %v1667_v25  ;;  %v1694_v6 = vmul.f32 %v1667_v25, %v3142_v12 }
 0x4c2   :  { %v1622_v31 = vsel %vm1621_vm2, %v2262_v19, %v1618_v50  ;;  %v1933_v19 = vld [vmem:[%s3274_s7 + $0x8] sm:$0xff]  ;;  %1977 = vmatpush.msra.mxu1 %v1928_v26 }
 0x4c3   :  { %v2264_v57 = vpop.eup %2263  ;;  %v1627_v36 = vsel %vm1624_vm3, %v1626_v29, %v1622_v31  ;;  %1953 = vmatpush.msra.mxu0 %v1933_v19 }
 0x4c4   :  { %v1579_v3 = vmul.f32 %v2264_v57, %v1578_v14  ;;  %v1689_v38 = vmul.f32 %v1687_v32, %v1627_v36 }
 0x4c5   :  { %1954 = vmatpush.msra.mxu0 %v1932_v24 }
 0x4c6   :  { %v3182_v33 = vadd.f32 %v1580_v28, %v1579_v3  ;;  %v1690_v40 = vadd.f32 %v2102_v63, %v1689_v38 }
 0x4c8   :  { %2111 = vmatmul.msk.f32.vlgmr.msra.gmra.mxu2 %vm63_vm0, %v3182_v33  ;;  %2113 = vmatmul.msk.f32.vlgmr.msra.gmra.mxu3 %vm63_vm0, %v3182_v33  ;;  %2265 = vtanh.f32 %v1690_v40 }
 0x4c9   :  { %2115 = vmatmul.msk.f32.vlgmr.msrb.gmra.mxu0 %vm63_vm0, %v3182_v33 }
 0x4ce   :  { %v2266_v56 = vpop.eup %2265 }
 0x4cf   :  { %v1693_v58 = vmul.f32 %v2266_v56, %v1692_v55 }
 0x4d1   :  { %v3197_v42 = vadd.f32 %v1694_v6, %v1693_v58 }
 0x4d3   :  { %2116 = vmatmul.msk.f32.vlgmr.msrb.gmra.mxu1 %vm63_vm0, %v3197_v42  ;;  %2118 = vmatmul.msk.f32.vlgmr.msrb.gmra.mxu2 %vm63_vm0, %v3197_v42 }
 0x4d4   :  { %2120 = vmatmul.msk.f32.vlgmr.msrb.gmra.mxu3 %vm63_vm0, %v3197_v42 }
 0x546   :  { %v1800_v3 = vpop.f32.mrf.mxu0 }
 0x547   :  { %v1801_v32 = vadd.f32 %v3034_v41, %v1800_v3 }
 0x54b   :  { %v1720_v12 = vpop.f32.mrf.mxu2  ;;  %v1760_v47 = vpop.f32.mrf.mxu3 }
 0x54c   :  { %v1723_v49 = vadd.f32 %v2108_v39, %v1720_v12  ;;  %v1763_v48 = vadd.f32 %v2109_v43, %v1760_v47 }
 0x54e   :  { %v2112_v34 = vmul.f32 -1.442695, %v1723_v49  ;;  %v2114_v51 = vmul.f32 -1.442695, %v1763_v48 }
 0x550   :  { %2267 = vpow2.f32 %v2112_v34  ;;  %v1833_v52 = vpop.f32.mrf.mxu1 }
 0x551   :  { %2269 = vpow2.f32 %v2114_v51  ;;  %v1836_v17 = vadd.f32 %v1833_v52, %v1810_v62 }
 0x553   :  { %v2117_v0 = vmul.f32 -1.442695, %v1836_v17 }
 0x556   :  { %v2268_v35 = vpop.eup %2267  ;;  %v1873_v9 = vpop.f32.mrf.mxu2 }
 0x557   :  { %v2270_v2 = vpop.eup %2269  ;;  %v1727_v60 = vadd.f32 1.0, %v2268_v35  ;;  %v1876_v7 = vadd.f32 %v1873_v9, %v1811_v5  ;;  %v1913_v47 = vpop.f32.mrf.mxu3 }
 0x558   :  { %v3214_v1 = vadd.f32 1.0, %v2270_v2  ;;  %v1914_v52 = vadd.f32 %v3046_v15, %v1913_v47 }
 0x559   :  { %2271 = vrcp.f32 %v1727_v60  ;;  %v2119_v8 = vmul.f32 -1.442695, %v1876_v7  ;;  %v1739_v44 = vand.u32 2147483648, %v1727_v60  ;;  %v1737_v59 = vand.u32 2147483647, %v1727_v60 }
 0x55a   :  { %2273 = vrcp.f32 %v3214_v1  ;;  %vm1733_vm9 = vweird.f32 %v1727_v60  ;;  %v1779_v40 = vand.u32 2147483648, %v3214_v1  ;;  %vm1773_vm13 = vweird.f32 %v3214_v1 }
 0x55b   :  { %2275 = vpow2.f32 %v2117_v0  ;;  %v1740_v31 = vor.u32 1.1754944e-38, %v1739_v44  ;;  %vm1738_vm11 = vcmp.eq.f32.partialorder %v1737_v59, 8.507059e+37  ;;  %v1777_v54 = vand.u32 2147483647, %v3214_v1 }
 0x55c   :  { %2277 = vpow2.f32 %v2119_v8  ;;  %v1780_v58 = vor.u32 1.1754944e-38, %v1779_v40 }
 0x55d   :  { %vm1778_vm15 = vcmp.eq.f32.partialorder %v1777_v54, 8.507059e+37 }
 0x55f   :  { %v2272_v4 = vpop.eup %2271 }
 0x560   :  { %v2274_v16 = vpop.eup %2273  ;;  %v1729_v18 = vmul.f32 %v2272_v4, %v1727_v60  ;;  %vm1734_vm8 = vweird.f32 %v2272_v4 }
 0x561   :  { %v2276_v22 = vpop.eup %2275  ;;  %v1769_v20 = vmul.f32 %v2274_v16, %v3214_v1  ;;  %vm1735_vm10 = vmor %vm1733_vm9, %vm1734_vm8  ;;  %vm1774_vm12 = vweird.f32 %v2274_v16  ;;  %v1812_v1 = vld [vmem:[%s3273_s1 + $0x10] sm:$0xff]  ;;  %vm1987_vm9 = vcmask 7168  }
 0x562   :  { %v1730_v45 = vsub.f32 1.0, %v1729_v18  ;;  %v1840_v14 = vadd.f32 1.0, %v2276_v22  ;;  %v2278_v53 = vpop.eup %2277  ;;  %vm1775_vm14 = vmor %vm1773_vm13, %vm1774_vm12 }
 0x563   :  { %v1770_v23 = vsub.f32 1.0, %v1769_v20  ;;  %v1880_v29 = vadd.f32 1.0, %v2278_v53 }
 0x564   :  { %v1731_v57 = vmul.f32 %v2272_v4, %v1730_v45  ;;  %2279 = vrcp.f32 %v1840_v14  ;;  %v1850_v6 = vand.u32 2147483647, %v1840_v14  ;;  %v1852_v39 = vand.u32 2147483648, %v1840_v14 }
 0x565   :  { %v1771_v50 = vmul.f32 %v2274_v16, %v1770_v23  ;;  %2281 = vrcp.f32 %v1880_v29  ;;  %vm1846_vm2 = vweird.f32 %v1840_v14  ;;  %v1892_v51 = vand.u32 2147483648, %v1880_v29 }
 0x566   :  { %v1732_v28 = vadd.f32 %v2272_v4, %v1731_v57  ;;  %vm1851_vm4 = vcmp.eq.f32.partialorder %v1850_v6, 8.507059e+37  ;;  %v1853_v62 = vor.u32 1.1754944e-38, %v1852_v39  ;;  %vm1886_vm6 = vweird.f32 %v1880_v29 }
 0x567   :  { %v1772_v36 = vadd.f32 %v2274_v16, %v1771_v50  ;;  %v1890_v0 = vand.u32 2147483647, %v1880_v29  ;;  %v1893_v11 = vor.u32 1.1754944e-38, %v1892_v51 }
 0x568   :  { %v1736_v37 = vsel %vm1735_vm10, %v2272_v4, %v1732_v28 }
 0x569   :  { %v1741_v63 = vsel %vm1738_vm11, %v1740_v31, %v1736_v37  ;;  %v1776_v55 = vsel %vm1775_vm14, %v2274_v16, %v1772_v36  ;;  %vm1891_vm8 = vcmp.eq.f32.partialorder %v1890_v0, 8.507059e+37 }
 0x56a   :  { %v2280_v38 = vpop.eup %2279  ;;  %v1803_v27 = vmul.f32 %v1801_v32, %v1741_v63  ;;  %v1781_v49 = vsel %vm1778_vm15, %v1780_v58, %v1776_v55 }
 0x56b   :  { %v1842_v46 = vmul.f32 %v2280_v38, %v1840_v14  ;;  %v2282_v56 = vpop.eup %2281  ;;  %vm1847_vm1 = vweird.f32 %v2280_v38  ;;  %v1806_v2 = vsub.f32 1.0, %v1781_v49  ;;  %v1808_v10 = vmul.f32 %v1781_v49, %v3182_v33 }
 0x56c   :  { %v1804_v41 = vadd.f32 %v2110_v61, %v1803_v27  ;;  %v1882_v43 = vmul.f32 %v2282_v56, %v1880_v29  ;;  %vm1848_vm3 = vmor %vm1846_vm2, %vm1847_vm1  ;;  %vm1887_vm5 = vweird.f32 %v2282_v56  ;;  %v14_v33 = vstv %s3276_s8 }
 0x56d   :  { %v1843_v25 = vsub.f32 1.0, %v1842_v46  ;;  %vm1888_vm7 = vmor %vm1886_vm6, %vm1887_vm5  ;;  %15 = vst [vmem:[#allocation4] sm:$0x1] %v14_v33 }
 0x56e   :  { %2283 = vtanh.f32 %v1804_v41  ;;  %v1883_v48 = vsub.f32 1.0, %v1882_v43 }
 0x56f   :  { %v1844_v12 = vmul.f32 %v2280_v38, %v1843_v25 }
 0x570   :  { %v1884_v17 = vmul.f32 %v2282_v56, %v1883_v48 }
 0x571   :  { %v1845_v34 = vadd.f32 %v2280_v38, %v1844_v12 }
 0x572   :  { %v1885_v9 = vadd.f32 %v2282_v56, %v1884_v17 }
 0x573   :  { %v1849_v35 = vsel %vm1848_vm3, %v2280_v38, %v1845_v34 }
 0x574   :  { %v2284_v60 = vpop.eup %2283  ;;  %v1854_v5 = vsel %vm1851_vm4, %v1853_v62, %v1849_v35  ;;  %v1889_v15 = vsel %vm1888_vm7, %v2282_v56, %v1885_v9  ;;  %v2126_v24 = vld [vmem:[#allocation4] ss:$0 sm:$0xff] }
 0x575   :  { %v1916_v7 = vmul.f32 %v1914_v52, %v1854_v5  ;;  %v1807_v8 = vmul.f32 %v2284_v60, %v1806_v2  ;;  %v1894_v30 = vsel %vm1891_vm8, %v1893_v11, %v1889_v15 }
 0x576   :  { %v1919_v16 = vsub.f32 1.0, %v1894_v30  ;;  %v1921_v21 = vmul.f32 %v1894_v30, %v3197_v42 }
 0x577   :  { %v1917_v4 = vadd.f32 %v1916_v7, %v1812_v1  ;;  %v1809_v13 = vadd.f32 %v1808_v10, %v1807_v8 }
 0x579   :  { %2285 = vtanh.f32 %v1917_v4  ;;  %1923 = vst.msk [vmem:[#allocation2] sm:$0xff] %vm63_vm0, %v1809_v13  ;;  %2122 = vmatmul.msk.f32.vlgmr.msra.gmra.mxu1 %vm63_vm0, %v1809_v13 }
 0x57f   :  { %v2286_v18 = vpop.eup %2285 }
 0x580   :  { %v1920_v19 = vmul.f32 %v2286_v18, %v1919_v16 }
 0x582   :  { %v1922_v22 = vadd.f32 %v1921_v21, %v1920_v19 }
 0x584   :  { %1924 = vst.msk [vmem:[#allocation3] sm:$0xff] %vm63_vm0, %v1922_v22  ;;  %2121 = vmatmul.msk.f32.vlgmr.msra.gmra.mxu0 %vm63_vm0, %v1922_v22 }
 0x5f6   :  { %v1979_v20 = vpop.f32.mrf.mxu1 }
 0x601   :  { %v1956_v26 = vpop.f32.mrf.mxu0 }
 0x602   :  { %v1980_v45 = vadd.f32 %v1979_v20, %v1956_v26 }
 0x604   :  { %v1986_v14 = vadd.f32 %v2126_v24, %v1980_v45 }
 0x606   :  { %1988 = vst.msk [vmem:[%s3277_s9] sm:$0xff] %vm1987_vm9, %v1986_v14 }

</bundles_post_ra>
